<compile_context>
chip_gen: v5e
topology: v5e:2x2
jax: 0.10.0
libtpu: 0.0.40
codegen_flags: <defaults>
</compile_context>

<pallas_src>
import jax
import jax.numpy as jnp
from jax.experimental import pallas as pl
from jax.experimental.pallas import tpu as pltpu

LRN_SIZE = 3
LRN_ALPHA = 1e-4
LRN_BETA = 0.75
LRN_K = 1.0
POOL = 5


def _lrn_channel_rows(x):
    """PyTorch LocalResponseNorm(size=3) across axis 0 (channels are rows)."""
    c = x.shape[0]
    sq = x * x
    prev = pltpu.roll(sq, 1, 0)        # row i <- sq[i-1]  (row 0 wraps -> masked)
    nxt = pltpu.roll(sq, c - 1, 0)     # row i <- sq[i+1]  (last row wraps -> masked)
    row = jax.lax.broadcasted_iota(jnp.int32, x.shape, 0)
    prev = jnp.where(row == 0, 0.0, prev)
    nxt = jnp.where(row == c - 1, 0.0, nxt)
    t = LRN_K + (LRN_ALPHA / LRN_SIZE) * (prev + sq + nxt)
    # t ** (-0.75) == rsqrt(t) * rsqrt(sqrt(t)) : stays on the EUP slot, no pow.
    return x * (jax.lax.rsqrt(t) * jax.lax.rsqrt(jnp.sqrt(t)))


def _cnn_hsi_kernel(x_ref, w1_ref, b1_ref, w2_ref, b2_ref, w3_ref, b3_ref,
                    pool_ref, o_ref):
    x = x_ref[0]                                   # (Cin, H*W)
    # layer1: 1x1 conv -> ReLU -> LRN(3) -> Dropout (identity at inference)
    h1 = jnp.dot(w1_ref[...], x, preferred_element_type=jnp.float32) + b1_ref[...]
    h1 = _lrn_channel_rows(jnp.maximum(h1, 0.0))
    # layer2
    h2 = jnp.dot(w2_ref[...], h1, preferred_element_type=jnp.float32) + b2_ref[...]
    h2 = _lrn_channel_rows(jnp.maximum(h2, 0.0))
    # layer3: 1x1 conv -> ReLU
    h3 = jnp.dot(w3_ref[...], h2, preferred_element_type=jnp.float32) + b3_ref[...]
    h3 = jnp.maximum(h3, 0.0)
    # AvgPool2d(5, stride=1) as one MXU matmul with the banded pooling matrix.
    # Result (nc, Ho*Wo) already matches the NCHW flatten (c-major) ordering.
    o_ref[0] = jnp.dot(h3, pool_ref[...], preferred_element_type=jnp.float32)


def _pool_matrix_t(h, w, k):
    """S^T (H*W, Ho*Wo) with S[y'*Wo+x', y*W+x] = 1/k^2 inside the kxk window."""
    ho, wo = h - k + 1, w - k + 1

    def band(o, i):
        r = jnp.arange(o)[:, None]
        c = jnp.arange(i)[None, :]
        return ((c >= r) & (c < r + k)).astype(jnp.float32)

    s = jnp.kron(band(ho, h), band(wo, w)) / float(k * k)   # (Ho*Wo, H*W)
    return s.T                                              # (H*W, Ho*Wo)


def cnn_hsi_forward(x_nchw, params):
    n, cin, h, w = x_nchw.shape
    c1 = params["w1"].shape[0]
    c2 = params["w2"].shape[0]
    nc = params["w3"].shape[0]
    hw = h * w
    ho, wo = h - (POOL - 1), w - (POOL - 1)
    howo = ho * wo

    x3 = x_nchw.reshape(n, cin, hw)                 # free (NCHW is contiguous)
    pool_t = _pool_matrix_t(h, w, POOL)

    out = pl.pallas_call(
        _cnn_hsi_kernel,
        out_shape=jax.ShapeDtypeStruct((n, nc, howo), jnp.float32),
        grid_spec=pltpu.PrefetchScalarGridSpec(
            num_scalar_prefetch=0,
            grid=(n,),
            in_specs=[
                pl.BlockSpec((1, cin, hw), lambda i: (i, 0, 0)),
                pl.BlockSpec((c1, cin), lambda i: (0, 0)),
                pl.BlockSpec((c1, 1), lambda i: (0, 0)),
                pl.BlockSpec((c2, c1), lambda i: (0, 0)),
                pl.BlockSpec((c2, 1), lambda i: (0, 0)),
                pl.BlockSpec((nc, c2), lambda i: (0, 0)),
                pl.BlockSpec((nc, 1), lambda i: (0, 0)),
                pl.BlockSpec((hw, howo), lambda i: (0, 0)),
            ],
            out_specs=pl.BlockSpec((1, nc, howo), lambda i: (i, 0, 0)),
        ),
        compiler_params=pltpu.CompilerParams(
            dimension_semantics=("parallel",)),
    )(x3,
      params["w1"], params["b1"].reshape(-1, 1),
      params["w2"], params["b2"].reshape(-1, 1),
      params["w3"], params["b3"].reshape(-1, 1),
      pool_t)
    return out.reshape(n, -1)                       # metadata-only reshape


def init_params(key, in_channel, nc):
    """Deterministic synthetic weights in PyTorch Conv2d(1x1) layout."""
    ks = jax.random.split(key, 6)

    def conv_w(k, cout, cin):
        return jax.random.normal(k, (cout, cin), jnp.float32) / float(cin) ** 0.5

    def conv_b(k, cout):
        return jax.random.normal(k, (cout,), jnp.float32) * 0.01

    return {
        "w1": conv_w(ks[0], 128, in_channel), "b1": conv_b(ks[1], 128),
        "w2": conv_w(ks[2], 64, 128),         "b2": conv_b(ks[3], 64),
        "w3": conv_w(ks[4], nc, 64),          "b3": conv_b(ks[5], nc),
    }


def _reference_forward(x_nchw, params):
    """Plain-JAX reference mirroring the PyTorch module (inference mode)."""
    def conv1x1(x, wgt, b):
        return jnp.einsum("oc,nchw->nohw", wgt, x) + b[None, :, None, None]

    def lrn(x):
        sq = x * x
        p = jnp.pad(sq, ((0, 0), (1, 1), (0, 0), (0, 0)))
        s = p[:, :-2] + p[:, 1:-1] + p[:, 2:]
        return x / (LRN_K + (LRN_ALPHA / LRN_SIZE) * s) ** LRN_BETA

    h1 = lrn(jax.nn.relu(conv1x1(x_nchw, params["w1"], params["b1"])))
    h2 = lrn(jax.nn.relu(conv1x1(h1, params["w2"], params["b2"])))
    h3 = jax.nn.relu(conv1x1(h2, params["w3"], params["b3"]))
    n, c, hh, ww = h3.shape
    ho, wo = hh - (POOL - 1), ww - (POOL - 1)
    acc = jnp.zeros((n, c, ho, wo), jnp.float32)
    for dy in range(POOL):
        for dx in range(POOL):
            acc = acc + h3[:, :, dy:dy + ho, dx:dx + wo]
    return (acc / float(POOL * POOL)).reshape(n, -1)


if __name__ == "__main__":
    N, IN_CH, SPATIAL, NC = 2, 4, 16, 8
    key = jax.random.PRNGKey(0)
    k_x, k_p = jax.random.split(key)
    x = jax.random.normal(k_x, (N, IN_CH, SPATIAL, SPATIAL), jnp.float32)
    params = init_params(k_p, IN_CH, NC)

    out = jax.block_until_ready(cnn_hsi_forward(x, params))
    ref = jax.block_until_ready(_reference_forward(x, params))

    assert out.shape == (N, NC * (SPATIAL - 4) * (SPATIAL - 4)), out.shape
    max_err = jnp.max(jnp.abs(out - ref))
    assert jnp.allclose(out, ref, atol=2e-3, rtol=2e-3), (
        f"mismatch vs reference (max abs err {max_err})")
    print("KERNEL_OK")
</pallas_src>

<mosaic_0001>
module attributes {stable_mosaic.version = 11 : i64} {
  func.func @_cnn_hsi_kernel(%arg0: i32, %arg1: memref<1x4x256xf32, #tpu.memory_space<vmem>>, %arg2: memref<128x4xf32, #tpu.memory_space<vmem>>, %arg3: memref<128x1xf32, #tpu.memory_space<vmem>>, %arg4: memref<64x128xf32, #tpu.memory_space<vmem>>, %arg5: memref<64x1xf32, #tpu.memory_space<vmem>>, %arg6: memref<8x64xf32, #tpu.memory_space<vmem>>, %arg7: memref<8x1xf32, #tpu.memory_space<vmem>>, %arg8: memref<256x144xf32, #tpu.memory_space<vmem>>, %arg9: memref<1x8x144xf32, #tpu.memory_space<vmem>>) attributes {dimension_semantics = [#tpu.dimension_semantics<parallel>], iteration_bounds = array<i64: 2>, scalar_prefetch = 0 : i64, scratch_operands = 0 : i64, tpu.core_type = #tpu.core_type<tc>, window_params = [{transform_indices = @transform_0, window_bounds = array<i64: 1, 4, 256>}, {pipeline_mode = #tpu.pipeline_mode<synchronous>, transform_indices = @transform_1, window_bounds = array<i64: 128, 4>}, {pipeline_mode = #tpu.pipeline_mode<synchronous>, transform_indices = @transform_2, window_bounds = array<i64: 128, 1>}, {pipeline_mode = #tpu.pipeline_mode<synchronous>, transform_indices = @transform_3, window_bounds = array<i64: 64, 128>}, {pipeline_mode = #tpu.pipeline_mode<synchronous>, transform_indices = @transform_4, window_bounds = array<i64: 64, 1>}, {pipeline_mode = #tpu.pipeline_mode<synchronous>, transform_indices = @transform_5, window_bounds = array<i64: 8, 64>}, {pipeline_mode = #tpu.pipeline_mode<synchronous>, transform_indices = @transform_6, window_bounds = array<i64: 8, 1>}, {pipeline_mode = #tpu.pipeline_mode<synchronous>, transform_indices = @transform_7, window_bounds = array<i64: 256, 144>}, {transform_indices = @transform_8, window_bounds = array<i64: 1, 8, 144>}]} {
    %c0 = arith.constant 0 : index
    %c0_0 = arith.constant 0 : index
    %c0_1 = arith.constant 0 : index
    %0 = vector.load %arg1[%c0, %c0_0, %c0_1] : memref<1x4x256xf32, #tpu.memory_space<vmem>>, vector<1x4x256xf32>
    %1 = vector.shape_cast %0 : vector<1x4x256xf32> to vector<4x256xf32>
    %c0_2 = arith.constant 0 : index
    %c0_3 = arith.constant 0 : index
    %2 = vector.load %arg2[%c0_2, %c0_3] : memref<128x4xf32, #tpu.memory_space<vmem>>, vector<128x4xf32>
    %cst = arith.constant dense<0.000000e+00> : vector<128x256xf32>
    %3 = tpu.matmul %2, %1, %cst {dimension_numbers = #tpu.dot_dimension_numbers<[1], [0], [0], [1], [0, 0, 1, 1], [], []>} : vector<128x4xf32>, vector<4x256xf32>, vector<128x256xf32> -> vector<128x256xf32>
    %c0_4 = arith.constant 0 : index
    %c0_5 = arith.constant 0 : index
    %4 = vector.load %arg3[%c0_4, %c0_5] : memref<128x1xf32, #tpu.memory_space<vmem>>, vector<128x1xf32>
    %5 = vector.broadcast %4 : vector<128x1xf32> to vector<128x256xf32>
    %6 = arith.addf %3, %5 : vector<128x256xf32>
    %cst_6 = arith.constant 0.000000e+00 : f32
    %7 = vector.broadcast %cst_6 : f32 to vector<128x256xf32>
    %8 = arith.maximumf %6, %7 : vector<128x256xf32>
    %9 = arith.mulf %8, %8 : vector<128x256xf32>
    %c1_i32 = arith.constant 1 : i32
    %10 = tpu.dynamic_rotate %9 by %c1_i32 dim 0 : vector<128x256xf32>, i32 -> vector<128x256xf32>
    %c127_i32 = arith.constant 127 : i32
    %11 = tpu.dynamic_rotate %9 by %c127_i32 dim 0 : vector<128x256xf32>, i32 -> vector<128x256xf32>
    %12 = tpu.iota {dimensions = array<i32: 0>} : vector<128x256xi32>
    %c0_i32 = arith.constant 0 : i32
    %13 = vector.broadcast %c0_i32 : i32 to vector<128x256xi32>
    %14 = arith.cmpi eq, %12, %13 : vector<128x256xi32>
    %cst_7 = arith.constant 0.000000e+00 : f32
    %15 = vector.broadcast %cst_7 : f32 to vector<128x256xf32>
    %16 = arith.select %14, %15, %10 : vector<128x256xi1>, vector<128x256xf32>
    %c127_i32_8 = arith.constant 127 : i32
    %17 = vector.broadcast %c127_i32_8 : i32 to vector<128x256xi32>
    %18 = arith.cmpi eq, %12, %17 : vector<128x256xi32>
    %cst_9 = arith.constant 0.000000e+00 : f32
    %19 = vector.broadcast %cst_9 : f32 to vector<128x256xf32>
    %20 = arith.select %18, %19, %11 : vector<128x256xi1>, vector<128x256xf32>
    %21 = arith.addf %16, %9 : vector<128x256xf32>
    %22 = arith.addf %21, %20 : vector<128x256xf32>
    %cst_10 = arith.constant 3.33333337E-5 : f32
    %23 = vector.broadcast %cst_10 : f32 to vector<128x256xf32>
    %24 = arith.mulf %23, %22 : vector<128x256xf32>
    %cst_11 = arith.constant 1.000000e+00 : f32
    %25 = vector.broadcast %cst_11 : f32 to vector<128x256xf32>
    %26 = arith.addf %25, %24 : vector<128x256xf32>
    %27 = math.rsqrt %26 : vector<128x256xf32>
    %28 = math.sqrt %26 : vector<128x256xf32>
    %29 = math.rsqrt %28 : vector<128x256xf32>
    %30 = arith.mulf %27, %29 : vector<128x256xf32>
    %31 = arith.mulf %8, %30 : vector<128x256xf32>
    %c0_12 = arith.constant 0 : index
    %c0_13 = arith.constant 0 : index
    %32 = vector.load %arg4[%c0_12, %c0_13] : memref<64x128xf32, #tpu.memory_space<vmem>>, vector<64x128xf32>
    %cst_14 = arith.constant dense<0.000000e+00> : vector<64x256xf32>
    %33 = tpu.matmul %32, %31, %cst_14 {dimension_numbers = #tpu.dot_dimension_numbers<[1], [0], [0], [1], [0, 0, 1, 1], [], []>} : vector<64x128xf32>, vector<128x256xf32>, vector<64x256xf32> -> vector<64x256xf32>
    %c0_15 = arith.constant 0 : index
    %c0_16 = arith.constant 0 : index
    %34 = vector.load %arg5[%c0_15, %c0_16] : memref<64x1xf32, #tpu.memory_space<vmem>>, vector<64x1xf32>
    %35 = vector.broadcast %34 : vector<64x1xf32> to vector<64x256xf32>
    %36 = arith.addf %33, %35 : vector<64x256xf32>
    %cst_17 = arith.constant 0.000000e+00 : f32
    %37 = vector.broadcast %cst_17 : f32 to vector<64x256xf32>
    %38 = arith.maximumf %36, %37 : vector<64x256xf32>
    %39 = arith.mulf %38, %38 : vector<64x256xf32>
    %c1_i32_18 = arith.constant 1 : i32
    %40 = tpu.dynamic_rotate %39 by %c1_i32_18 dim 0 : vector<64x256xf32>, i32 -> vector<64x256xf32>
    %c63_i32 = arith.constant 63 : i32
    %41 = tpu.dynamic_rotate %39 by %c63_i32 dim 0 : vector<64x256xf32>, i32 -> vector<64x256xf32>
    %42 = tpu.iota {dimensions = array<i32: 0>} : vector<64x256xi32>
    %c0_i32_19 = arith.constant 0 : i32
    %43 = vector.broadcast %c0_i32_19 : i32 to vector<64x256xi32>
    %44 = arith.cmpi eq, %42, %43 : vector<64x256xi32>
    %cst_20 = arith.constant 0.000000e+00 : f32
    %45 = vector.broadcast %cst_20 : f32 to vector<64x256xf32>
    %46 = arith.select %44, %45, %40 : vector<64x256xi1>, vector<64x256xf32>
    %c63_i32_21 = arith.constant 63 : i32
    %47 = vector.broadcast %c63_i32_21 : i32 to vector<64x256xi32>
    %48 = arith.cmpi eq, %42, %47 : vector<64x256xi32>
    %cst_22 = arith.constant 0.000000e+00 : f32
    %49 = vector.broadcast %cst_22 : f32 to vector<64x256xf32>
    %50 = arith.select %48, %49, %41 : vector<64x256xi1>, vector<64x256xf32>
    %51 = arith.addf %46, %39 : vector<64x256xf32>
    %52 = arith.addf %51, %50 : vector<64x256xf32>
    %cst_23 = arith.constant 3.33333337E-5 : f32
    %53 = vector.broadcast %cst_23 : f32 to vector<64x256xf32>
    %54 = arith.mulf %53, %52 : vector<64x256xf32>
    %cst_24 = arith.constant 1.000000e+00 : f32
    %55 = vector.broadcast %cst_24 : f32 to vector<64x256xf32>
    %56 = arith.addf %55, %54 : vector<64x256xf32>
    %57 = math.rsqrt %56 : vector<64x256xf32>
    %58 = math.sqrt %56 : vector<64x256xf32>
    %59 = math.rsqrt %58 : vector<64x256xf32>
    %60 = arith.mulf %57, %59 : vector<64x256xf32>
    %61 = arith.mulf %38, %60 : vector<64x256xf32>
    %c0_25 = arith.constant 0 : index
    %c0_26 = arith.constant 0 : index
    %62 = vector.load %arg6[%c0_25, %c0_26] : memref<8x64xf32, #tpu.memory_space<vmem>>, vector<8x64xf32>
    %cst_27 = arith.constant dense<0.000000e+00> : vector<8x256xf32>
    %63 = tpu.matmul %62, %61, %cst_27 {dimension_numbers = #tpu.dot_dimension_numbers<[1], [0], [0], [1], [0, 0, 1, 1], [], []>} : vector<8x64xf32>, vector<64x256xf32>, vector<8x256xf32> -> vector<8x256xf32>
    %c0_28 = arith.constant 0 : index
    %c0_29 = arith.constant 0 : index
    %64 = vector.load %arg7[%c0_28, %c0_29] : memref<8x1xf32, #tpu.memory_space<vmem>>, vector<8x1xf32>
    %65 = vector.broadcast %64 : vector<8x1xf32> to vector<8x256xf32>
    %66 = arith.addf %63, %65 : vector<8x256xf32>
    %cst_30 = arith.constant 0.000000e+00 : f32
    %67 = vector.broadcast %cst_30 : f32 to vector<8x256xf32>
    %68 = arith.maximumf %66, %67 : vector<8x256xf32>
    %c0_31 = arith.constant 0 : index
    %c0_32 = arith.constant 0 : index
    %69 = vector.load %arg8[%c0_31, %c0_32] : memref<256x144xf32, #tpu.memory_space<vmem>>, vector<256x144xf32>
    %cst_33 = arith.constant dense<0.000000e+00> : vector<8x144xf32>
    %70 = tpu.matmul %68, %69, %cst_33 {dimension_numbers = #tpu.dot_dimension_numbers<[1], [0], [0], [1], [0, 0, 1, 1], [], []>} : vector<8x256xf32>, vector<256x144xf32>, vector<8x144xf32> -> vector<8x144xf32>
    %c0_34 = arith.constant 0 : index
    %c0_35 = arith.constant 0 : index
    %c0_36 = arith.constant 0 : index
    %71 = vector.load %arg9[%c0_34, %c0_35, %c0_36] : memref<1x8x144xf32, #tpu.memory_space<vmem>>, vector<1x8x144xf32>
    %72 = vector.shape_cast %71 : vector<1x8x144xf32> to vector<8x144xf32>
    %73 = vector.shape_cast %70 : vector<8x144xf32> to vector<1x8x144xf32>
    tpu.vector_store %arg9[%c0_34, %c0_35, %c0_36], %73 {strides = array<i32>} : memref<1x8x144xf32, #tpu.memory_space<vmem>>, vector<1x8x144xf32>,
    return
  }
  func.func @transform_0(%arg0: i32) -> (i32, i32, i32) {
    %c0_i32 = arith.constant 0 : i32
    %c0_i32_0 = arith.constant 0 : i32
    %c0_i32_1 = arith.constant 0 : i32
    return %arg0, %c0_i32, %c0_i32_0 : i32, i32, i32
  }
  func.func @transform_1(%arg0: i32) -> (i32, i32) {
    %c0_i32 = arith.constant 0 : i32
    %c0_i32_0 = arith.constant 0 : i32
    %c0_i32_1 = arith.constant 0 : i32
    return %c0_i32, %c0_i32_0 : i32, i32
  }
  func.func @transform_2(%arg0: i32) -> (i32, i32) {
    %c0_i32 = arith.constant 0 : i32
    %c0_i32_0 = arith.constant 0 : i32
    %c0_i32_1 = arith.constant 0 : i32
    return %c0_i32, %c0_i32_0 : i32, i32
  }
  func.func @transform_3(%arg0: i32) -> (i32, i32) {
    %c0_i32 = arith.constant 0 : i32
    %c0_i32_0 = arith.constant 0 : i32
    %c0_i32_1 = arith.constant 0 : i32
    return %c0_i32, %c0_i32_0 : i32, i32
  }
  func.func @transform_4(%arg0: i32) -> (i32, i32) {
    %c0_i32 = arith.constant 0 : i32
    %c0_i32_0 = arith.constant 0 : i32
    %c0_i32_1 = arith.constant 0 : i32
    return %c0_i32, %c0_i32_0 : i32, i32
  }
  func.func @transform_5(%arg0: i32) -> (i32, i32) {
    %c0_i32 = arith.constant 0 : i32
    %c0_i32_0 = arith.constant 0 : i32
    %c0_i32_1 = arith.constant 0 : i32
    return %c0_i32, %c0_i32_0 : i32, i32
  }
  func.func @transform_6(%arg0: i32) -> (i32, i32) {
    %c0_i32 = arith.constant 0 : i32
    %c0_i32_0 = arith.constant 0 : i32
    %c0_i32_1 = arith.constant 0 : i32
    return %c0_i32, %c0_i32_0 : i32, i32
  }
  func.func @transform_7(%arg0: i32) -> (i32, i32) {
    %c0_i32 = arith.constant 0 : i32
    %c0_i32_0 = arith.constant 0 : i32
    %c0_i32_1 = arith.constant 0 : i32
    return %c0_i32, %c0_i32_0 : i32, i32
  }
  func.func @transform_8(%arg0: i32) -> (i32, i32, i32) {
    %c0_i32 = arith.constant 0 : i32
    %c0_i32_0 = arith.constant 0 : i32
    %c0_i32_1 = arith.constant 0 : i32
    return %arg0, %c0_i32, %c0_i32_0 : i32, i32, i32
  }
}

</mosaic_0001>

<bundles_post_ra>
// kernel: tpu_custom_call.1
= control target key start
LH: loop header
LB: loop body
LE: loop exit
PB: predicated region body
PF: predicated region fallthrough
CT: control target
= control target key end

     0   :  { %13 = vsyncpa [#allocation3], 0  ;;  %s6687_s0 = inlined_call_operand.vmem [shape: f32[2,4,256], index: 0, kind: input, shape index: {}]   ;;  %s6688_s1 = inlined_call_operand.vmem [shape: f32[128,4], index: 1, kind: input, shape index: {}]   ;;  %s6689_s2 = inlined_call_operand.vmem [shape: f32[128,1], index: 2, kind: input, shape index: {}]   ;;  %s6690_s3 = inlined_call_operand.vmem [shape: f32[64,128], index: 3, kind: input, shape index: {}]   ;;  %s6691_s4 = inlined_call_operand.vmem [shape: f32[64,1], index: 4, kind: input, shape index: {}]   ;;  %s6692_s5 = inlined_call_operand.vmem [shape: f32[8,64], index: 5, kind: input, shape index: {}]   ;;  %s6693_s6 = inlined_call_operand.vmem [shape: f32[8,1], index: 6, kind: input, shape index: {}]   ;;  %s6694_s7 = inlined_call_operand.vmem [shape: f32[256,144], index: 7, kind: input, shape index: {}]   ;;  %s6695_s8 = inlined_call_operand.hbm [shape: f32[2,8,144], index: 8, kind: output, shape index: {}]  }
   0x1   :  { %15 = vsyncpa [#allocation3 + $0x1], 0  ;;  %s3681_s27 = smov 0   ;;  %s3683_s28 = smov 0  }
   0x2   :  { %s3685_s29 = smov 0   ;;  %s3687_s30 = smov 0  }
   0x3 LB: > { %s3702_s9 = sadd.s32 4294967295, %s3633_s30   ;;  %s3286_s10 = sadd.s32 4294967294, %s3633_s30   ;;  %s3633_s30 = sphi %s3687_s30, %s7051_s30   ;;  %s3629_s29 = sphi %s3685_s29, %s7050_s29   ;;  %s3625_s28 = sphi %s3683_s28, %s7049_s28   ;;  %s3621_s27 = sphi %s3681_s27, %s7048_s27  }
   0x4   : > { %s3706_s11 = sadd.s32 1, %s3633_s30   ;;  %s201_s12 = sadd.s32 1, %s3629_s29 }
   0x5   : > { %s198_s13 = ssub.s32 %s3633_s30, %s3706_s11  ;;  %p211_p0 = scmp.ne.s32.totalorder %s3629_s29, %s3625_s28 }
   0x6   : > { %p199_p1 = scmp.eq.s32.totalorder %s198_s13, 0  ;;  %p212_p2 = scmp.eq.s32.totalorder %s3702_s9, 1 }
   0x7   : > { %p217_p3 = scmp.ne.s32.totalorder %s3625_s28, %s3621_s27  ;;  %p218_p4 = scmp.eq.s32.totalorder %s3286_s10, 1 }
   0x8   : > { %s3717_s14 = scalar_select %p199_p1, %s3629_s29, %s201_s12  }
   0x9   : > { %p3719_p5 = por %p212_p2, %p211_p0  ;;  %p3723_p6 = por %p218_p4, %p217_p3 }
   0xa   : > { %p3289_p7 = scmp.ge.s32.totalorder %s3633_s30, 1  ;;  %p265_p8 = scmp.lt.s32.totalorder %s3633_s30, 3 }
   0xc   : > { %p266_p9 = pnand %p3289_p7, %p265_p8 }
   0xe   : > { %269 = sbr.rel (%p266_p9) target bundleno = 1144 (0x478), region = 52 }
  0x13   : > { %v335_v0 = vld [vmem:[%s6689_s2 + $0x70] sm:$0xff]  ;;  %p299_p10 = scmp.lt.s32.totalorder %s3702_s9, 1  ;;  %v3635_v1 = vmov 0   ;;  %v321_v2 = vld [vmem:[%s6689_s2] sm:$0xff]  ;;  %v336_v5 = vld [vmem:[%s6689_s2 + $0x78] sm:$0xff]  ;;  %vm470_vm0 = vcmask 1043456  }
  0x14   : > { %3376 = vset.pattern.permute.xlu0 %v3635_v1  ;;  %3377 = vset.pattern.permute.xlu1 %v3635_v1  ;;  %v333_v3 = vld [vmem:[%s6689_s2 + $0x60] sm:$0xff]  ;;  %v334_v6 = vld [vmem:[%s6689_s2 + $0x68] sm:$0xff]  ;;  %v332_v7 = vld [vmem:[%s6689_s2 + $0x58] sm:$0xff]  ;;  %vm421_vm1 = vcmask 31744   ;;  %s296_s13 = sand.u32 1, %s3625_s28   ;;  %s3335_s18 = sshll.u32 %s3702_s9, 4 }
  0x15   : > { %409 = vperm.xlu0 %3376, %v335_v0   ;;  %s300_s21 = scalar_select %p299_p10, %s3702_s9, 1  ;;  %339 = vperm.xlu1 %3377, %v321_v2   ;;  %v305_v8 = vld [vmem:[%s6688_s1] sm:$0xff]  ;;  %v331_v11 = vld [vmem:[%s6689_s2 + $0x50] sm:$0xff]  ;;  %v330_v12 = vld [vmem:[%s6689_s2 + $0x48] sm:$0xff] }
  0x16   : > { %3378 = vset.pattern.permute.xlu2 %v3635_v1  ;;  %v329_v13 = vld [vmem:[%s6689_s2 + $0x40] sm:$0xff]  ;;  %v306_v14 = vld [vmem:[%s6688_s1 + $0x8] sm:$0xff]  ;;  %v328_v15 = vld [vmem:[%s6689_s2 + $0x38] sm:$0xff]  ;;  %s3290_s17 = sshll.u32 %s296_s13, 4  ;;  %s3211_s25 = scalar_lea.sflag [#allocation3], %s296_s13 }
  0x17   : > { %s3334_s24 = sshll.u32 %s300_s21, 3  ;;  %399 = vperm.xlu2 %3378, %v333_v3   ;;  %v327_v16 = vld [vmem:[%s6689_s2 + $0x30] sm:$0xff]  ;;  %v326_v17 = vld [vmem:[%s6689_s2 + $0x28] sm:$0xff]  ;;  %v325_v19 = vld [vmem:[%s6689_s2 + $0x20] sm:$0xff]  ;;  %s3222_s21 = scalar_lea.hbm %s6695_s8, %s3335_s18 }
  0x18   : > { %s303_s10 = scalar_lea.vmem %s6687_s0, %s3334_s24  ;;  %v307_v18 = vld [vmem:[%s6688_s1 + $0x10] sm:$0xff]  ;;  %v324_v20 = vld [vmem:[%s6689_s2 + $0x18] sm:$0xff]  ;;  %v322_v23 = vld [vmem:[%s6689_s2 + $0x8] sm:$0xff]  ;;  %s298_s22 = scalar_lea.vmem [#allocation2], %s3290_s17 }
  0x19   : > { %v304_v4 = vld [vmem:[%s303_s10] sm:$0xff]  ;;  %v323_v21 = vld [vmem:[%s6689_s2 + $0x10] sm:$0xff]  ;;  %v308_v22 = vld [vmem:[%s6688_s1 + $0x18] sm:$0xff]  ;;  %s3224_s23 = sshll.u32 %s298_s22, 4  ;;  %s3226_s24 = sshll.u32 %s3222_s21, 4  ;;  %s3225_s23 = int_to_ptr.vmem [resolvable:$true] %s3224_s23  ;;  %s3227_s24 = int_to_ptr.hbm [resolvable:$true] %s3226_s24 }
  0x1a   : > { %418 = vst [vmem:[#allocation1] ss:$2 sm:$0xff] %v304_v4  ;;  %v309_v24 = vld [vmem:[%s6688_s1 + $0x20] sm:$0xff]  ;;  %v310_v25 = vld [vmem:[%s6688_s1 + $0x28] sm:$0xff]  ;;  %v311_v26 = vld [vmem:[%s6688_s1 + $0x30] sm:$0xff]  ;;  %s3585_s9 = sshra.s32 %s3227_s24, 4  ;;  %s3586_s9 = int_to_ptr.hbm [resolvable:$true] %s3585_s9 }
  0x1b   : > { %v312_v27 = vld [vmem:[%s6688_s1 + $0x38] sm:$0xff]  ;;  %v313_v28 = vld [vmem:[%s6688_s1 + $0x40] sm:$0xff]  ;;  %v314_v30 = vld [vmem:[%s6688_s1 + $0x48] sm:$0xff]  ;;  %s3587_s26 = scalar_lea.hbm %s3586_s9, 16  ;;  %s3591_s17 = scalar_lea.hbm %s6695_s8, 32 }
  0x1c   : > { %v2136_v29 = vld [vmem:[%s6691_s4] sm:$0xff]  ;;  %v2142_v31 = vld [vmem:[%s6691_s4 + $0x30] sm:$0xff]  ;;  %v2139_v32 = vld [vmem:[%s6691_s4 + $0x18] sm:$0xff]  ;;  %p3588_p11 = scmp.ne.s32.totalorder %s3586_s9, %s3587_s26  ;;  %p3592_p0 = scmp.lt.s32.totalorder %s3586_s9, %s6695_s8 }
  0x1d   : > { %414 = vperm.xlu0 %3376, %v336_v5   ;;  %404 = vperm.xlu1 %3377, %v334_v6   ;;  %v315_v33 = vld [vmem:[%s6688_s1 + $0x50] sm:$0xff]  ;;  %v2141_v34 = vld [vmem:[%s6691_s4 + $0x28] sm:$0xff]  ;;  %v3011_v35 = vld [vmem:[%s6693_s6] sm:$0xff]  ;;  %p3593_p1 = scmp.lt.s32.totalorder %s3591_s17, %s3587_s26 }
  0x1e   : > { %v316_v36 = vld [vmem:[%s6688_s1 + $0x58] sm:$0xff]  ;;  %v2138_v37 = vld [vmem:[%s6691_s4 + $0x10] sm:$0xff]  ;;  %v317_v38 = vld [vmem:[%s6688_s1 + $0x60] sm:$0xff]  ;;  %p3589_p12 = pnand %p3588_p11, %p3719_p5 }
  0x1f   : > { %394 = vperm.xlu2 %3378, %v332_v7   ;;  %v2143_v39 = vld [vmem:[%s6691_s4 + $0x38] sm:$0xff]  ;;  %v318_v40 = vld [vmem:[%s6688_s1 + $0x68] sm:$0xff]  ;;  %v2140_v41 = vld [vmem:[%s6691_s4 + $0x20] sm:$0xff]  ;;  %p3594_p2 = por %p3593_p1, %p3592_p0 }
  0x20   : > { %v319_v44 = vld [vmem:[%s6688_s1 + $0x70] sm:$0xff]  ;;  %v2137_v46 = vld [vmem:[%s6691_s4 + $0x8] sm:$0xff]  ;;  %v320_v48 = vld [vmem:[%s6688_s1 + $0x78] sm:$0xff]  ;;  %p3590_p13 = pneg %p3589_p12 }
  0x21   : > { %v419_v9 = vld.sshfl [vmem:[#allocation1] sm:$0xff pattern:$0x75316420]  ;;  %v420_v10 = vld.sshfl [vmem:[#allocation1 + $0x8] sm:$0xff pattern:$0x75316420] }
  0x22   : > { %3293 = vmatpush.msk.msra.mxu0 %vm470_vm0, %v419_v9  ;;  %3310 = vmatpush.msk.msra.mxu1 %vm470_vm0, %v420_v10  ;;  %p3595_p3 = pnand %p3594_p2, %p3590_p13 }
  0x23   : > { %3294 = vmatmul.msk.f32.vlgmr.msra.gmra.mxu0 %vm421_vm1, %v305_v8  ;;  %3311 = vmatmul.msk.f32.vlgmr.msra.gmra.mxu1 %vm421_vm1, %v305_v8  ;;  %v701_v8 = vlaneseq }
  0x25   : > { %389 = vperm.xlu0 %3376, %v331_v11   ;;  %384 = vperm.xlu1 %3377, %v330_v12  }
  0x27   : > { %379 = vperm.xlu2 %3378, %v329_v13   ;;  %v3923_v13 = vshrl.u32 %v701_v8, 7 }
  0x29   : > { %6792 = vst [vmem:[#allocation7_spill] sm:$0xff] %v3923_v13  ;;  %vm6781_vm2 = vcmp.lt.s32.totalorder %v3923_v13, 1  ;;  %vm6761_vm3 = vcmp.lt.s32.totalorder %v3923_v13, 7  ;;  %vm6779_vm4 = vcmp.eq.s32.totalorder %v3923_v13, 0 }
  0x2b   : > { %3295 = vmatmul.msk.f32.gmra.mxu0 %vm421_vm1, %v306_v14  ;;  %3312 = vmatmul.msk.f32.gmra.mxu1 %vm421_vm1, %v306_v14 }
  0x2d   : > { %374 = vperm.xlu0 %3376, %v328_v15   ;;  %369 = vperm.xlu1 %3377, %v327_v16  }
  0x2f   : > { %364 = vperm.xlu2 %3378, %v326_v17  }
  0x33   : > { %3296 = vmatmul.msk.f32.gmra.mxu0 %vm421_vm1, %v307_v18  ;;  %3313 = vmatmul.msk.f32.gmra.mxu1 %vm421_vm1, %v307_v18 }
  0x35   : > { %359 = vperm.xlu0 %3376, %v325_v19   ;;  %354 = vperm.xlu1 %3377, %v324_v20  }
  0x37   : > { %349 = vperm.xlu2 %3378, %v323_v21  }
  0x3b   : > { %3297 = vmatmul.msk.f32.gmra.mxu0 %vm421_vm1, %v308_v22  ;;  %3314 = vmatmul.msk.f32.gmra.mxu1 %vm421_vm1, %v308_v22 }
  0x3d   : > { %344 = vperm.xlu0 %3376, %v322_v23   ;;  %2176 = vperm.xlu1 %3377, %v2142_v31  }
  0x3f   : > { %2181 = vperm.xlu2 %3378, %v2143_v39  }
  0x43   : > { %3298 = vmatmul.msk.f32.gmra.mxu0 %vm421_vm1, %v309_v24  ;;  %3315 = vmatmul.msk.f32.gmra.mxu1 %vm421_vm1, %v309_v24 }
  0x45   : > { %2146 = vperm.xlu0 %3376, %v2136_v29   ;;  %2171 = vperm.xlu1 %3377, %v2141_v34  }
  0x47   : > { %2166 = vperm.xlu2 %3378, %v2140_v41  }
  0x4b   : > { %3299 = vmatmul.msk.f32.gmra.mxu0 %vm421_vm1, %v310_v25  ;;  %3316 = vmatmul.msk.f32.gmra.mxu1 %vm421_vm1, %v310_v25 }
  0x4d   : > { %2161 = vperm.xlu0 %3376, %v2139_v32   ;;  %2156 = vperm.xlu1 %3377, %v2138_v37  }
  0x4f   : > { %2151 = vperm.xlu2 %3378, %v2137_v46  }
  0x53   : > { %3300 = vmatmul.msk.f32.gmra.mxu0 %vm421_vm1, %v311_v26  ;;  %3317 = vmatmul.msk.f32.gmra.mxu1 %vm421_vm1, %v311_v26 }
  0x55   : > { %3014 = vperm.xlu0 %3376, %v3011_v35  }
  0x5b   : > { %3301 = vmatmul.msk.f32.gmra.mxu0 %vm421_vm1, %v312_v27  ;;  %3318 = vmatmul.msk.f32.gmra.mxu1 %vm421_vm1, %v312_v27 }
  0x63   : > { %3302 = vmatmul.msk.f32.gmra.mxu0 %vm421_vm1, %v313_v28  ;;  %3319 = vmatmul.msk.f32.gmra.mxu1 %vm421_vm1, %v313_v28 }
  0x6b   : > { %3303 = vmatmul.msk.f32.gmra.mxu0 %vm421_vm1, %v314_v30  ;;  %3320 = vmatmul.msk.f32.gmra.mxu1 %vm421_vm1, %v314_v30 }
  0x71   : > { %v3876_v42 = vpop.permute.xlu2 %399 }
  0x73   : > { %3304 = vmatmul.msk.f32.gmra.mxu0 %vm421_vm1, %v315_v33  ;;  %3321 = vmatmul.msk.f32.gmra.mxu1 %vm421_vm1, %v315_v33 }
  0x79   : > { %v3888_v47 = vpop.permute.xlu2 %394 }
  0x7b   : > { %3305 = vmatmul.msk.f32.gmra.mxu0 %vm421_vm1, %v316_v36  ;;  %3322 = vmatmul.msk.f32.gmra.mxu1 %vm421_vm1, %v316_v36 }
  0x81   : > { %v3899_v53 = vpop.permute.xlu2 %379 }
  0x83   : > { %3306 = vmatmul.msk.f32.gmra.mxu0 %vm421_vm1, %v317_v38  ;;  %3323 = vmatmul.msk.f32.gmra.mxu1 %vm421_vm1, %v317_v38 }
  0x87   : > { %v340_v43 = vpop.permute.xlu1 %339  ;;  %v3881_v45 = vpop.permute.xlu0 %409 }
  0x89   : > { %v3905_v58 = vpop.permute.xlu2 %364 }
  0x8b   : > { %3307 = vmatmul.msk.f32.gmra.mxu0 %vm421_vm1, %v318_v40  ;;  %3324 = vmatmul.msk.f32.gmra.mxu1 %vm421_vm1, %v318_v40 }
  0x8f   : > { %v3893_v49 = vpop.permute.xlu1 %404  ;;  %v3897_v50 = vpop.permute.xlu0 %414 }
  0x91   : > { %v350_v63 = vpop.permute.xlu2 %349 }
  0x93   : > { %3308 = vmatmul.msk.f32.gmra.mxu0 %vm421_vm1, %v319_v44  ;;  %3325 = vmatmul.msk.f32.gmra.mxu1 %vm421_vm1, %v319_v44 }
  0x97   : > { %v3901_v54 = vpop.permute.xlu1 %384  ;;  %v3903_v55 = vpop.permute.xlu0 %389 }
  0x9b   : > { %3309 = vmatmul.msk.f32.gmra.mxu0 %vm421_vm1, %v320_v48  ;;  %3326 = vmatmul.msk.f32.gmra.mxu1 %vm421_vm1, %v320_v48 }
  0x9f   : > { %v3907_v59 = vpop.permute.xlu1 %369  ;;  %v3909_v62 = vpop.permute.xlu0 %374 }
  0xa0   : > { %v492_v51 = vpop.f32.mrf.mxu0  ;;  %v557_v52 = vpop.f32.mrf.mxu1 }
  0xa1   : > { %v493_v27 = vadd.f32 %v492_v51, %v340_v43  ;;  %v558_v28 = vadd.f32 %v557_v52, %v340_v43 }
  0xa3   : > { %v3956_v35 = vmax.f32 %v493_v27, 0.0  ;;  %v3958_v36 = vmax.f32 %v558_v28, 0.0 }
  0xa5   : > { %6796 = vst [vmem:[#allocation11_spill] sm:$0xff] %v3956_v35  ;;  %v3972_v43 = vmul.f32 %v3956_v35, %v3956_v35  ;;  %v3976_v44 = vmul.f32 %v3958_v36, %v3958_v36 }
  0xa6   : > { %6797 = vst [vmem:[#allocation12_spill] sm:$0xff] %v3958_v36 }
  0xa7   : > { %v355_v0 = vpop.permute.xlu1 %354  ;;  %v360_v4 = vpop.permute.xlu0 %359  ;;  %6799 = vst [vmem:[#allocation14_spill] sm:$0xff] %v3976_v44 }
  0xa8   : > { %v495_v56 = vpop.f32.mrf.mxu0  ;;  %v560_v57 = vpop.f32.mrf.mxu1 }
  0xaf   : > { %v345_v17 = vpop.permute.xlu0 %344 }
  0xb0   : > { %v498_v60 = vpop.f32.mrf.mxu0  ;;  %v563_v61 = vpop.f32.mrf.mxu1  ;;  %v496_v21 = vadd.f32 %v495_v56, %v345_v17  ;;  %v561_v22 = vadd.f32 %v560_v57, %v345_v17  ;;  %v6698_v56 = vrot.slane %v3972_v43, 7  ;;  %v6696_v57 = vrot.slane %v3976_v44, 7 }
  0xb1   : > { %v564_v3 = vadd.f32 %v563_v61, %v350_v63  ;;  %v499_v30 = vadd.f32 %v498_v60, %v350_v63 }
  0xb2   : > { %v3950_v32 = vmax.f32 %v496_v21, 0.0  ;;  %v3952_v33 = vmax.f32 %v561_v22, 0.0 }
  0xb3   : > { %v3911_v6 = vmax.f32 %v564_v3, 0.0  ;;  %v3960_v37 = vmax.f32 %v499_v30, 0.0 }
  0xb4   : > { %6794 = vst [vmem:[#allocation9_spill] sm:$0xff] %v3950_v32  ;;  %v3964_v38 = vmul.f32 %v3950_v32, %v3950_v32  ;;  %v3968_v39 = vmul.f32 %v3952_v33, %v3952_v33 }
  0xb5   : > { %6790 = vst [vmem:[#allocation5_spill] sm:$0xff] %v3911_v6  ;;  %v3921_v12 = vmul.f32 %v3911_v6, %v3911_v6  ;;  %v641_v46 = vmul.f32 %v3960_v37, %v3960_v37 }
  0xb6   : > { %6795 = vst [vmem:[#allocation10_spill] sm:$0xff] %v3952_v33  ;;  %v671_v48 = vrot.slane %v3964_v38, 7  ;;  %v672_v51 = vrot.slane %v3968_v39, 7  ;;  %v6699_v60 = vrot.slane %v3964_v38, 1  ;;  %v6697_v61 = vrot.slane %v3968_v39, 1 }
  0xb7   : > { %v674_v18 = vrot.slane %v3921_v12, 7  ;;  %6798 = vst [vmem:[#allocation13_spill] sm:$0xff] %v3960_v37  ;;  %v740_v63 = vrot.slane %v641_v46, 1  ;;  %v673_v28 = vrot.slane %v641_v46, 7 }
  0xb8   : > { %v501_v1 = vpop.f32.mrf.mxu0  ;;  %v566_v2 = vpop.f32.mrf.mxu1  ;;  %v732_v3 = vsel %vm6781_vm2, %v6698_v56, %v671_v48 }
  0xb9   : > { %v567_v5 = vadd.f32 %v566_v2, %v355_v0  ;;  %v502_v52 = vadd.f32 %v501_v1, %v355_v0  ;;  %v6700_v2 = vrot.slane %v3921_v12, 1  ;;  %v733_v0 = vsel %vm6781_vm2, %v6696_v57, %v672_v51 }
  0xba   : > { %v915_v17 = vadd.f32 %v733_v0, %v3968_v39 }
  0xbb   : > { %v3913_v7 = vmax.f32 %v567_v5, 0.0  ;;  %v3995_v1 = vmax.f32 %v502_v52, 0.0  ;;  %v796_v21 = vsel %vm6761_vm3, %v6697_v61, %v6700_v2 }
  0xbc   : > { %v947_v30 = vadd.f32 %v915_v17, %v796_v21 }
  0xbd   : > { %6791 = vst [vmem:[#allocation6_spill] sm:$0xff] %v3913_v7  ;;  %v3917_v9 = vmul.f32 %v3913_v7, %v3913_v7 }
  0xbe   : > { %6800 = vst [vmem:[#allocation15_spill] sm:$0xff] %v3995_v1  ;;  %v979_v17 = vmul.f32 3.3333334e-05, %v947_v30 }
  0xbf   : > { %v676_v15 = vrot.slane %v3917_v9, 7  ;;  %v6701_v25 = vrot.slane %v3917_v9, 1 }
  0xc0   : > { %v504_v10 = vpop.f32.mrf.mxu0  ;;  %v569_v11 = vpop.f32.mrf.mxu1 }
  0xc1   : > { %v570_v14 = vadd.f32 %v569_v11, %v360_v4  ;;  %v729_v20 = vsel %vm6781_vm2, %v674_v18, %v676_v15  ;;  %v505_v5 = vadd.f32 %v504_v10, %v360_v4  ;;  %v643_v4 = vmul.f32 %v3995_v1, %v3995_v1 }
  0xc2   : > { %v919_v29 = vadd.f32 %v729_v20, %v3917_v9  ;;  %v795_v20 = vsel %vm6761_vm3, %v6699_v60, %v740_v63 }
  0xc3   : > { %v3926_v16 = vmax.f32 %v570_v14, 0.0  ;;  %v914_v14 = vadd.f32 %v732_v3, %v3964_v38  ;;  %v4011_v10 = vmax.f32 %v505_v5, 0.0 }
  0xc5   : > { %6793 = vst [vmem:[#allocation8_spill] sm:$0xff] %v3926_v16  ;;  %v3932_v19 = vmul.f32 %v3926_v16, %v3926_v16  ;;  %v645_v52 = vmul.f32 %v4011_v10, %v4011_v10 }
  0xc6   : > { %6801 = vst [vmem:[#allocation16_spill] sm:$0xff] %v4011_v10 }
  0xc7   : > { %v6702_v26 = vrot.slane %v3932_v19, 1 }
  0xc8   : > { %v507_v23 = vpop.f32.mrf.mxu0  ;;  %v572_v24 = vpop.f32.mrf.mxu1 }
  0xc9   : > { %v792_v31 = vsel %vm6761_vm3, %v6701_v25, %v6702_v26  ;;  %v508_v22 = vadd.f32 %v507_v23, %v3905_v58  ;;  %v573_v27 = vadd.f32 %v572_v24, %v3905_v58  ;;  %v730_v23 = vsel %vm6781_vm2, %v671_v48, %v673_v28 }
  0xca   : > { %v3954_v34 = vadd.f32 %v919_v29, %v792_v31  ;;  %v946_v29 = vadd.f32 %v914_v14, %v795_v20  ;;  %v742_v31 = vrot.slane %v643_v4, 1  ;;  %v675_v20 = vrot.slane %v643_v4, 7 }
  0xcb   : > { %v4020_v61 = vmax.f32 %v508_v22, 0.0  ;;  %v4022_v5 = vmax.f32 %v573_v27, 0.0  ;;  %v677_v22 = vrot.slane %v645_v52, 7  ;;  %v916_v56 = vadd.f32 %v730_v23, %v641_v46 }
  0xcc   : > { %v978_v14 = vmul.f32 3.3333334e-05, %v946_v29  ;;  %v793_v21 = vsel %vm6761_vm3, %v740_v63, %v742_v31  ;;  %v744_v48 = vrot.slane %v645_v52, 1  ;;  %v728_v24 = vsel %vm6781_vm2, %v673_v28, %v675_v20 }
  0xcd   : > { %6802 = vst [vmem:[#allocation17_spill] sm:$0xff] %v4020_v61  ;;  %v948_v23 = vadd.f32 %v916_v56, %v793_v21  ;;  %v726_v29 = vsel %vm6781_vm2, %v675_v20, %v677_v22  ;;  %v918_v2 = vadd.f32 %v728_v24, %v643_v4  ;;  %v6810_v24 = vrot.slane %v3932_v19, 1 }
  0xce   : > { %6803 = vst [vmem:[#allocation18_spill] sm:$0xff] %v4022_v5  ;;  %v4047_v30 = vadd.f32 1.0, %v978_v14  ;;  %v791_v14 = vsel %vm6761_vm3, %v742_v31, %v744_v48  ;;  %v920_v26 = vadd.f32 %v726_v29, %v645_v52 }
  0xcf   : > { %v980_v25 = vmul.f32 3.3333334e-05, %v948_v23 }
  0xd0   : > { %v510_v40 = vpop.f32.mrf.mxu0  ;;  %v575_v41 = vpop.f32.mrf.mxu1  ;;  %6806 = vst [vmem:[#allocation21_spill] sm:$0xff] %v4047_v30  ;;  %3379 = vrsqrt.f32 %v4047_v30 }
  0xd1   : > { %v511_v3 = vadd.f32 %v510_v40, %v3907_v59  ;;  %v576_v58 = vadd.f32 %v575_v41, %v3907_v59  ;;  %v731_v40 = vsel %vm6781_vm2, %v672_v51, %v674_v18  ;;  %v647_v59 = vmul.f32 %v4020_v61, %v4020_v61 }
  0xd2   : > { %v4040_v41 = vmul.f32 %v4022_v5, %v4022_v5  ;;  %v4050_v46 = vadd.f32 %v731_v40, %v3921_v12 }
  0xd3   : > { %v4034_v27 = vmax.f32 %v511_v3, 0.0  ;;  %v4043_v18 = vmax.f32 %v576_v58, 0.0  ;;  %v4052_v3 = vadd.f32 1.0, %v979_v17  ;;  %v678_v58 = vrot.slane %v3932_v19, 7 }
  0xd4   : > { %v679_v40 = vrot.slane %v647_v59, 7  ;;  %v746_v17 = vrot.slane %v647_v59, 1  ;;  %v680_v56 = vrot.slane %v4040_v41, 7  ;;  %v747_v28 = vrot.slane %v4040_v41, 1 }
  0xd5   : > { %6804 = vst [vmem:[#allocation19_spill] sm:$0xff] %v4034_v27  ;;  %v4069_v20 = vmul.f32 %v4043_v18, %v4043_v18  ;;  %3381 = vrsqrt.f32 %v4052_v3  ;;  %v727_v36 = vsel %vm6781_vm2, %v676_v15, %v678_v58 }
  0xd6   : > { %6805 = vst [vmem:[#allocation20_spill] sm:$0xff] %v4043_v18  ;;  %v789_v4 = vsel %vm6761_vm3, %v744_v48, %v746_v17  ;;  %v790_v52 = vsel %vm6761_vm3, %v6810_v24, %v747_v28  ;;  %v921_v48 = vadd.f32 %v727_v36, %v3932_v19  ;;  %v4114_v7 = vpop.eup %3379 }
  0xd7   : > { %6807 = vst [vmem:[#allocation22_spill] sm:$0xff] %v4052_v3  ;;  %v749_v29 = vrot.slane %v4069_v20, 1  ;;  %v6834_v3 = vrot.slane %v4069_v20, 7 }
  0xd8   : > { %v513_v8 = vpop.f32.mrf.mxu0  ;;  %v578_v11 = vpop.f32.mrf.mxu1  ;;  %6813 = vst [vmem:[#allocation27_spill] sm:$0xff] %v4114_v7  ;;  %v953_v36 = vadd.f32 %v921_v48, %v790_v52 }
  0xd9   : > { %v514_v51 = vadd.f32 %v513_v8, %v3909_v62  ;;  %v579_v63 = vadd.f32 %v578_v11, %v3909_v62  ;;  %v4061_v8 = vmul.f32 %v4034_v27, %v4034_v27 }
  0xdb   : > { %v4071_v21 = vmax.f32 %v514_v51, 0.0  ;;  %v4073_v60 = vmax.f32 %v579_v63, 0.0  ;;  %v748_v35 = vrot.slane %v4061_v8, 1  ;;  %v950_v51 = vadd.f32 %v918_v2, %v791_v14 }
  0xdc   : > { %v724_v63 = vsel %vm6781_vm2, %v677_v22, %v679_v40  ;;  %v4102_v22 = vadd.f32 1.0, %v980_v25  ;;  %v681_v23 = vrot.slane %v4061_v8, 7  ;;  %v952_v14 = vadd.f32 %v920_v26, %v789_v4 }
  0xdd   : > { %6808 = vst [vmem:[#allocation23_spill] sm:$0xff] %v4071_v21  ;;  %v4096_v15 = vmul.f32 %v4071_v21, %v4071_v21  ;;  %v4100_v2 = vmul.f32 %v4073_v60, %v4073_v60  ;;  %v787_v24 = vsel %vm6761_vm3, %v746_v17, %v748_v35  ;;  %v982_v25 = vmul.f32 3.3333334e-05, %v950_v51 }
  0xde   : > { %6809 = vst [vmem:[#allocation24_spill] sm:$0xff] %v4073_v60  ;;  %v922_v1 = vadd.f32 %v724_v63, %v647_v59  ;;  %v788_v26 = vsel %vm6761_vm3, %v747_v28, %v749_v29  ;;  %v722_v33 = vsel %vm6781_vm2, %v679_v40, %v681_v23  ;;  %v983_v63 = vmul.f32 3.3333334e-05, %v3954_v34 }
  0xdf   : > { %6811 = vst [vmem:[#allocation25_spill] sm:$0xff] %v4102_v22  ;;  %v750_v17 = vrot.slane %v4096_v15, 1  ;;  %v6711_v4 = vrot.slane %v4100_v2, 1  ;;  %v984_v28 = vmul.f32 3.3333334e-05, %v952_v14  ;;  %v683_v40 = vrot.slane %v4096_v15, 7 }
  0xe0   : > { %v516_v0 = vpop.f32.mrf.mxu0  ;;  %v4018_v57 = vpop.f32.mrf.mxu1  ;;  %v954_v51 = vadd.f32 %v922_v1, %v787_v24  ;;  %v924_v24 = vadd.f32 %v722_v33, %v4061_v8  ;;  %v6821_v33 = vrot.slane %v3921_v12, 1  ;;  %v4161_v8 = vadd.f32 1.0, %v983_v63 }
  0xe1   : > { %v517_v31 = vadd.f32 %v516_v0, %v3899_v53  ;;  %v725_v0 = vsel %vm6781_vm2, %v678_v58, %v680_v56  ;;  %v786_v34 = vsel %vm6761_vm3, %v749_v29, %v6711_v4  ;;  %3383 = vrsqrt.f32 %v4102_v22 }
  0xe2   : > { %v923_v19 = vadd.f32 %v725_v0, %v4040_v41  ;;  %v6815_v0 = vrot.slane %v4069_v20, 7  ;;  %6822 = vst [vmem:[#allocation33_spill] sm:$0xff] %v4161_v8 }
  0xe3   : > { %v4106_v58 = vmax.f32 %v517_v31, 0.0  ;;  %v4117_v31 = vpop.eup %3381 }
  0xe4   : > { %6814 = vst [vmem:[#allocation28_spill] sm:$0xff] %v4117_v31  ;;  %v723_v52 = vsel %vm6781_vm2, %v680_v56, %v6815_v0  ;;  %v955_v1 = vadd.f32 %v923_v19, %v788_v26  ;;  %v6820_v19 = vrot.slane %v3917_v9, 1 }
  0xe5   : > { %6812 = vst [vmem:[#allocation26_spill] sm:$0xff] %v4106_v58  ;;  %v4129_v59 = vmul.f32 %v4106_v58, %v4106_v58  ;;  %v925_v56 = vadd.f32 %v723_v52, %v4069_v20 }
  0xe7   : > { %v752_v14 = vrot.slane %v4129_v59, 1  ;;  %v957_v0 = vadd.f32 %v925_v56, %v786_v34  ;;  %v685_v63 = vrot.slane %v4129_v59, 7 }
  0xe8   : > { %v519_v62 = vpop.f32.mrf.mxu0  ;;  %v584_v11 = vpop.f32.mrf.mxu1 }
  0xe9   : > { %v520_v32 = vadd.f32 %v519_v62, %v3901_v54  ;;  %v582_v62 = vadd.f32 %v4018_v57, %v3899_v53  ;;  %v585_v41 = vadd.f32 %v584_v11, %v3901_v54  ;;  %v4139_v53 = vadd.f32 1.0, %v982_v25 }
  0xea   : > { %v985_v57 = vmul.f32 3.3333334e-05, %v953_v36  ;;  %v785_v54 = vsel %vm6761_vm3, %v748_v35, %v750_v17  ;;  %v794_v35 = vsel %vm6761_vm3, %v6821_v33, %v6820_v19  ;;  %v4163_v36 = vadd.f32 1.0, %v984_v28 }
  0xeb   : > { %v4137_v48 = vmax.f32 %v520_v32, 0.0  ;;  %6817 = vst [vmem:[#allocation30_spill] sm:$0xff] %v4139_v53  ;;  %v4149_v11 = vmax.f32 %v582_v62, 0.0  ;;  %v986_v32 = vmul.f32 3.3333334e-05, %v954_v51  ;;  %v4153_v25 = vmax.f32 %v585_v41, 0.0 }
  0xec   : > { %6823 = vst [vmem:[#allocation34_spill] sm:$0xff] %v4163_v36  ;;  %v987_v51 = vmul.f32 3.3333334e-05, %v955_v1  ;;  %v720_v41 = vsel %vm6781_vm2, %v681_v23, %v683_v40  ;;  %v956_v9 = vadd.f32 %v924_v24, %v785_v54  ;;  %v4172_v12 = vadd.f32 1.0, %v985_v57 }
  0xed   : > { %6816 = vst [vmem:[#allocation29_spill] sm:$0xff] %v4137_v48  ;;  %v4167_v29 = vmul.f32 %v4137_v48, %v4137_v48  ;;  %v4177_v28 = vmul.f32 %v4149_v11, %v4149_v11  ;;  %3385 = vrsqrt.f32 %v4139_v53  ;;  %v4180_v52 = vadd.f32 1.0, %v986_v32 }
  0xee   : > { %6818 = vst [vmem:[#allocation31_spill] sm:$0xff] %v4149_v11  ;;  %v783_v1 = vsel %vm6761_vm3, %v750_v17, %v752_v14  ;;  %v4186_v23 = vmul.f32 %v4153_v25, %v4153_v25  ;;  %3387 = vrsqrt.f32 %v4161_v8  ;;  %v926_v57 = vadd.f32 %v720_v41, %v4096_v15 }
  0xef   : > { %6819 = vst [vmem:[#allocation32_spill] sm:$0xff] %v4153_v25  ;;  %v6713_v24 = vrot.slane %v4167_v29, 1  ;;  %3389 = vrsqrt.f32 %v4163_v36  ;;  %v4193_v34 = vadd.f32 1.0, %v987_v51  ;;  %v988_v32 = vmul.f32 3.3333334e-05, %v956_v9  ;;  %v4203_v51 = vpop.eup %3383 }
  0xf0   : > { %v522_v6 = vpop.f32.mrf.mxu0  ;;  %v4112_v37 = vpop.f32.mrf.mxu1  ;;  %6824 = vst [vmem:[#allocation35_spill] sm:$0xff] %v4172_v12  ;;  %v989_v56 = vmul.f32 3.3333334e-05, %v957_v0  ;;  %3391 = vrsqrt.f32 %v4172_v12  ;;  %v718_v17 = vsel %vm6781_vm2, %v683_v40, %v685_v63  ;;  %v958_v19 = vadd.f32 %v926_v57, %v783_v1 }
  0xf1   : > { %6825 = vst [vmem:[#allocation36_spill] sm:$0xff] %v4180_v52  ;;  %v523_v54 = vadd.f32 %v522_v6, %v3903_v55  ;;  %v686_v33 = vrot.slane %v4177_v28, 7  ;;  %v949_v15 = vadd.f32 %v4050_v46, %v794_v35  ;;  %3393 = vrsqrt.f32 %v4180_v52 }
  0xf2   : > { %6826 = vst [vmem:[#allocation37_spill] sm:$0xff] %v4193_v34  ;;  %v684_v6 = vrot.slane %v4100_v2, 7  ;;  %v781_v9 = vsel %vm6761_vm3, %v752_v14, %v6713_v24  ;;  %v588_v40 = vadd.f32 %v4112_v37, %v3903_v55  ;;  %3395 = vrsqrt.f32 %v4193_v34 }
  0xf3   : > { %6827 = vst [vmem:[#allocation38_spill] sm:$0xff] %v4203_v51  ;;  %v4209_v0 = vmax.f32 %v523_v54, 0.0  ;;  %v4214_v57 = vpop.eup %3385  ;;  %v4217_v4 = vadd.f32 1.0, %v988_v32  ;;  %v4219_v41 = vadd.f32 1.0, %v989_v56  ;;  %v928_v31 = vadd.f32 %v718_v17, %v4129_v59 }
  0xf4   : > { %6829 = vst [vmem:[#allocation40_spill] sm:$0xff] %v4214_v57  ;;  %v4222_v14 = vpop.eup %3387  ;;  %v990_v54 = vmul.f32 3.3333334e-05, %v958_v19  ;;  %v719_v55 = vsel %vm6781_vm2, %v684_v6, %v686_v33  ;;  %v753_v37 = vrot.slane %v4177_v28, 1  ;;  %v721_v32 = vsel %vm6781_vm2, %v6834_v3, %v684_v6 }
  0xf5   : > { %6828 = vst [vmem:[#allocation39_spill] sm:$0xff] %v4209_v0  ;;  %v4228_v24 = vpop.eup %3389  ;;  %v687_v56 = vrot.slane %v4167_v29, 7  ;;  %v960_v59 = vadd.f32 %v928_v31, %v781_v9  ;;  %v688_v17 = vrot.slane %v4186_v23, 7  ;;  %v6836_v16 = vrot.slane %v4186_v23, 1 }
  0xf6   : > { %6830 = vst [vmem:[#allocation41_spill] sm:$0xff] %v4217_v4  ;;  %v4236_v19 = vpop.eup %3391  ;;  %v4246_v20 = vmax.f32 %v588_v40, 0.0  ;;  %v6840_v31 = vrot.slane %v3964_v38, 1  ;;  %v6841_v6 = vrot.slane %v3972_v43, 1  ;;  %v4260_v7 = vmul.f32 3.3333334e-05, %v949_v15 }
  0xf7   : > { %6831 = vst [vmem:[#allocation42_spill] sm:$0xff] %v4219_v41  ;;  %v782_v10 = vsel %vm6761_vm3, %v753_v37, %v6836_v16  ;;  %v4250_v3 = vpop.eup %3393  ;;  %3397 = vrsqrt.f32 %v4217_v4  ;;  %v929_v16 = vadd.f32 %v719_v55, %v4177_v28  ;;  %v4265_v40 = vadd.f32 %v721_v32, %v4100_v2 }
  0xf8   : > { %v525_v26 = vpop.f32.mrf.mxu0  ;;  %v590_v62 = vpop.f32.mrf.mxu1  ;;  %6832 = vst [vmem:[#allocation43_spill] sm:$0xff] %v4222_v14  ;;  %v4258_v9 = vsel %vm6761_vm3, %v6841_v6, %v6840_v31  ;;  %3399 = vrsqrt.f32 %v4219_v41  ;;  %v716_v31 = vsel %vm6781_vm2, %v685_v63, %v687_v56  ;;  %v992_v15 = vmul.f32 3.3333334e-05, %v960_v59 }
  0xf9   : > { %v526_v46 = vadd.f32 %v525_v26, %v3888_v47  ;;  %v591_v26 = vadd.f32 %v590_v62, %v3888_v47  ;;  %6833 = vst [vmem:[#allocation44_spill] sm:$0xff] %v4228_v24  ;;  %v4244_v47 = vmul.f32 %v4209_v0, %v4209_v0  ;;  %v4272_v30 = vpop.eup %3395  ;;  %v961_v6 = vadd.f32 %v929_v16, %v782_v10 }
  0xfa   : > { %6835 = vst [vmem:[#allocation45_spill] sm:$0xff] %v4236_v19  ;;  %v717_v28 = vsel %vm6781_vm2, %v686_v33, %v688_v17  ;;  %v6845_v33 = vrot.slane %v4100_v2, 1  ;;  %v930_v22 = vadd.f32 %v716_v31, %v4167_v29  ;;  %v6854_v24 = vrot.slane %v4186_v23, 1 }
  0xfb   : > { %6837 = vst [vmem:[#allocation46_spill] sm:$0xff] %v4246_v20  ;;  %v4248_v62 = vmax.f32 %v526_v46, 0.0  ;;  %v4268_v46 = vadd.f32 1.0, %v990_v54  ;;  %v4270_v38 = vmax.f32 %v591_v26, 0.0  ;;  %v689_v55 = vrot.slane %v4244_v47, 7 }
  0xfc   : > { %6839 = vst [vmem:[#allocation48_spill] sm:$0xff] %v4250_v3  ;;  %v658_v54 = vmul.f32 %v4246_v20, %v4246_v20  ;;  %v756_v63 = vrot.slane %v4244_v47, 1  ;;  %v4295_v16 = vsel %vm6761_vm3, %v6845_v33, %v753_v37 }
  0xfd   : > { %6838 = vst [vmem:[#allocation47_spill] sm:$0xff] %v4248_v62  ;;  %v4284_v26 = vmul.f32 %v4248_v62, %v4248_v62  ;;  %3401 = vrsqrt.f32 %v4268_v46  ;;  %v4300_v14 = vmul.f32 %v4270_v38, %v4270_v38  ;;  %v4302_v8 = vpop.eup %3397  ;;  %v714_v61 = vsel %vm6781_vm2, %v687_v56, %v689_v55 }
  0xfe   : > { %6842 = vst [vmem:[#allocation49_spill] sm:$0xff] %v4268_v46  ;;  %v4309_v2 = vpop.eup %3399  ;;  %v932_v53 = vadd.f32 %v714_v61, %v4244_v47 }
  0xff   : > { %6843 = vst [vmem:[#allocation50_spill] sm:$0xff] %v4270_v38  ;;  %v758_v37 = vrot.slane %v4284_v26, 1  ;;  %v691_v18 = vrot.slane %v4284_v26, 7  ;;  %v692_v57 = vrot.slane %v4300_v14, 7 }
 0x100   : > { %v528_v35 = vpop.f32.mrf.mxu0  ;;  %v593_v1 = vpop.f32.mrf.mxu1  ;;  %6844 = vst [vmem:[#allocation51_spill] sm:$0xff] %v4272_v30 }
 0x101   : > { %v529_v5 = vadd.f32 %v528_v35, %v3876_v42  ;;  %v594_v10 = vadd.f32 %v593_v1, %v3876_v42  ;;  %6846 = vst [vmem:[#allocation52_spill] sm:$0xff] %v4302_v8  ;;  %v4304_v42 = vadd.f32 1.0, %v992_v15  ;;  %v6850_v15 = vrot.slane %v4167_v29, 1 }
 0x102   : > { %6849 = vst [vmem:[#allocation55_spill] sm:$0xff] %v4309_v2 }
 0x103   : > { %6847 = vst [vmem:[#allocation53_spill] sm:$0xff] %v4304_v42  ;;  %v4307_v1 = vmax.f32 %v529_v5, 0.0  ;;  %v4322_v5 = vmax.f32 %v594_v10, 0.0  ;;  %3403 = vrsqrt.f32 %v4304_v42 }
 0x105   : > { %6848 = vst [vmem:[#allocation54_spill] sm:$0xff] %v4307_v1  ;;  %v661_v29 = vmul.f32 %v4307_v1, %v4307_v1  ;;  %v4355_v21 = vmul.f32 %v4322_v5, %v4322_v5 }
 0x106   : > { %6851 = vst [vmem:[#allocation56_spill] sm:$0xff] %v4322_v5 }
 0x107   : > { %v693_v30 = vrot.slane %v661_v29, 7 }
 0x108   : > { %v531_v32 = vpop.f32.mrf.mxu0  ;;  %v596_v51 = vpop.f32.mrf.mxu1 }
 0x109   : > { %v532_v35 = vadd.f32 %v531_v32, %v3893_v49  ;;  %v597_v59 = vadd.f32 %v596_v51, %v3893_v49  ;;  %v931_v49 = vadd.f32 %v717_v28, %v4186_v23  ;;  %v993_v51 = vmul.f32 3.3333334e-05, %v961_v6 }
 0x10a   : > { %v690_v32 = vrot.slane %v658_v54, 7  ;;  %v779_v28 = vsel %vm6761_vm3, %v6850_v15, %v756_v63  ;;  %v757_v6 = vrot.slane %v658_v54, 1  ;;  %v4340_v15 = vpop.eup %3401 }
 0x10b   : > { %v4312_v33 = vmax.f32 %v532_v35, 0.0  ;;  %v4314_v31 = vmax.f32 %v597_v59, 0.0  ;;  %v759_v35 = vrot.slane %v4300_v14, 1  ;;  %v4332_v56 = vadd.f32 1.0, %v993_v51  ;;  %6853 = vst [vmem:[#allocation58_spill] sm:$0xff] %v4340_v15 }
 0x10c   : > { %v4343_v27 = vadd.f32 %v930_v22, %v779_v28  ;;  %v715_v19 = vsel %vm6781_vm2, %v688_v17, %v690_v32  ;;  %v777_v51 = vsel %vm6761_vm3, %v756_v63, %v758_v37  ;;  %v780_v36 = vsel %vm6761_vm3, %v6854_v24, %v757_v6 }
 0x10d   : > { %v4329_v59 = vmul.f32 %v4312_v33, %v4312_v33  ;;  %6852 = vst [vmem:[#allocation57_spill] sm:$0xff] %v4332_v56  ;;  %v4338_v10 = vmul.f32 %v4314_v31, %v4314_v31  ;;  %v712_v17 = vsel %vm6781_vm2, %v689_v55, %v691_v18  ;;  %v713_v47 = vsel %vm6781_vm2, %v690_v32, %v692_v57  ;;  %v4373_v55 = vpop.eup %3403 }
 0x10e   : > { %v778_v23 = vsel %vm6761_vm3, %v757_v6, %v759_v35  ;;  %v933_v24 = vadd.f32 %v715_v19, %v658_v54  ;;  %v964_v28 = vadd.f32 %v932_v53, %v777_v51  ;;  %v4367_v11 = vadd.f32 %v931_v49, %v780_v36  ;;  %6855 = vst [vmem:[#allocation59_spill] sm:$0xff] %v4373_v55 }
 0x10f   : > { %v695_v63 = vrot.slane %v4329_v59, 7  ;;  %v696_v34 = vrot.slane %v4338_v10, 7  ;;  %v934_v32 = vadd.f32 %v712_v17, %v4284_v26  ;;  %v935_v6 = vadd.f32 %v713_v47, %v4300_v14 }
 0x110   : > { %v534_v12 = vpop.f32.mrf.mxu0  ;;  %v599_v60 = vpop.f32.mrf.mxu1  ;;  %v4377_v3 = vadd.f32 %v933_v24, %v778_v23  ;;  %v694_v53 = vrot.slane %v4355_v21, 7  ;;  %v4389_v49 = vadd.s32 120, %v3923_v13  ;;  %v4391_v26 = vmul.f32 3.3333334e-05, %v964_v28 }
 0x111   : > { %v535_v61 = vadd.f32 %v534_v12, %v3881_v45  ;;  %v600_v22 = vadd.f32 %v599_v60, %v3881_v45  ;;  %v760_v12 = vrot.slane %v661_v29, 1  ;;  %v708_v19 = vsel %vm6781_vm2, %v693_v30, %v695_v63 }
 0x112   : > { %v710_v14 = vsel %vm6781_vm2, %v691_v18, %v693_v30  ;;  %v761_v51 = vrot.slane %v4355_v21, 1  ;;  %v762_v17 = vrot.slane %v4329_v59, 1  ;;  %v763_v47 = vrot.slane %v4338_v10, 1 }
 0x113   : > { %v4369_v45 = vmax.f32 %v535_v61, 0.0  ;;  %v4371_v60 = vmax.f32 %v600_v22, 0.0  ;;  %v709_v61 = vsel %vm6781_vm2, %v694_v53, %v696_v34  ;;  %v775_v22 = vsel %vm6761_vm3, %v758_v37, %v760_v12 }
 0x114   : > { %v938_v52 = vadd.f32 %v708_v19, %v4329_v59  ;;  %v939_v2 = vadd.f32 %v709_v61, %v4338_v10  ;;  %v711_v8 = vsel %vm6781_vm2, %v692_v57, %v694_v53  ;;  %v776_v59 = vsel %vm6761_vm3, %v759_v35, %v761_v51 }
 0x115   : > { %v665_v36 = vmul.f32 %v4369_v45, %v4369_v45  ;;  %v4386_v54 = vmul.f32 %v4371_v60, %v4371_v60  ;;  %v936_v4 = vadd.f32 %v710_v14, %v661_v29  ;;  %v966_v48 = vadd.f32 %v934_v32, %v775_v22 }
 0x116   : > { %vm879_vm5 = vcmp.eq.s32.totalorder %v4389_v49, 127  ;;  %v967_v35 = vadd.f32 %v935_v6, %v776_v59  ;;  %v6858_v6 = vrot.slane %v3972_v43, 1 }
 0x117   : > { %v764_v23 = vrot.slane %v665_v36, 1  ;;  %v765_v18 = vrot.slane %v4386_v54, 1  ;;  %v697_v37 = vrot.slane %v665_v36, 7  ;;  %v698_v25 = vrot.slane %v4386_v54, 7 }
 0x118   : > { %v537_v24 = vpop.f32.mrf.mxu0  ;;  %v602_v28 = vpop.f32.mrf.mxu1 }
 0x119   : > { %v538_v30 = vadd.f32 %v537_v24, %v3897_v50  ;;  %v603_v58 = vadd.f32 %v602_v28, %v3897_v50  ;;  %v771_v41 = vsel %vm6761_vm3, %v762_v17, %v764_v23  ;;  %v772_v24 = vsel %vm6761_vm3, %v763_v47, %v765_v18 }
 0x11a   : > { %v970_v19 = vadd.f32 %v938_v52, %v771_v41  ;;  %v773_v50 = vsel %vm6761_vm3, %v760_v12, %v762_v17  ;;  %v971_v10 = vadd.f32 %v939_v2, %v772_v24  ;;  %v706_v57 = vsel %vm6781_vm2, %v695_v63, %v697_v37 }
 0x11b   : > { %v4419_v61 = vmax.f32 %v538_v30, 0.0  ;;  %v4421_v28 = vmax.f32 %v603_v58, 0.0  ;;  %v707_v52 = vsel %vm6781_vm2, %v696_v34, %v698_v25  ;;  %v937_v58 = vadd.f32 %v711_v8, %v4355_v21 }
 0x11c   : > { %v1002_v20 = vmul.f32 3.3333334e-05, %v970_v19  ;;  %v968_v29 = vadd.f32 %v936_v4, %v773_v50  ;;  %v1003_v32 = vmul.f32 3.3333334e-05, %v971_v10  ;;  %v774_v34 = vsel %vm6761_vm3, %v761_v51, %v763_v47 }
 0x11d   : > { %v667_v41 = vmul.f32 %v4419_v61, %v4419_v61  ;;  %v4432_v2 = vmul.f32 %v4421_v28, %v4421_v28  ;;  %v940_v22 = vadd.f32 %v706_v57, %v665_v36  ;;  %v941_v17 = vadd.f32 %v707_v52, %v4386_v54 }
 0x11e   : > { %v4435_v12 = vadd.f32 1.0, %v1002_v20  ;;  %v6857_v4 = vrot.slane %v3972_v43, 7  ;;  %v4457_v59 = vadd.f32 1.0, %v1003_v32  ;;  %v6859_v57 = vrot.slane %v3976_v44, 1 }
 0x11f   : > { %6856 = vst [vmem:[#allocation60_spill] sm:$0xff] %v4432_v2  ;;  %v699_v53 = vrot.slane %v667_v41, 7  ;;  %v766_v14 = vrot.slane %v667_v41, 1  ;;  %v6759_v63 = vrot.slane %v4432_v2, 7  ;;  %v767_v30 = vrot.slane %v4432_v2, 1 }
 0x120   : > { %3405 = vrsqrt.f32 %v4435_v12  ;;  %vm1679_vm7 = vcmp.eq.f32.partialorder %v4435_v12, inf  ;;  %vm1306_vm0 = vweird.f32 %v4435_v12  ;;  %vm1681_vm1 = vcmp.eq.f32.partialorder %v4435_v12, 0.0 }
 0x121   : > { %v704_v21 = vsel %vm6781_vm2, %v697_v37, %v699_v53  ;;  %v734_v8 = vsel %vm6781_vm2, %v699_v53, %v6857_v4  ;;  %v769_v20 = vsel %vm6761_vm3, %v764_v23, %v766_v14  ;;  %v799_v36 = vsel %vm6761_vm3, %v766_v14, %v6858_v6 }
 0x122   : > { %v832_v54 = vsel %vm6779_vm4, 0.0, %v734_v8  ;;  %v942_v51 = vadd.f32 %v704_v21, %v667_v41  ;;  %v972_v47 = vadd.f32 %v940_v22, %v769_v20  ;;  %v910_v37 = vsel %vm879_vm5, 0.0, %v799_v36 }
 0x123   : > { %v912_v19 = vadd.f32 %v832_v54, %v3972_v43  ;;  %v705_v23 = vsel %vm6781_vm2, %v698_v25, %v6759_v63  ;;  %v770_v10 = vsel %vm6761_vm3, %v765_v18, %v767_v30  ;;  %v800_v52 = vsel %vm6761_vm3, %v767_v30, %v6859_v57 }
 0x124   : > { %v974_v24 = vadd.f32 %v942_v51, %v910_v37  ;;  %v1004_v50 = vmul.f32 3.3333334e-05, %v972_v47  ;;  %v969_v41 = vadd.f32 %v937_v58, %v774_v34  ;;  %v911_v43 = vsel %vm879_vm5, 0.0, %v800_v52 }
 0x125   : > { %v4473_v32 = vadd.f32 %v912_v19, %v4258_v9  ;;  %v943_v53 = vadd.f32 %v705_v23, %v4432_v2  ;;  %v998_v25 = vmul.f32 3.3333334e-05, %v966_v48  ;;  %v973_v21 = vadd.f32 %v941_v17, %v770_v10 }
 0x126   : > { %v1006_v14 = vmul.f32 3.3333334e-05, %v974_v24  ;;  %v4478_v22 = vadd.f32 1.0, %v1004_v50  ;;  %v4480_v18 = vpop.eup %3405  ;;  %v4483_v4 = vadd.f32 1.0, %v4391_v26  ;;  %v999_v30 = vmul.f32 3.3333334e-05, %v967_v35 }
 0x127   : > { %6860 = vst [vmem:[#allocation61_spill] sm:$0xff] %v4473_v32  ;;  %3407 = vrsqrt.f32 %v4457_v59  ;;  %v975_v9 = vadd.f32 %v943_v53, %v911_v43  ;;  %v1000_v58 = vmul.f32 3.3333334e-05, %v968_v29  ;;  %v1005_v49 = vmul.f32 3.3333334e-05, %v973_v21 }
 0x128   : > { %v4486_v34 = vadd.f32 1.0, %v1006_v14  ;;  %3409 = vrsqrt.f32 %v4478_v22  ;;  %v959_v48 = vadd.f32 %v4265_v40, %v4295_v16  ;;  %v1001_v17 = vmul.f32 3.3333334e-05, %v969_v41 }
 0x129   : > { %3411 = vrsqrt.f32 %v4332_v56  ;;  %v1007_v8 = vmul.f32 3.3333334e-05, %v975_v9  ;;  %v994_v26 = vmul.f32 3.3333334e-05, %v4343_v27  ;;  %v4493_v20 = vadd.f32 1.0, %v998_v25 }
 0x12a   : > { %3413 = vrsqrt.f32 %v4486_v34  ;;  %v4496_v35 = vadd.f32 1.0, %v1005_v49  ;;  %v4499_v29 = vadd.f32 1.0, %v999_v30  ;;  %v1301_v40 = vmul.f32 %v4480_v18, %v4435_v12 }
 0x12b   : > { %3415 = vrsqrt.f32 %v4483_v4  ;;  %v4501_v6 = vadd.f32 1.0, %v1007_v8  ;;  %v995_v16 = vmul.f32 3.3333334e-05, %v4367_v11  ;;  %v997_v36 = vmul.f32 3.3333334e-05, %v4377_v3 }
 0x12c   : > { %v4507_v27 = vadd.f32 1.0, %v1000_v58  ;;  %3417 = vrsqrt.f32 %v4496_v35  ;;  %v4512_v51 = vadd.f32 1.0, %v1001_v17  ;;  %v6861_v37 = vrot.slane %v3968_v39, 1 }
 0x12d   : > { %v4510_v54 = vpop.eup %3407  ;;  %3419 = vrsqrt.f32 %v4501_v6  ;;  %v6862_v19 = vmov %v6859_v57  ;;  %v4526_v3 = vadd.f32 1.0, %v4260_v7  ;;  %v4528_v23 = vmul.f32 3.3333334e-05, %v959_v48 }
 0x12e   : > { %v4515_v47 = vpop.eup %3409  ;;  %v4523_v11 = vsel %vm6761_vm3, %v6862_v19, %v6861_v37  ;;  %3421 = vrsqrt.f32 %v4493_v20  ;;  %v4533_v50 = vadd.f32 1.0, %v994_v26  ;;  %v1302_v10 = vmul.f32 %v4480_v18, %v1301_v40 }
 0x12f   : > { %6863 = vst [vmem:[#allocation62_spill] sm:$0xff] %v4523_v11  ;;  %v4531_v24 = vpop.eup %3411  ;;  %3423 = vrsqrt.f32 %v4499_v29  ;;  %v1321_v39 = vmul.f32 %v4515_v47, %v4478_v22  ;;  %v4541_v52 = vadd.f32 1.0, %v995_v16  ;;  %v4543_v7 = vadd.f32 1.0, %v997_v36 }
 0x130   : > { %6864 = vst [vmem:[#allocation63_spill] sm:$0xff] %v4526_v3  ;;  %v4539_v57 = vpop.eup %3413  ;;  %3425 = vrsqrt.f32 %v4507_v27  ;;  %v1311_v41 = vmul.f32 %v4510_v54, %v4457_v59  ;;  %v1303_v14 = vmul.f32 0.5, %v1302_v10  ;;  %vm1703_vm6 = vcmp.eq.f32.partialorder %v4478_v22, inf }
 0x131   : > { %6865 = vst [vmem:[#allocation64_spill] sm:$0xff] %v4528_v23  ;;  %v4548_v43 = vpop.eup %3415  ;;  %3427 = vrsqrt.f32 %v4512_v51  ;;  %v1341_v53 = vmul.f32 %v4539_v57, %v4486_v34  ;;  %v1322_v25 = vmul.f32 %v4515_v47, %v1321_v39  ;;  %v1730_v48 = vand.u32 2147483648, %v4486_v34 }
 0x132   : > { %6866 = vst [vmem:[#allocation65_spill] sm:$0xff] %v4531_v24  ;;  %v4554_v21 = vpop.eup %3417  ;;  %v1312_v30 = vmul.f32 %v4510_v54, %v1311_v41  ;;  %vm1727_vm8 = vcmp.eq.f32.partialorder %v4486_v34, inf  ;;  %vm1705_vm9 = vcmp.eq.f32.partialorder %v4478_v22, 0.0  ;;  %v1304_v16 = vsub.f32 1.5, %v1303_v14 }
 0x133   : > { %6867 = vst [vmem:[#allocation66_spill] sm:$0xff] %v4533_v50  ;;  %v4560_v58 = vpop.eup %3419  ;;  %v1342_v49 = vmul.f32 %v4539_v57, %v1341_v53  ;;  %v1323_v17 = vmul.f32 0.5, %v1322_v25  ;;  %v1331_v8 = vmul.f32 %v4554_v21, %v4496_v35  ;;  %vm1729_vm10 = vcmp.eq.f32.partialorder %v4486_v34, 0.0 }
 0x134   : > { %6868 = vst [vmem:[#allocation67_spill] sm:$0xff] %v4541_v52  ;;  %v4566_v26 = vpop.eup %3421  ;;  %v1351_v40 = vmul.f32 %v4560_v58, %v4501_v6  ;;  %v1313_v36 = vmul.f32 0.5, %v1312_v30  ;;  %v1706_v10 = vand.u32 2147483648, %v4478_v22  ;;  %v1742_v63 = vand.u32 2147483648, %v4501_v6 }
 0x135   : > { %6869 = vst [vmem:[#allocation68_spill] sm:$0xff] %v4548_v43  ;;  %v4572_v37 = vpop.eup %3423  ;;  %v1343_v19 = vmul.f32 0.5, %v1342_v49  ;;  %v1324_v39 = vsub.f32 1.5, %v1323_v17  ;;  %v1332_v41 = vmul.f32 %v4554_v21, %v1331_v8  ;;  %v4582_v9 = vmul.f32 %v4480_v18, %v1304_v16 }
 0x136   : > { %v4577_v53 = vpop.eup %3425  ;;  %v1352_v25 = vmul.f32 %v4560_v58, %v1351_v40  ;;  %v1314_v14 = vsub.f32 1.5, %v1313_v36  ;;  %vm1739_vm11 = vcmp.eq.f32.partialorder %v4501_v6, inf  ;;  %vm1715_vm12 = vcmp.eq.f32.partialorder %v4496_v35, inf }
 0x137   : > { %v4584_v30 = vpop.eup %3427  ;;  %v1344_v49 = vsub.f32 1.5, %v1343_v19  ;;  %v4588_v17 = vmul.f32 %v4515_v47, %v1324_v39  ;;  %v1333_v32 = vmul.f32 0.5, %v1332_v41  ;;  %vm1307_vm13 = vweird.f32 %v4480_v18 }
 0x138   : > { %v1353_v8 = vmul.f32 0.5, %v1352_v25  ;;  %vm1741_vm14 = vcmp.eq.f32.partialorder %v4501_v6, 0.0  ;;  %vm1717_vm15 = vcmp.eq.f32.partialorder %v4496_v35, 0.0  ;;  %v1678_v40 = vmul.f32 %v4582_v9, %v4435_v12 }
 0x139   : > { %v4597_v16 = vmul.f32 %v4510_v54, %v1314_v14  ;;  %v4600_v36 = vmul.f32 %v4539_v57, %v1344_v49  ;;  %v1702_v19 = vmul.f32 %v4588_v17, %v4478_v22  ;;  %v1334_v39 = vsub.f32 1.5, %v1333_v32 }
 0x13a   : > { %v1354_v41 = vsub.f32 1.5, %v1353_v8  ;;  %vm1326_vm5 = vweird.f32 %v4478_v22  ;;  %v1680_v25 = vsel %vm1679_vm7, %v4435_v12, %v1678_v40  ;;  %v1682_v14 = vand.u32 2147483648, %v4435_v12 }
 0x13b   : > { %v1690_v49 = vmul.f32 %v4597_v16, %v4457_v59  ;;  %v1726_v3 = vmul.f32 %v4600_v36, %v4486_v34  ;;  %v1704_v32 = vsel %vm1703_vm6, %v4478_v22, %v1702_v19  ;;  %v4619_v8 = vmul.f32 %v4554_v21, %v1334_v39 }
 0x13c   : > { %vm1691_vm3 = vcmp.eq.f32.partialorder %v4457_v59, inf  ;;  %v4623_v11 = vmul.f32 %v4560_v58, %v1354_v41  ;;  %v4627_v40 = vsel %vm1705_vm9, %v1706_v10, %v1704_v32  ;;  %v1694_v46 = vand.u32 2147483648, %v4457_v59 }
 0x13d   : > { %v1692_v15 = vsel %vm1691_vm3, %v4457_v59, %v1690_v49  ;;  %v1728_v19 = vsel %vm1727_vm8, %v4486_v34, %v1726_v3  ;;  %3429 = vrsqrt.f32 %v4627_v40  ;;  %v4637_v39 = vsel %vm1681_vm1, %v1682_v14, %v1680_v25 }
 0x13e   : > { %v1281_v41 = vmul.f32 %v4577_v53, %v4507_v27  ;;  %v4643_v10 = vsel %vm1729_vm10, %v1730_v48, %v1728_v19  ;;  %v1738_v49 = vmul.f32 %v4623_v11, %v4501_v6  ;;  %v1714_v32 = vmul.f32 %v4619_v8, %v4496_v35  ;;  %vm4680_vm10 = vmor %vm1306_vm0, %vm1307_vm13 }
 0x13f   : > { %vm1693_vm3 = vcmp.eq.f32.partialorder %v4457_v59, 0.0  ;;  %3431 = vrsqrt.f32 %v4643_v10  ;;  %vm1327_vm6 = vweird.f32 %v4515_v47  ;;  %v1718_v3 = vand.u32 2147483648, %v4496_v35 }
 0x140   : > { %v4653_v25 = vsel %vm1693_vm3, %v1694_v46, %v1692_v15  ;;  %vm1347_vm7 = vweird.f32 %v4539_v57  ;;  %v1740_v48 = vsel %vm1739_vm11, %v4501_v6, %v1738_v49  ;;  %v1716_v14 = vsel %vm1715_vm12, %v4496_v35, %v1714_v32  ;;  %vm4693_vm12 = vmor %vm1326_vm5, %vm1327_vm6 }
 0x141   : > { %3433 = vrsqrt.f32 %v4637_v39  ;;  %v4665_v19 = vsel %vm1741_vm14, %v1742_v63, %v1740_v48  ;;  %v4669_v46 = vsel %vm1717_vm15, %v1718_v3, %v1716_v14  ;;  %v1282_v15 = vmul.f32 %v4577_v53, %v1281_v41 }
 0x142   : > { %3435 = vrsqrt.f32 %v4653_v25  ;;  %vm1346_vm8 = vweird.f32 %v4486_v34  ;;  %vm1357_vm9 = vweird.f32 %v4560_v58  ;;  %v1291_v49 = vmul.f32 %v4584_v30, %v4512_v51 }
 0x143   : > { %3437 = vrsqrt.f32 %v4665_v19  ;;  %v4686_v32 = vpop.eup %3429  ;;  %vm1356_vm11 = vweird.f32 %v4501_v6  ;;  %vm1337_vm13 = vweird.f32 %v4554_v21  ;;  %v1283_v12 = vmul.f32 0.5, %v1282_v15  ;;  %vm4701_vm14 = vmor %vm1346_vm8, %vm1347_vm7 }
 0x144   : > { %3439 = vrsqrt.f32 %v4669_v46  ;;  %v2025_v6 = vmul.f32 %v4686_v32, %v4627_v40  ;;  %vm1655_vm15 = vcmp.eq.f32.partialorder %v4507_v27, inf  ;;  %v1292_v48 = vmul.f32 %v4584_v30, %v1291_v49  ;;  %vm4725_vm0 = vmor %vm1356_vm11, %vm1357_vm9 }
 0x145   : > { %v4717_v14 = vpop.eup %3431  ;;  %vm2030_vm1 = vweird.f32 %v4627_v40  ;;  %vm1336_vm5 = vweird.f32 %v4496_v35  ;;  %v1284_v3 = vsub.f32 1.5, %v1283_v12  ;;  %vm1657_vm3 = vcmp.eq.f32.partialorder %v4507_v27, 0.0 }
 0x146   : > { %v1261_v49 = vmul.f32 %v4566_v26, %v4493_v20  ;;  %v2045_v15 = vmul.f32 %v4717_v14, %v4643_v10  ;;  %v2026_v56 = vmul.f32 %v4686_v32, %v2025_v6  ;;  %vm2051_vm7 = vweird.f32 %v4717_v14 }
 0x147   : > { %v4734_v0 = vpop.eup %3433  ;;  %vm2031_vm8 = vweird.f32 %v4686_v32  ;;  %v4752_v55 = vmul.f32 %v4577_v53, %v1284_v3  ;;  %v1293_v13 = vmul.f32 0.5, %v1292_v48  ;;  %vm2060_vm4 = vweird.f32 %v4665_v19 }
 0x148   : > { %v4744_v12 = vpop.eup %3435  ;;  %v2005_v38 = vmul.f32 %v4734_v0, %v4637_v39  ;;  %v2046_v62 = vmul.f32 %v4717_v14, %v2045_v15  ;;  %v2027_v24 = vmul.f32 0.5, %v2026_v56  ;;  %vm2011_vm2 = vweird.f32 %v4734_v0  ;;  %vm4779_vm9 = vmor %vm2030_vm1, %vm2031_vm8 }
 0x149   : > { %v3438_v42 = vpop.eup %3437  ;;  %v2015_v6 = vmul.f32 %v4744_v12, %v4653_v25  ;;  %v1262_v56 = vmul.f32 %v4566_v26, %v1261_v49  ;;  %vm2021_vm11 = vweird.f32 %v4744_v12  ;;  %vm1316_vm6 = vweird.f32 %v4457_v59  ;;  %vm4794_vm1 = vmor %vm1336_vm5, %vm1337_vm13 }
 0x14a   : > { %v4758_v2 = vpop.eup %3439  ;;  %v2055_v44 = vmul.f32 %v3438_v42, %v4665_v19  ;;  %v2006_v5 = vmul.f32 %v4734_v0, %v2005_v38  ;;  %v2047_v3 = vmul.f32 0.5, %v2046_v62  ;;  %v2028_v15 = vsub.f32 1.5, %v2027_v24 }
 0x14b   : > { %v2035_v1 = vmul.f32 %v4758_v2, %v4669_v46  ;;  %v2016_v50 = vmul.f32 %v4744_v12, %v2015_v6  ;;  %v1654_v38 = vmul.f32 %v4752_v55, %v4507_v27  ;;  %v1294_v24 = vsub.f32 1.5, %v1293_v13 }
 0x14c   : > { %v2056_v48 = vmul.f32 %v3438_v42, %v2055_v44  ;;  %v2007_v52 = vmul.f32 0.5, %v2006_v5  ;;  %v2048_v23 = vsub.f32 1.5, %v2047_v3  ;;  %v2029_v43 = vmul.f32 %v4686_v32, %v2028_v15 }
 0x14d   : > { %v2036_v62 = vmul.f32 %v4758_v2, %v2035_v1  ;;  %v2017_v6 = vmul.f32 0.5, %v2016_v50  ;;  %v1656_v3 = vsel %vm1655_vm15, %v4507_v27, %v1654_v38  ;;  %v6882_v50 = vand.u32 2147483648, %v4507_v27 }
 0x14e   : > { %v2057_v49 = vmul.f32 0.5, %v2056_v48  ;;  %v2008_v5 = vsub.f32 1.5, %v2007_v52  ;;  %v2049_v15 = vmul.f32 %v4717_v14, %v2048_v23  ;;  %v2033_v13 = vsel %vm4779_vm9, %v4686_v32, %v2029_v43 }
 0x14f   : > { %v2037_v52 = vmul.f32 0.5, %v2036_v62  ;;  %v4802_v40 = vsel %vm1657_vm3, %v6882_v50, %v1656_v3  ;;  %vm6883_vm15 = vweird.f32 %v4643_v10  ;;  %vm2061_vm9 = vweird.f32 %v3438_v42 }
 0x150   : > { %vm2052_vm8 = vmor %vm6883_vm15, %vm2051_vm7  ;;  %v2058_v23 = vsub.f32 1.5, %v2057_v49  ;;  %v2009_v35 = vmul.f32 %v4734_v0, %v2008_v5  ;;  %v2018_v43 = vsub.f32 1.5, %v2017_v6  ;;  %vm2041_vm13 = vweird.f32 %v4758_v2 }
 0x151   : > { %v2053_v32 = vsel %vm2052_vm8, %v4717_v14, %v2049_v15  ;;  %v2038_v48 = vsub.f32 1.5, %v2037_v52  ;;  %vm6884_vm5 = vweird.f32 %v4637_v39  ;;  %3441 = vrsqrt.f32 %v4802_v40  ;;  %v6895_v52 = vld [vmem:[#allocation68_spill] sm:$0xff] }
 0x152   : > { %vm4815_vm3 = vmor %vm6884_vm5, %vm2011_vm2  ;;  %v6887_v10 = vsel %vm4701_vm14, %v4539_v57, %v4600_v36  ;;  %v2059_v14 = vmul.f32 %v3438_v42, %v2058_v23  ;;  %v6888_v49 = vsel %vm4693_vm12, %v4515_v47, %v4588_v17  ;;  %vm6889_vm2 = vweird.f32 %v4653_v25 }
 0x153   : > { %v2094_v62 = vmul.f32 %v2053_v32, %v6887_v10  ;;  %v2092_v44 = vmul.f32 %v2033_v13, %v6888_v49  ;;  %v2013_v39 = vsel %vm4815_vm3, %v4734_v0, %v2009_v35  ;;  %vm4837_vm7 = vmor %vm6889_vm2, %vm2021_vm11  ;;  %v2039_v57 = vmul.f32 %v4758_v2, %v2038_v48  ;;  %v6896_v32 = vld [vmem:[#allocation64_spill] sm:$0xff] }
 0x154   : > { %vm2062_vm14 = vmor %vm2060_vm4, %vm2061_vm9  ;;  %vm2040_vm12 = vweird.f32 %v4669_v46  ;;  %v2019_v47 = vmul.f32 %v4744_v12, %v2018_v43  ;;  %v4847_v17 = vmul.f32 %v4584_v30, %v1294_v24  ;;  %v6892_v25 = vsel %vm4680_vm10, %v4480_v18, %v4582_v9 }
 0x155   : > { %v2126_v0 = vmul.f32 %v2094_v62, %v4419_v61  ;;  %v2063_v36 = vsel %vm2062_vm14, %v3438_v42, %v2059_v14  ;;  %vm2042_vm11 = vmor %vm2040_vm12, %vm2041_vm13  ;;  %v2090_v19 = vmul.f32 %v2013_v39, %v6892_v25  ;;  %v1263_v34 = vmul.f32 0.5, %v1262_v56  ;;  %v6899_v62 = vld [vmem:[#allocation66_spill] sm:$0xff]  ;;  %v6902_v39 = vld [vmem:[#allocation67_spill] sm:$0xff] }
 0x156   : > { %v6893_v46 = vsel %vm4725_vm0, %v4560_v58, %v4623_v11  ;;  %v1339_v42 = vsel %vm4794_vm1, %v4554_v21, %v4619_v8  ;;  %v2043_v61 = vsel %vm2042_vm11, %v4758_v2, %v2039_v57  ;;  %vm6894_vm4 = vweird.f32 %v4510_v54 }
 0x157   : > { %v2095_v24 = vmul.f32 %v2063_v36, %v6893_v46  ;;  %vm1318_vm10 = vmor %vm1316_vm6, %vm6894_vm4  ;;  %v2023_v18 = vsel %vm4837_vm7, %v4744_v12, %v2019_v47  ;;  %2184 = vmatpush.msra.mxu2 %v2126_v0  ;;  %v2124_v11 = vmul.f32 %v2092_v44, %v4369_v45  ;;  %v2093_v9 = vmul.f32 %v2043_v61, %v1339_v42  ;;  %v3442_v2 = vpop.eup %3441 }
 0x158   : > { %v1319_v58 = vsel %vm1318_vm10, %v4510_v54, %v4597_v16  ;;  %v1666_v21 = vmul.f32 %v4847_v17, %v4512_v51  ;;  %3443 = vrsqrt.f32 %v4543_v7  ;;  %v1264_v63 = vsub.f32 1.5, %v1263_v34 }
 0x159   : > { %v2127_v59 = vmul.f32 %v2095_v24, %v4421_v28  ;;  %v2091_v8 = vmul.f32 %v2023_v18, %v1319_v58  ;;  %2185 = vmatpush.msra.mxu2 %v2124_v11  ;;  %v2122_v22 = vmul.f32 %v2090_v19, %v4312_v33  ;;  %v1985_v12 = vmul.f32 %v3442_v2, %v4802_v40 }
 0x15a   : > { %vm1667_vm0 = vcmp.eq.f32.partialorder %v4512_v51, inf  ;;  %v1670_v45 = vand.u32 2147483648, %v4512_v51  ;;  %v2125_v54 = vmul.f32 %v2093_v9, %v4371_v60  ;;  %vm1669_vm6 = vcmp.eq.f32.partialorder %v4512_v51, 0.0 }
 0x15b   : > { %2225 = vmatpush.msra.mxu3 %v2127_v59  ;;  %v1668_v16 = vsel %vm1667_vm0, %v4512_v51, %v1666_v21  ;;  %v4889_v28 = vmul.f32 %v4566_v26, %v1264_v63  ;;  %2186 = vmatpush.msra.mxu2 %v2122_v22  ;;  %vm1286_vm1 = vweird.f32 %v4507_v27  ;;  %v1986_v33 = vmul.f32 %v3442_v2, %v1985_v12 }
 0x15c   : > { %v4892_v56 = vsel %vm1669_vm6, %v1670_v45, %v1668_v16  ;;  %v1271_v5 = vmul.f32 %v4572_v37, %v4499_v29  ;;  %v2123_v6 = vmul.f32 %v2091_v8, %v4314_v31  ;;  %vm1287_vm15 = vweird.f32 %v4577_v53 }
 0x15d   : > { %2226 = vmatpush.msra.mxu3 %v2125_v54  ;;  %3445 = vrsqrt.f32 %v4892_v56  ;;  %v1630_v60 = vmul.f32 %v4889_v28, %v4493_v20  ;;  %v1987_v3 = vmul.f32 0.5, %v1986_v33  ;;  %vm1631_vm8 = vcmp.eq.f32.partialorder %v4493_v20, inf  ;;  %vm4920_vm3 = vmor %vm1286_vm1, %vm1287_vm15 }
 0x15e   : > { %v1634_v15 = vand.u32 2147483648, %v4493_v20  ;;  %v1272_v13 = vmul.f32 %v4572_v37, %v1271_v5  ;;  %v4904_v1 = vpop.eup %3443  ;;  %vm1297_vm9 = vweird.f32 %v4584_v30  ;;  %vm1633_vm13 = vcmp.eq.f32.partialorder %v4493_v20, 0.0 }
 0x15f   : > { %2227 = vmatpush.msra.mxu3 %v2123_v6  ;;  %v1632_v31 = vsel %vm1631_vm8, %v4493_v20, %v1630_v60  ;;  %v1241_v50 = vmul.f32 %v6895_v52, %v4483_v4  ;;  %v1988_v23 = vsub.f32 1.5, %v1987_v3  ;;  %vm1991_vm5 = vweird.f32 %v3442_v2 }
 0x160   : > { %v4911_v35 = vsel %vm1633_vm13, %v1634_v15, %v1632_v31  ;;  %v1273_v43 = vmul.f32 0.5, %v1272_v13  ;;  %v4914_v48 = vadd.f32 1.0, %v6896_v32  ;;  %vm1296_vm2 = vweird.f32 %v4512_v51 }
 0x161   : > { %3447 = vrsqrt.f32 %v4911_v35  ;;  %v1242_v10 = vmul.f32 %v6895_v52, %v1241_v50  ;;  %v1989_v14 = vmul.f32 %v3442_v2, %v1988_v23  ;;  %vm1990_vm7 = vweird.f32 %v4802_v40  ;;  %vm4931_vm14 = vmor %vm1296_vm2, %vm1297_vm9 }
 0x162   : > { %3449 = vrsqrt.f32 %v6899_v62  ;;  %v1274_v27 = vsub.f32 1.5, %v1273_v43  ;;  %v1289_v51 = vsel %vm4920_vm3, %v4577_v53, %v4752_v55  ;;  %vm1992_vm12 = vmor %vm1990_vm7, %vm1991_vm5  ;;  %v1251_v40 = vmul.f32 %v4904_v1, %v4543_v7 }
 0x163   : > { %v3446_v44 = vpop.eup %3445  ;;  %3451 = vrsqrt.f32 %v6902_v39  ;;  %v1243_v41 = vmul.f32 0.5, %v1242_v10  ;;  %v1993_v57 = vsel %vm1992_vm12, %v3442_v2, %v1989_v14  ;;  %v1299_v47 = vsel %vm4931_vm14, %v4584_v30, %v4847_v17  ;;  %v6903_v17 = vld [vmem:[#allocation54_spill] sm:$0xff]  ;;  %v6906_v14 = vld [vmem:[#allocation56_spill] sm:$0xff] }
 0x164   : > { %v1995_v0 = vmul.f32 %v3446_v44, %v4892_v56  ;;  %v4949_v36 = vmul.f32 %v4572_v37, %v1274_v27  ;;  %v2088_v25 = vmul.f32 %v1993_v57, %v1289_v51  ;;  %vm1267_vm11 = vweird.f32 %v4566_v26 }
 0x165   : > { %v1244_v55 = vsub.f32 1.5, %v1243_v41  ;;  %v1252_v53 = vmul.f32 %v4904_v1, %v1251_v40  ;;  %vm1643_vm4 = vcmp.eq.f32.partialorder %v4499_v29, inf  ;;  %vm1645_vm10 = vcmp.eq.f32.partialorder %v4499_v29, 0.0  ;;  %v6907_v40 = vld [vmem:[#allocation14_spill] sm:$0xff] }
 0x166   : > { %v1996_v19 = vmul.f32 %v3446_v44, %v1995_v0  ;;  %v1642_v34 = vmul.f32 %v4949_v36, %v4499_v29  ;;  %v2120_v46 = vmul.f32 %v2088_v25, %v6903_v17  ;;  %vm1266_vm0 = vweird.f32 %v4493_v20  ;;  %v6911_v25 = vld [vmem:[#allocation7_spill] sm:$0xff] }
 0x167   : > { %v3448_v30 = vpop.eup %3447  ;;  %v1646_v24 = vand.u32 2147483648, %v4499_v29  ;;  %v4961_v42 = vmul.f32 %v6895_v52, %v1244_v55  ;;  %v1253_v61 = vmul.f32 0.5, %v1252_v53  ;;  %vm1607_vm6 = vcmp.eq.f32.partialorder %v4483_v4, inf  ;;  %vm5000_vm14 = vmor %vm1266_vm0, %vm1267_vm11 }
 0x168   : > { %v4963_v18 = vpop.eup %3449  ;;  %v1997_v11 = vmul.f32 0.5, %v1996_v19  ;;  %v1965_v9 = vmul.f32 %v3448_v30, %v4911_v35  ;;  %v1644_v58 = vsel %vm1643_vm4, %v4499_v29, %v1642_v34  ;;  %2187 = vmatpush.msra.mxu2 %v2120_v46  ;;  %v1610_v8 = vand.u32 2147483648, %v4483_v4  ;;  %v6917_v46 = vld [vmem:[#allocation47_spill] sm:$0xff] }
 0x169   : > { %v4968_v21 = vpop.eup %3451  ;;  %v4970_v2 = vsel %vm1645_vm10, %v1646_v24, %v1644_v58  ;;  %v1606_v59 = vmul.f32 %v4961_v42, %v4483_v4  ;;  %v1254_v63 = vsub.f32 1.5, %v1253_v61  ;;  %vm2001_vm1 = vweird.f32 %v3446_v44 }
 0x16a   : > { %v1998_v22 = vsub.f32 1.5, %v1997_v11  ;;  %v1966_v12 = vmul.f32 %v3448_v30, %v1965_v9  ;;  %vm1276_vm15 = vweird.f32 %v4499_v29  ;;  %3453 = vrsqrt.f32 %v4970_v2 }
 0x16b   : > { %v1608_v45 = vsel %vm1607_vm6, %v4483_v4, %v1606_v59  ;;  %vm1609_vm8 = vcmp.eq.f32.partialorder %v4483_v4, 0.0  ;;  %v4980_v54 = vmul.f32 %v4904_v1, %v1254_v63  ;;  %v1221_v16 = vmul.f32 %v4963_v18, %v6899_v62  ;;  %v6919_v63 = vld [vmem:[#allocation59_spill] sm:$0xff] }
 0x16c   : > { %v1999_v33 = vmul.f32 %v3446_v44, %v1998_v22  ;;  %vm2000_vm9 = vweird.f32 %v4892_v56  ;;  %v1967_v5 = vmul.f32 0.5, %v1966_v12  ;;  %v4985_v6 = vsel %vm1609_vm8, %v1610_v8, %v1608_v45  ;;  %v6918_v8 = vld [vmem:[#allocation53_spill] sm:$0xff] }
 0x16d   : > { %vm2002_vm13 = vmor %vm2000_vm9, %vm2001_vm1  ;;  %vm1971_vm5 = vweird.f32 %v3448_v30  ;;  %3455 = vrsqrt.f32 %v4985_v6  ;;  %v1618_v60 = vmul.f32 %v4980_v54, %v4543_v7  ;;  %vm1619_vm3 = vcmp.eq.f32.partialorder %v4543_v7, inf }
 0x16e   : > { %v2003_v3 = vsel %vm2002_vm13, %v3446_v44, %v1999_v33  ;;  %v1968_v15 = vsub.f32 1.5, %v1967_v5  ;;  %v1622_v13 = vand.u32 2147483648, %v4543_v7  ;;  %v1222_v31 = vmul.f32 %v4963_v18, %v1221_v16 }
 0x16f   : > { %v2089_v50 = vmul.f32 %v2003_v3, %v1299_v47  ;;  %vm1277_vm2 = vweird.f32 %v4572_v37  ;;  %v1620_v56 = vsel %vm1619_vm3, %v4543_v7, %v1618_v60  ;;  %vm1621_vm7 = vcmp.eq.f32.partialorder %v4543_v7, 0.0  ;;  %v6909_v47 = vld [vmem:[#allocation60_spill] sm:$0xff] }
 0x170   : > { %v3454_v23 = vpop.eup %3453  ;;  %v1969_v32 = vmul.f32 %v3448_v30, %v1968_v15  ;;  %vm1970_vm12 = vweird.f32 %v4911_v35  ;;  %v5005_v38 = vsel %vm1621_vm7, %v1622_v13, %v1620_v56  ;;  %v1223_v10 = vmul.f32 0.5, %v1222_v31  ;;  %vm5030_vm0 = vmor %vm1276_vm15, %vm1277_vm2 }
 0x171   : > { %v2121_v49 = vmul.f32 %v2089_v50, %v6906_v14  ;;  %vm1972_vm4 = vmor %vm1970_vm12, %vm1971_vm5  ;;  %v1975_v27 = vmul.f32 %v3454_v23, %v4970_v2  ;;  %vm1247_vm10 = vweird.f32 %v6895_v52  ;;  %3457 = vrsqrt.f32 %v5005_v38 }
 0x172   : > { %v1269_v20 = vsel %vm5000_vm14, %v4566_v26, %v4889_v28  ;;  %v1973_v44 = vsel %vm1972_vm4, %v3448_v30, %v1969_v32  ;;  %v1224_v35 = vsub.f32 1.5, %v1223_v10  ;;  %v1231_v51 = vmul.f32 %v4968_v21, %v6902_v39  ;;  %v6920_v10 = vld [vmem:[#allocation50_spill] sm:$0xff]  ;;  %v6924_v26 = vld [vmem:[#allocation39_spill] sm:$0xff] }
 0x173   : > { %v3456_v41 = vpop.eup %3455  ;;  %v6908_v57 = vrot.slane %v6907_v40, 7  ;;  %v6910_v0 = vrot.slane %v6909_v47, 7  ;;  %vm6912_vm11 = vcmp.lt.s32.totalorder %v6911_v25, 1  ;;  %2228 = vmatpush.msra.mxu3 %v2121_v49  ;;  %v2086_v53 = vmul.f32 %v1973_v44, %v1269_v20 }
 0x174   : > { %v1976_v28 = vmul.f32 %v3454_v23, %v1975_v27  ;;  %vm1246_vm6 = vweird.f32 %v4483_v4  ;;  %v1279_v19 = vsel %vm5030_vm0, %v4572_v37, %v4949_v36  ;;  %v1945_v30 = vmul.f32 %v3456_v41, %v4985_v6 }
 0x175   : > { %v5024_v55 = vsel %vm6912_vm11, %v6910_v0, %v6908_v57  ;;  %vm5039_vm1 = vmor %vm1246_vm6, %vm1247_vm10  ;;  %v5045_v29 = vmul.f32 %v4963_v18, %v1224_v35  ;;  %v1232_v17 = vmul.f32 %v4968_v21, %v1231_v51  ;;  %v2118_v24 = vmul.f32 %v2086_v53, %v6917_v46  ;;  %v6921_v35 = vld [vmem:[#allocation57_spill] sm:$0xff] }
 0x176   : > { %v1977_v61 = vmul.f32 0.5, %v1976_v28  ;;  %vm1980_vm15 = vweird.f32 %v4970_v2  ;;  %v1249_v4 = vsel %vm5039_vm1, %v6895_v52, %v4961_v42  ;;  %vm1257_vm8 = vweird.f32 %v4904_v1  ;;  %v6922_v51 = vld [vmem:[#allocation65_spill] sm:$0xff] }
 0x177   : > { %v1946_v37 = vmul.f32 %v3456_v41, %v1945_v30  ;;  %v1582_v36 = vmul.f32 %v5045_v29, %v6899_v62  ;;  %vm1583_vm9 = vcmp.eq.f32.partialorder %v6899_v62, inf  ;;  %v1233_v11 = vmul.f32 0.5, %v1232_v17  ;;  %v3458_v9 = vpop.eup %3457  ;;  %2188 = vmatpush.msra.mxu2 %v2118_v24 }
 0x178   : > { %v1978_v58 = vsub.f32 1.5, %v1977_v61  ;;  %vm1981_vm13 = vweird.f32 %v3454_v23  ;;  %vm1256_vm5 = vweird.f32 %v4543_v7  ;;  %v1586_v59 = vand.u32 2147483648, %v6899_v62 }
 0x179   : > { %v1201_v52 = vmul.f32 %v6919_v63, %v6918_v8  ;;  %v1947_v42 = vmul.f32 0.5, %v1946_v37  ;;  %v1955_v22 = vmul.f32 %v3458_v9, %v5005_v38  ;;  %v1584_v12 = vsel %vm1583_vm9, %v6899_v62, %v1582_v36  ;;  %vm1982_vm2 = vmor %vm1980_vm15, %vm1981_vm13 }
 0x17a   : > { %vm1585_vm3 = vcmp.eq.f32.partialorder %v6899_v62, 0.0  ;;  %v1979_v45 = vmul.f32 %v3454_v23, %v1978_v58  ;;  %v1234_v33 = vsub.f32 1.5, %v1233_v11  ;;  %vm1951_vm7 = vweird.f32 %v3456_v41  ;;  %vm1258_vm0 = vmor %vm1256_vm5, %vm1257_vm8 }
 0x17b   : > { %v5065_v16 = vsel %vm1585_vm3, %v1586_v59, %v1584_v12  ;;  %v1202_v5 = vmul.f32 %v6919_v63, %v1201_v52  ;;  %v1948_v60 = vsub.f32 1.5, %v1947_v42  ;;  %v1956_v3 = vmul.f32 %v3458_v9, %v1955_v22 }
 0x17c   : > { %3459 = vrsqrt.f32 %v5065_v16  ;;  %v1983_v15 = vsel %vm1982_vm2, %v3454_v23, %v1979_v45  ;;  %vm1950_vm14 = vweird.f32 %v4985_v6  ;;  %v5073_v13 = vmul.f32 %v4968_v21, %v1234_v33 }
 0x17d   : > { %v1203_v31 = vmul.f32 0.5, %v1202_v5  ;;  %v2087_v50 = vmul.f32 %v1983_v15, %v1279_v19  ;;  %v1949_v56 = vmul.f32 %v3456_v41, %v1948_v60  ;;  %v1957_v43 = vmul.f32 0.5, %v1956_v3  ;;  %vm1952_vm4 = vmor %vm1950_vm14, %vm1951_vm7  ;;  %v6940_v60 = vld [vmem:[#allocation62_spill] sm:$0xff] }
 0x17e   : > { %vm1595_vm12 = vcmp.eq.f32.partialorder %v6902_v39, inf  ;;  %v1594_v2 = vmul.f32 %v5073_v13, %v6902_v39  ;;  %vm1597_vm10 = vcmp.eq.f32.partialorder %v6902_v39, 0.0  ;;  %v1598_v32 = vand.u32 2147483648, %v6902_v39 }
 0x17f   : > { %v1204_v23 = vsub.f32 1.5, %v1203_v31  ;;  %v2119_v6 = vmul.f32 %v2087_v50, %v6920_v10  ;;  %v1953_v14 = vsel %vm1952_vm4, %v3456_v41, %v1949_v56  ;;  %v1958_v49 = vsub.f32 1.5, %v1957_v43 }
 0x180   : > { %vm1961_vm11 = vweird.f32 %v3458_v9  ;;  %v2084_v27 = vmul.f32 %v1953_v14, %v1249_v4  ;;  %v1596_v20 = vsel %vm1595_vm12, %v6902_v39, %v1594_v2  ;;  %v1211_v57 = vmul.f32 %v6922_v51, %v6921_v35  ;;  %v6927_v4 = vld [vmem:[#allocation46_spill] sm:$0xff] }
 0x181   : > { %v5083_v44 = vmul.f32 %v6919_v63, %v1204_v23  ;;  %3461 = vrsqrt.f32 %v4914_v48  ;;  %2229 = vmatpush.msra.mxu3 %v2119_v6  ;;  %v1959_v41 = vmul.f32 %v3458_v9, %v1958_v49  ;;  %vm1960_vm6 = vweird.f32 %v5005_v38  ;;  %v6932_v6 = vld [vmem:[#allocation29_spill] sm:$0xff] }
 0x182   : > { %v3460_v47 = vpop.eup %3459  ;;  %v5095_v0 = vsel %vm1597_vm10, %v1598_v32, %v1596_v20  ;;  %vm6923_vm1 = vcmp.eq.s32.totalorder %v6911_v25, 0  ;;  %v2116_v28 = vmul.f32 %v2084_v27, %v6924_v26  ;;  %vm1962_vm15 = vmor %vm1960_vm6, %vm1961_vm11  ;;  %v1259_v7 = vsel %vm1258_vm0, %v4904_v1, %v4980_v54  ;;  %v6925_v1 = vld [vmem:[#allocation49_spill] sm:$0xff]  ;;  %v6926_v54 = vld [vmem:[#allocation58_spill] sm:$0xff] }
 0x183   : > { %v833_v53 = vsel %vm6923_vm1, 0.0, %v5024_v55  ;;  %v1925_v19 = vmul.f32 %v3460_v47, %v5065_v16  ;;  %3463 = vrsqrt.f32 %v5095_v0  ;;  %v1963_v34 = vsel %vm1962_vm15, %v3458_v9, %v1959_v41 }
 0x184   : > { %v1558_v38 = vmul.f32 %v5083_v44, %v6918_v8  ;;  %vm1559_vm8 = vcmp.eq.f32.partialorder %v6918_v8, inf  ;;  %2189 = vmatpush.msra.mxu2 %v2116_v28  ;;  %v2085_v30 = vmul.f32 %v1963_v34, %v1259_v7  ;;  %v1562_v55 = vand.u32 2147483648, %v6918_v8 }
 0x185   : > { %v1926_v17 = vmul.f32 %v3460_v47, %v1925_v19  ;;  %v1212_v46 = vmul.f32 %v6922_v51, %v1211_v57  ;;  %vm1227_vm9 = vweird.f32 %v4963_v18  ;;  %vm1561_vm13 = vcmp.eq.f32.partialorder %v6918_v8, 0.0  ;;  %v6934_v19 = vld [vmem:[#allocation52_spill] sm:$0xff] }
 0x186   : > { %v1560_v24 = vsel %vm1559_vm8, %v6918_v8, %v1558_v38  ;;  %v1181_v61 = vmul.f32 %v6926_v54, %v6925_v1  ;;  %v2117_v37 = vmul.f32 %v2085_v30, %v6927_v4  ;;  %vm1226_vm5 = vweird.f32 %v6899_v62 }
 0x187   : > { %v1927_v36 = vmul.f32 0.5, %v1926_v17  ;;  %v5116_v11 = vsel %vm1561_vm13, %v1562_v55, %v1560_v24  ;;  %v1213_v9 = vmul.f32 0.5, %v1212_v46  ;;  %v5118_v58 = vpop.eup %3461  ;;  %vm1237_vm3 = vweird.f32 %v4968_v21  ;;  %vm5129_vm2 = vmor %vm1226_vm5, %vm1227_vm9 }
 0x188   : > { %3465 = vrsqrt.f32 %v5116_v11  ;;  %v1182_v59 = vmul.f32 %v6926_v54, %v1181_v61  ;;  %v5125_v42 = vadd.f32 %v833_v53, %v6907_v40  ;;  %2230 = vmatpush.msra.mxu3 %v2117_v37  ;;  %vm1931_vm7 = vweird.f32 %v3460_v47  ;;  %v6937_v37 = vld [vmem:[#allocation32_spill] sm:$0xff] }
 0x189   : > { %v3464_v52 = vpop.eup %3463  ;;  %v1928_v12 = vsub.f32 1.5, %v1927_v36  ;;  %v1214_v62 = vsub.f32 1.5, %v1213_v9  ;;  %v1229_v45 = vsel %vm5129_vm2, %v4963_v18, %v5045_v29  ;;  %vm1236_vm14 = vweird.f32 %v6902_v39 }
 0x18a   : > { %v1935_v40 = vmul.f32 %v3464_v52, %v5095_v0  ;;  %v1183_v33 = vmul.f32 0.5, %v1182_v59  ;;  %vm1930_vm12 = vweird.f32 %v5065_v16  ;;  %vm5142_vm4 = vmor %vm1236_vm14, %vm1237_vm3  ;;  %v1191_v18 = vmul.f32 %v5118_v58, %v4914_v48 }
 0x18b   : > { %v1929_v5 = vmul.f32 %v3460_v47, %v1928_v12  ;;  %v5147_v3 = vmul.f32 %v6922_v51, %v1214_v62  ;;  %vm1932_vm10 = vmor %vm1930_vm12, %vm1931_vm7  ;;  %v1239_v39 = vsel %vm5142_vm4, %v4968_v21, %v5073_v13  ;;  %vm1206_vm11 = vweird.f32 %v6918_v8  ;;  %v6938_v12 = vld [vmem:[#allocation42_spill] sm:$0xff]  ;;  %v6939_v62 = vld [vmem:[#allocation55_spill] sm:$0xff] }
 0x18c   : > { %v1936_v29 = vmul.f32 %v3464_v52, %v1935_v40  ;;  %vm1207_vm0 = vweird.f32 %v6919_v63  ;;  %v1184_v16 = vsub.f32 1.5, %v1183_v33  ;;  %vm1571_vm6 = vcmp.eq.f32.partialorder %v6921_v35, inf }
 0x18d   : > { %v1933_v15 = vsel %vm1932_vm10, %v3460_v47, %v1929_v5  ;;  %v1570_v31 = vmul.f32 %v5147_v3, %v6921_v35  ;;  %v1192_v50 = vmul.f32 %v5118_v58, %v1191_v18  ;;  %v1574_v32 = vand.u32 2147483648, %v6921_v35  ;;  %vm5191_vm2 = vmor %vm1206_vm11, %vm1207_vm0 }
 0x18e   : > { %v3466_v56 = vpop.eup %3465  ;;  %v2082_v43 = vmul.f32 %v1933_v15, %v1229_v45  ;;  %v1937_v2 = vmul.f32 0.5, %v1936_v29  ;;  %v5163_v21 = vmul.f32 %v6926_v54, %v1184_v16  ;;  %vm1573_vm1 = vcmp.eq.f32.partialorder %v6921_v35, 0.0 }
 0x18f   : > { %v1905_v13 = vmul.f32 %v3466_v56, %v5116_v11  ;;  %v1572_v23 = vsel %vm1571_vm6, %v6921_v35, %v1570_v31  ;;  %v1193_v10 = vmul.f32 0.5, %v1192_v50  ;;  %vm1941_vm15 = vweird.f32 %v3464_v52 }
 0x190   : > { %v2114_v14 = vmul.f32 %v2082_v43, %v6932_v6  ;;  %v1938_v49 = vsub.f32 1.5, %v1937_v2  ;;  %v5169_v27 = vsel %vm1573_vm1, %v1574_v32, %v1572_v23  ;;  %vm1940_vm8 = vweird.f32 %v5095_v0  ;;  %v6933_v0 = vld [vmem:[#allocation41_spill] sm:$0xff]  ;;  %v6946_v32 = vld [vmem:[#allocation36_spill] sm:$0xff] }
 0x191   : > { %v1906_v20 = vmul.f32 %v3466_v56, %v1905_v13  ;;  %3467 = vrsqrt.f32 %v5169_v27  ;;  %v1534_v57 = vmul.f32 %v5163_v21, %v6925_v1  ;;  %vm1535_vm9 = vcmp.eq.f32.partialorder %v6925_v1, inf  ;;  %vm1942_vm13 = vmor %vm1940_vm8, %vm1941_vm15  ;;  %v6947_v13 = vld [vmem:[#allocation48_spill] sm:$0xff] }
 0x192   : > { %2190 = vmatpush.msra.mxu2 %v2114_v14  ;;  %v1939_v47 = vmul.f32 %v3464_v52, %v1938_v49  ;;  %v1538_v41 = vand.u32 2147483648, %v6925_v1  ;;  %v1194_v53 = vsub.f32 1.5, %v1193_v10  ;;  %vm1537_vm5 = vcmp.eq.f32.partialorder %v6925_v1, 0.0 }
 0x193   : > { %v1907_v26 = vmul.f32 0.5, %v1906_v20  ;;  %v1536_v28 = vsel %vm1535_vm9, %v6925_v1, %v1534_v57  ;;  %v1161_v7 = vmul.f32 %v6934_v19, %v6933_v0  ;;  %vm1217_vm3 = vweird.f32 %v6922_v51 }
 0x194   : > { %v1943_v34 = vsel %vm1942_vm13, %v3464_v52, %v1939_v47  ;;  %v5182_v38 = vsel %vm1537_vm5, %v1538_v41, %v1536_v28  ;;  %v5185_v30 = vmul.f32 %v5118_v58, %v1194_v53  ;;  %vm1911_vm7 = vweird.f32 %v3466_v56 }
 0x195   : > { %v2083_v17 = vmul.f32 %v1943_v34, %v1239_v39  ;;  %v1908_v46 = vsub.f32 1.5, %v1907_v26  ;;  %3469 = vrsqrt.f32 %v5182_v38  ;;  %v1209_v24 = vsel %vm5191_vm2, %v6919_v63, %v5083_v44 }
 0x196   : > { %vm1910_vm14 = vweird.f32 %v5116_v11  ;;  %v1546_v61 = vmul.f32 %v5185_v30, %v4914_v48  ;;  %v1162_v8 = vmul.f32 %v6934_v19, %v1161_v7  ;;  %vm1547_vm12 = vcmp.eq.f32.partialorder %v4914_v48, inf }
 0x197   : > { %v3468_v4 = vpop.eup %3467  ;;  %v2115_v36 = vmul.f32 %v2083_v17, %v6937_v37  ;;  %v1909_v9 = vmul.f32 %v3466_v56, %v1908_v46  ;;  %v1550_v59 = vand.u32 2147483648, %v4914_v48  ;;  %vm1912_vm4 = vmor %vm1910_vm14, %vm1911_vm7  ;;  %vm1549_vm10 = vcmp.eq.f32.partialorder %v4914_v48, 0.0 }
 0x198   : > { %v1915_v52 = vmul.f32 %v3468_v4, %v5169_v27  ;;  %v1548_v63 = vsel %vm1547_vm12, %v4914_v48, %v1546_v61  ;;  %v1163_v44 = vmul.f32 0.5, %v1162_v8  ;;  %vm1187_vm11 = vweird.f32 %v6926_v54 }
 0x199   : > { %2231 = vmatpush.msra.mxu3 %v2115_v36  ;;  %v1913_v11 = vsel %vm1912_vm4, %v3466_v56, %v1909_v9  ;;  %v5211_v22 = vsel %vm1549_vm10, %v1550_v59, %v1548_v63  ;;  %v1171_v45 = vmul.f32 %v6939_v62, %v6938_v12  ;;  %vm1216_vm0 = vweird.f32 %v6921_v35  ;;  %v6943_v35 = vld [vmem:[#allocation26_spill] sm:$0xff]  ;;  %v6949_v9 = vld [vmem:[#allocation37_spill] sm:$0xff]  ;;  %v6950_v59 = vld [vmem:[#allocation51_spill] sm:$0xff] }
 0x19a   : > { %v2080_v40 = vmul.f32 %v1913_v11, %v1209_v24  ;;  %v1916_v33 = vmul.f32 %v3468_v4, %v1915_v52  ;;  %3471 = vrsqrt.f32 %v5211_v22  ;;  %v5219_v18 = vadd.f32 %v5125_v42, %v6940_v60  ;;  %vm5223_vm6 = vmor %vm1216_vm0, %vm1217_vm3  ;;  %v6948_v24 = vld [vmem:[#allocation31_spill] sm:$0xff] }
 0x19b   : > { %v3470_v5 = vpop.eup %3469  ;;  %vm1186_vm1 = vweird.f32 %v6925_v1  ;;  %v1164_v29 = vsub.f32 1.5, %v1163_v44  ;;  %v1172_v16 = vmul.f32 %v6939_v62, %v1171_v45  ;;  %v1219_v31 = vsel %vm5223_vm6, %v6922_v51, %v5147_v3 }
 0x19c   : > { %v2112_v15 = vmul.f32 %v2080_v40, %v6943_v35  ;;  %v1917_v42 = vmul.f32 0.5, %v1916_v33  ;;  %vm5236_vm15 = vmor %vm1186_vm1, %vm1187_vm11  ;;  %v1885_v56 = vmul.f32 %v3470_v5, %v5182_v38  ;;  %vm1920_vm8 = vweird.f32 %v5169_v27  ;;  %v6951_v33 = vld [vmem:[#allocation23_spill] sm:$0xff] }
 0x19d   : > { %v1189_v1 = vsel %vm5236_vm15, %v6926_v54, %v5163_v21  ;;  %v5247_v43 = vmul.f32 %v6934_v19, %v1164_v29  ;;  %v1173_v51 = vmul.f32 0.5, %v1172_v16  ;;  %vm1921_vm9 = vweird.f32 %v3468_v4 }
 0x19e   : > { %2191 = vmatpush.msra.mxu2 %v2112_v15  ;;  %v1918_v3 = vsub.f32 1.5, %v1917_v42  ;;  %v1886_v2 = vmul.f32 %v3470_v5, %v1885_v56  ;;  %vm1197_vm13 = vweird.f32 %v5118_v58  ;;  %v1141_v23 = vmul.f32 %v6947_v13, %v6946_v32  ;;  %vm1922_vm7 = vmor %vm1920_vm8, %vm1921_vm9  ;;  %v6966_v56 = vld [vmem:[#allocation20_spill] sm:$0xff] }
 0x19f   : > { %v1510_v10 = vmul.f32 %v5247_v43, %v6933_v0  ;;  %vm1511_vm5 = vcmp.eq.f32.partialorder %v6933_v0, inf  ;;  %vm1513_vm3 = vcmp.eq.f32.partialorder %v6933_v0, 0.0  ;;  %v1174_v54 = vsub.f32 1.5, %v1173_v51 }
 0x1a0   : > { %v3472_v21 = vpop.eup %3471  ;;  %v1919_v6 = vmul.f32 %v3468_v4, %v1918_v3  ;;  %v1887_v14 = vmul.f32 0.5, %v1886_v2  ;;  %vm1196_vm2 = vweird.f32 %v4914_v48  ;;  %v1514_v49 = vand.u32 2147483648, %v6933_v0  ;;  %v6956_v2 = vld [vmem:[#allocation24_spill] sm:$0xff] }
 0x1a1   : > { %v1142_v20 = vmul.f32 %v6947_v13, %v1141_v23  ;;  %vm1891_vm14 = vweird.f32 %v3470_v5  ;;  %v1895_v57 = vmul.f32 %v3472_v21, %v5211_v22  ;;  %v1512_v47 = vsel %vm1511_vm5, %v6933_v0, %v1510_v10  ;;  %vm1198_vm8 = vmor %vm1196_vm2, %vm1197_vm13 }
 0x1a2   : > { %v5264_v41 = vmul.f32 %v6939_v62, %v1174_v54  ;;  %v1923_v53 = vsel %vm1922_vm7, %v3468_v4, %v1919_v6  ;;  %v1888_v26 = vsub.f32 1.5, %v1887_v14  ;;  %v5266_v28 = vsel %vm1513_vm3, %v1514_v49, %v1512_v47  ;;  %v6960_v49 = vld [vmem:[#allocation45_spill] sm:$0xff] }
 0x1a3   : > { %v1143_v7 = vmul.f32 0.5, %v1142_v20  ;;  %v2081_v34 = vmul.f32 %v1923_v53, %v1219_v31  ;;  %vm1890_vm12 = vweird.f32 %v5182_v38  ;;  %v1896_v17 = vmul.f32 %v3472_v21, %v1895_v57 }
 0x1a4   : > { %3473 = vrsqrt.f32 %v5266_v28  ;;  %v1889_v27 = vmul.f32 %v3470_v5, %v1888_v26  ;;  %vm1166_vm4 = vweird.f32 %v6933_v0  ;;  %v1522_v55 = vmul.f32 %v5264_v41, %v6938_v12  ;;  %vm1892_vm11 = vmor %vm1890_vm12, %vm1891_vm14 }
 0x1a5   : > { %vm1523_vm10 = vcmp.eq.f32.partialorder %v6938_v12, inf  ;;  %v1144_v46 = vsub.f32 1.5, %v1143_v7  ;;  %v2113_v61 = vmul.f32 %v2081_v34, %v6948_v24  ;;  %v1897_v8 = vmul.f32 0.5, %v1896_v17 }
 0x1a6   : > { %vm1525_vm0 = vcmp.eq.f32.partialorder %v6938_v12, 0.0  ;;  %v1526_v38 = vand.u32 2147483648, %v6938_v12  ;;  %v1893_v4 = vsel %vm1892_vm11, %v3470_v5, %v1889_v27  ;;  %v1524_v37 = vsel %vm1523_vm10, %v6938_v12, %v1522_v55 }
 0x1a7   : > { %v5280_v36 = vmul.f32 %v6947_v13, %v1144_v46  ;;  %v1151_v52 = vmul.f32 %v6950_v59, %v6949_v9  ;;  %2232 = vmatpush.msra.mxu3 %v2113_v61  ;;  %v2078_v63 = vmul.f32 %v1893_v4, %v1189_v1  ;;  %v1898_v44 = vsub.f32 1.5, %v1897_v8  ;;  %v6955_v1 = vld [vmem:[#allocation44_spill] sm:$0xff] }
 0x1a8   : > { %vm1901_vm6 = vweird.f32 %v3472_v21  ;;  %v5284_v11 = vsel %vm1525_vm0, %v1526_v38, %v1524_v37  ;;  %vm1900_vm1 = vweird.f32 %v5211_v22  ;;  %vm1487_vm15 = vcmp.eq.f32.partialorder %v6946_v32, inf }
 0x1a9   : > { %3475 = vrsqrt.f32 %v5284_v11  ;;  %v1486_v45 = vmul.f32 %v5280_v36, %v6946_v32  ;;  %v2110_v5 = vmul.f32 %v2078_v63, %v6951_v33  ;;  %v1899_v60 = vmul.f32 %v3472_v21, %v1898_v44  ;;  %vm1902_vm9 = vmor %vm1900_vm1, %vm1901_vm6  ;;  %v6963_v44 = vld [vmem:[#allocation19_spill] sm:$0xff] }
 0x1aa   : > { %v3474_v40 = vpop.eup %3473  ;;  %v1490_v39 = vand.u32 2147483648, %v6946_v32  ;;  %v1152_v22 = vmul.f32 %v6950_v59, %v1151_v52  ;;  %vm1167_vm5 = vweird.f32 %v6934_v19  ;;  %vm1489_vm3 = vcmp.eq.f32.partialorder %v6946_v32, 0.0 }
 0x1ab   : > { %v1865_v29 = vmul.f32 %v3474_v40, %v5266_v28  ;;  %v1488_v16 = vsel %vm1487_vm15, %v6946_v32, %v1486_v45  ;;  %2192 = vmatpush.msra.mxu2 %v2110_v5  ;;  %v1199_v35 = vsel %vm1198_vm8, %v5118_v58, %v5185_v30  ;;  %v1903_v48 = vsel %vm1902_vm9, %v3472_v21, %v1899_v60  ;;  %vm5310_vm2 = vmor %vm1166_vm4, %vm1167_vm5  ;;  %v6954_v30 = vld [vmem:[#allocation34_spill] sm:$0xff] }
 0x1ac   : > { %v5304_v15 = vsel %vm1489_vm3, %v1490_v39, %v1488_v16  ;;  %v1153_v31 = vmul.f32 0.5, %v1152_v22  ;;  %v2079_v42 = vmul.f32 %v1903_v48, %v1199_v35  ;;  %vm1177_vm13 = vweird.f32 %v6939_v62  ;;  %v6964_v60 = vld [vmem:[#allocation30_spill] sm:$0xff]  ;;  %v6965_v39 = vld [vmem:[#allocation40_spill] sm:$0xff] }
 0x1ad   : > { %v1866_v50 = vmul.f32 %v3474_v40, %v1865_v29  ;;  %3477 = vrsqrt.f32 %v5304_v15  ;;  %vm1176_vm7 = vweird.f32 %v6938_v12  ;;  %vm1146_vm14 = vweird.f32 %v6946_v32 }
 0x1ae   : > { %v1154_v58 = vsub.f32 1.5, %v1153_v31  ;;  %v1121_v51 = vmul.f32 %v6955_v1, %v6954_v30  ;;  %v2111_v23 = vmul.f32 %v2079_v42, %v6956_v2  ;;  %v1169_v0 = vsel %vm5310_vm2, %v6934_v19, %v5247_v43  ;;  %vm5325_vm10 = vmor %vm1176_vm7, %vm1177_vm13  ;;  %v6959_v43 = vld [vmem:[#allocation35_spill] sm:$0xff] }
 0x1af   : > { %v3476_v3 = vpop.eup %3475  ;;  %v1867_v10 = vmul.f32 0.5, %v1866_v50  ;;  %vm1147_vm12 = vweird.f32 %v6947_v13  ;;  %vm1870_vm4 = vweird.f32 %v5266_v28  ;;  %vm1871_vm11 = vweird.f32 %v3474_v40  ;;  %v6972_v28 = vld [vmem:[#allocation25_spill] sm:$0xff] }
 0x1b0   : > { %v1875_v54 = vmul.f32 %v3476_v3, %v5284_v11  ;;  %v5331_v21 = vmul.f32 %v6950_v59, %v1154_v58  ;;  %v1122_v6 = vmul.f32 %v6955_v1, %v1121_v51  ;;  %2233 = vmatpush.msra.mxu3 %v2111_v23  ;;  %v1179_v19 = vsel %vm5325_vm10, %v6939_v62, %v5264_v41  ;;  %vm1872_vm1 = vmor %vm1870_vm4, %vm1871_vm11 }
 0x1b1   : > { %v1868_v14 = vsub.f32 1.5, %v1867_v10  ;;  %v1131_v20 = vmul.f32 %v6960_v49, %v6959_v43  ;;  %vm1499_vm0 = vcmp.eq.f32.partialorder %v6949_v9, inf  ;;  %vm1501_vm6 = vcmp.eq.f32.partialorder %v6949_v9, 0.0  ;;  %vm5356_vm8 = vmor %vm1146_vm14, %vm1147_vm12  ;;  %v6967_v10 = vld [vmem:[#allocation63_spill] sm:$0xff] }
 0x1b2   : > { %v1876_v57 = vmul.f32 %v3476_v3, %v1875_v54  ;;  %v1498_v47 = vmul.f32 %v5331_v21, %v6949_v9  ;;  %v1123_v53 = vmul.f32 0.5, %v1122_v6  ;;  %v1502_v34 = vand.u32 2147483648, %v6949_v9 }
 0x1b3   : > { %v3478_v26 = vpop.eup %3477  ;;  %v1869_v7 = vmul.f32 %v3474_v40, %v1868_v14  ;;  %v1132_v17 = vmul.f32 %v6960_v49, %v1131_v20  ;;  %vm1881_vm15 = vweird.f32 %v3476_v3  ;;  %vm1880_vm9 = vweird.f32 %v5284_v11 }
 0x1b4   : > { %v1877_v62 = vmul.f32 0.5, %v1876_v57  ;;  %v1845_v41 = vmul.f32 %v3478_v26, %v5304_v15  ;;  %v1500_v27 = vsel %vm1499_vm0, %v6949_v9, %v1498_v47  ;;  %v1124_v24 = vsub.f32 1.5, %v1123_v53  ;;  %vm1882_vm3 = vmor %vm1880_vm9, %vm1881_vm15  ;;  %v6969_v57 = vld [vmem:[#allocation17_spill] sm:$0xff] }
 0x1b5   : > { %v1873_v55 = vsel %vm1872_vm1, %v3474_v40, %v1869_v7  ;;  %v5350_v46 = vsel %vm1501_vm6, %v1502_v34, %v1500_v27  ;;  %v1133_v61 = vmul.f32 0.5, %v1132_v17  ;;  %v1149_v37 = vsel %vm5356_vm8, %v6947_v13, %v5280_v36  ;;  %v6971_v7 = vld [vmem:[#allocation43_spill] sm:$0xff] }
 0x1b6   : > { %v2076_v8 = vmul.f32 %v1873_v55, %v1169_v0  ;;  %v1878_v38 = vsub.f32 1.5, %v1877_v62  ;;  %v1846_v4 = vmul.f32 %v3478_v26, %v1845_v41  ;;  %3479 = vrsqrt.f32 %v5350_v46 }
 0x1b7   : > { %v5367_v52 = vmul.f32 %v6955_v1, %v1124_v24  ;;  %v1134_v63 = vsub.f32 1.5, %v1133_v61  ;;  %vm1850_vm5 = vweird.f32 %v5304_v15  ;;  %vm1463_vm13 = vcmp.eq.f32.partialorder %v6954_v30, inf  ;;  %v6968_v15 = vld [vmem:[#allocation61_spill] sm:$0xff] }
 0x1b8   : > { %v2108_v32 = vmul.f32 %v2076_v8, %v6963_v44  ;;  %v1879_v45 = vmul.f32 %v3476_v3, %v1878_v38  ;;  %v1847_v40 = vmul.f32 0.5, %v1846_v4  ;;  %v1466_v33 = vand.u32 2147483648, %v6954_v30  ;;  %v6973_v4 = vld [vmem:[#allocation38_spill] sm:$0xff] }
 0x1b9   : > { %v1462_v11 = vmul.f32 %v5367_v52, %v6954_v30  ;;  %v5377_v13 = vmul.f32 %v6960_v49, %v1134_v63  ;;  %vm1851_vm2 = vweird.f32 %v3478_v26  ;;  %v1101_v22 = vmul.f32 %v6965_v39, %v6964_v60 }
 0x1ba   : > { %2193 = vmatpush.msra.mxu2 %v2108_v32  ;;  %v1883_v36 = vsel %vm1882_vm3, %v3476_v3, %v1879_v45  ;;  %v1848_v5 = vsub.f32 1.5, %v1847_v40  ;;  %vm1465_vm7 = vcmp.eq.f32.partialorder %v6954_v30, 0.0  ;;  %vm1475_vm14 = vcmp.eq.f32.partialorder %v6959_v43, inf  ;;  %vm1852_vm12 = vmor %vm1850_vm5, %vm1851_vm2 }
 0x1bb   : > { %v2077_v29 = vmul.f32 %v1883_v36, %v1179_v19  ;;  %v1464_v16 = vsel %vm1463_vm13, %v6954_v30, %v1462_v11  ;;  %v1474_v35 = vmul.f32 %v5377_v13, %v6959_v43  ;;  %v1102_v50 = vmul.f32 %v6965_v39, %v1101_v22 }
 0x1bc   : > { %v3480_v48 = vpop.eup %3479  ;;  %v1849_v31 = vmul.f32 %v3478_v26, %v1848_v5  ;;  %v5385_v42 = vsel %vm1465_vm7, %v1466_v33, %v1464_v16  ;;  %v1478_v3 = vand.u32 2147483648, %v6959_v43  ;;  %vm1477_vm4 = vcmp.eq.f32.partialorder %v6959_v43, 0.0 }
 0x1bd   : > { %v2109_v58 = vmul.f32 %v2077_v29, %v6966_v56  ;;  %v1855_v51 = vmul.f32 %v3480_v48, %v5350_v46  ;;  %3481 = vrsqrt.f32 %v5385_v42  ;;  %v1476_v23 = vsel %vm1475_vm14, %v6959_v43, %v1474_v35  ;;  %v6976_v29 = vld [vmem:[#allocation18_spill] sm:$0xff] }
 0x1be   : > { %v1853_v2 = vsel %vm1852_vm12, %v3478_v26, %v1849_v31  ;;  %v1103_v0 = vmul.f32 0.5, %v1102_v50  ;;  %3483 = vrsqrt.f32 %v6967_v10  ;;  %v5398_v6 = vsel %vm1477_vm4, %v1478_v3, %v1476_v23  ;;  %v6970_v26 = vld [vmem:[#allocation33_spill] sm:$0xff] }
 0x1bf   : > { %2234 = vmatpush.msra.mxu3 %v2109_v58  ;;  %v2074_v12 = vmul.f32 %v1853_v2, %v1149_v37  ;;  %v1856_v54 = vmul.f32 %v3480_v48, %v1855_v51  ;;  %v5401_v14 = vmul.f32 3.3333334e-05, %v6968_v15  ;;  %3485 = vrsqrt.f32 %v5398_v6 }
 0x1c0   : > { %v1104_v19 = vsub.f32 1.5, %v1103_v0  ;;  %v5405_v20 = vmul.f32 3.3333334e-05, %v5219_v18  ;;  %v1111_v34 = vmul.f32 %v6971_v7, %v6970_v26  ;;  %vm1156_vm10 = vweird.f32 %v6949_v9 }
 0x1c1   : > { %v2106_v47 = vmul.f32 %v2074_v12, %v6969_v57  ;;  %v1857_v53 = vmul.f32 0.5, %v1856_v54  ;;  %vm1157_vm11 = vweird.f32 %v6950_v59  ;;  %vm1126_vm0 = vweird.f32 %v6954_v30  ;;  %v6979_v57 = vld [vmem:[#allocation21_spill] sm:$0xff] }
 0x1c2   : > { %v5414_v17 = vmul.f32 %v6965_v39, %v1104_v19  ;;  %vm1861_vm6 = vweird.f32 %v3480_v48  ;;  %vm1127_vm1 = vweird.f32 %v6955_v1  ;;  %v1112_v18 = vmul.f32 %v6971_v7, %v1111_v34  ;;  %vm1158_vm9 = vmor %vm1156_vm10, %vm1157_vm11  ;;  %v6981_v34 = vld [vmem:[#allocation16_spill] sm:$0xff] }
 0x1c3   : > { %v3482_v62 = vpop.eup %3481  ;;  %2194 = vmatpush.msra.mxu2 %v2106_v47  ;;  %v1858_v41 = vsub.f32 1.5, %v1857_v53  ;;  %vm1860_vm15 = vweird.f32 %v5350_v46  ;;  %vm1439_vm8 = vcmp.eq.f32.partialorder %v6964_v60, inf  ;;  %v1442_v8 = vand.u32 2147483648, %v6964_v60  ;;  %vm5443_vm2 = vmor %vm1126_vm0, %vm1127_vm1  ;;  %v6980_v47 = vld [vmem:[#allocation27_spill] sm:$0xff] }
 0x1c4   : > { %v1825_v27 = vmul.f32 %v3482_v62, %v5385_v42  ;;  %v1438_v55 = vmul.f32 %v5414_v17, %v6964_v60  ;;  %v5423_v24 = vpop.eup %3483  ;;  %v1113_v38 = vmul.f32 0.5, %v1112_v18  ;;  %v1081_v37 = vmul.f32 %v6973_v4, %v6972_v28  ;;  %vm1862_vm5 = vmor %vm1860_vm15, %vm1861_vm6 }
 0x1c5   : > { %v1859_v61 = vmul.f32 %v3480_v48, %v1858_v41  ;;  %v3486_v46 = vpop.eup %3485  ;;  %v1159_v63 = vsel %vm1158_vm9, %v6950_v59, %v5331_v21  ;;  %vm1441_vm3 = vcmp.eq.f32.partialorder %v6964_v60, 0.0  ;;  %vm1137_vm13 = vweird.f32 %v6960_v49 }
 0x1c6   : > { %v1826_v44 = vmul.f32 %v3482_v62, %v1825_v27  ;;  %v1440_v32 = vsel %vm1439_vm8, %v6964_v60, %v1438_v55  ;;  %v1835_v45 = vmul.f32 %v3486_v46, %v5398_v6  ;;  %vm1136_vm7 = vweird.f32 %v6959_v43 }
 0x1c7   : > { %v1863_v9 = vsel %vm1862_vm5, %v3480_v48, %v1859_v61  ;;  %v5437_v40 = vsel %vm1441_vm3, %v1442_v8, %v1440_v32  ;;  %v1129_v33 = vsel %vm5443_vm2, %v6955_v1, %v5367_v52  ;;  %v1114_v5 = vsub.f32 1.5, %v1113_v38  ;;  %vm5457_vm12 = vmor %vm1136_vm7, %vm1137_vm13 }
 0x1c8   : > { %v2075_v11 = vmul.f32 %v1863_v9, %v1159_v63  ;;  %v1827_v21 = vmul.f32 0.5, %v1826_v44  ;;  %3487 = vrsqrt.f32 %v5437_v40  ;;  %v1836_v36 = vmul.f32 %v3486_v46, %v1835_v45 }
 0x1c9   : > { %v1082_v22 = vmul.f32 %v6973_v4, %v1081_v37  ;;  %vm1831_vm14 = vweird.f32 %v3482_v62  ;;  %v1091_v43 = vmul.f32 %v5423_v24, %v6967_v10  ;;  %v1139_v1 = vsel %vm5457_vm12, %v6960_v49, %v5377_v13  ;;  %v6982_v37 = vld [vmem:[#allocation8_spill] sm:$0xff] }
 0x1ca   : > { %v2107_v30 = vmul.f32 %v2075_v11, %v6976_v29  ;;  %v1828_v16 = vsub.f32 1.5, %v1827_v21  ;;  %v1837_v52 = vmul.f32 0.5, %v1836_v36  ;;  %v5468_v48 = vmul.f32 %v6971_v7, %v1114_v5 }
 0x1cb   : > { %v1083_v31 = vmul.f32 0.5, %v1082_v22  ;;  %vm1830_vm4 = vweird.f32 %v5385_v42  ;;  %vm1840_vm10 = vweird.f32 %v5398_v6  ;;  %v1092_v56 = vmul.f32 %v5423_v24, %v1091_v43 }
 0x1cc   : > { %2235 = vmatpush.msra.mxu3 %v2107_v30  ;;  %v1829_v50 = vmul.f32 %v3482_v62, %v1828_v16  ;;  %vm1832_vm11 = vmor %vm1830_vm4, %vm1831_vm14  ;;  %v1838_v58 = vsub.f32 1.5, %v1837_v52  ;;  %vm1841_vm0 = vweird.f32 %v3486_v46  ;;  %v1450_v51 = vmul.f32 %v5468_v48, %v6970_v26  ;;  %v6984_v30 = vld [vmem:[#allocation28_spill] sm:$0xff] }
 0x1cd   : > { %v1084_v49 = vsub.f32 1.5, %v1083_v31  ;;  %vm1106_vm6 = vweird.f32 %v6964_v60  ;;  %vm1451_vm1 = vcmp.eq.f32.partialorder %v6970_v26, inf  ;;  %vm1453_vm15 = vcmp.eq.f32.partialorder %v6970_v26, 0.0  ;;  %vm1842_vm8 = vmor %vm1840_vm10, %vm1841_vm0  ;;  %v6983_v60 = vld [vmem:[#allocation22_spill] sm:$0xff] }
 0x1ce   : > { %v3488_v13 = vpop.eup %3487  ;;  %v1833_v3 = vsel %vm1832_vm11, %v3482_v62, %v1829_v50  ;;  %v1093_v42 = vmul.f32 0.5, %v1092_v56  ;;  %v1839_v23 = vmul.f32 %v3486_v46, %v1838_v58  ;;  %v1454_v12 = vand.u32 2147483648, %v6970_v26  ;;  %v6985_v56 = vld [vmem:[#allocation15_spill] sm:$0xff] }
 0x1cf   : > { %v2072_v2 = vmul.f32 %v1833_v3, %v1129_v33  ;;  %v1805_v0 = vmul.f32 %v3488_v13, %v5437_v40  ;;  %v1452_v54 = vsel %vm1451_vm1, %v6970_v26, %v1450_v51  ;;  %v5484_v15 = vmul.f32 %v6973_v4, %v1084_v49 }
 0x1d0   : > { %v1094_v19 = vsub.f32 1.5, %v1093_v42  ;;  %v1061_v53 = vmul.f32 %v6980_v47, %v6979_v57  ;;  %v1843_v41 = vsel %vm1842_vm8, %v3486_v46, %v1839_v23  ;;  %v5489_v27 = vsel %vm1453_vm15, %v1454_v12, %v1452_v54 }
 0x1d1   : > { %v2104_v62 = vmul.f32 %v2072_v2, %v6981_v34  ;;  %v1806_v18 = vmul.f32 %v3488_v13, %v1805_v0  ;;  %v2073_v55 = vmul.f32 %v1843_v41, %v1139_v1  ;;  %vm1107_vm9 = vweird.f32 %v6965_v39 }
 0x1d2   : > { %3489 = vrsqrt.f32 %v5489_v27  ;;  %vm1415_vm5 = vcmp.eq.f32.partialorder %v6972_v28, inf  ;;  %v1414_v61 = vmul.f32 %v5484_v15, %v6972_v28  ;;  %v5497_v8 = vmul.f32 %v5423_v24, %v1094_v19  ;;  %vm1108_vm14 = vmor %vm1106_vm6, %vm1107_vm9 }
 0x1d3   : > { %2195 = vmatpush.msra.mxu2 %v2104_v62  ;;  %v1807_v6 = vmul.f32 0.5, %v1806_v18  ;;  %v1062_v38 = vmul.f32 %v6980_v47, %v1061_v53  ;;  %v2105_v46 = vmul.f32 %v2073_v55, %v6982_v37  ;;  %vm1810_vm3 = vweird.f32 %v5437_v40 }
 0x1d4   : > { %vm1417_vm13 = vcmp.eq.f32.partialorder %v6972_v28, 0.0  ;;  %v1418_v63 = vand.u32 2147483648, %v6972_v28  ;;  %vm1811_vm2 = vweird.f32 %v3488_v13  ;;  %v1416_v32 = vsel %vm1415_vm5, %v6972_v28, %v1414_v61 }
 0x1d5   : > { %v1808_v44 = vsub.f32 1.5, %v1807_v6  ;;  %v1426_v9 = vmul.f32 %v5497_v8, %v6967_v10  ;;  %2236 = vmatpush.msra.mxu3 %v2105_v46  ;;  %vm1427_vm7 = vcmp.eq.f32.partialorder %v6967_v10, inf  ;;  %v1430_v11 = vand.u32 2147483648, %v6967_v10  ;;  %vm1812_vm4 = vmor %vm1810_vm3, %vm1811_vm2  ;;  %v6986_v46 = vld [vmem:[#allocation6_spill] sm:$0xff] }
 0x1d6   : > { %v5507_v45 = vsel %vm1417_vm13, %v1418_v63, %v1416_v32  ;;  %v1063_v59 = vmul.f32 0.5, %v1062_v38  ;;  %vm1429_vm12 = vcmp.eq.f32.partialorder %v6967_v10, 0.0  ;;  %v5519_v5 = vadd.f32 1.0, %v5401_v14 }
 0x1d7   : > { %v1809_v21 = vmul.f32 %v3488_v13, %v1808_v44  ;;  %3491 = vrsqrt.f32 %v5507_v45  ;;  %v1428_v33 = vsel %vm1427_vm7, %v6967_v10, %v1426_v9  ;;  %v1071_v16 = vmul.f32 %v6984_v30, %v6983_v60 }
 0x1d8   : > { %v3490_v36 = vpop.eup %3489  ;;  %v5524_v22 = vsel %vm1429_vm12, %v1430_v11, %v1428_v33  ;;  %v1064_v29 = vsub.f32 1.5, %v1063_v59  ;;  %v1109_v35 = vsel %vm1108_vm14, %v6965_v39, %v5414_v17  ;;  %v5537_v31 = vadd.f32 1.0, %v5405_v20 }
 0x1d9   : > { %v1813_v43 = vsel %vm1812_vm4, %v3488_v13, %v1809_v21  ;;  %v1815_v1 = vmul.f32 %v3490_v36, %v5489_v27  ;;  %3493 = vrsqrt.f32 %v5524_v22  ;;  %v1072_v40 = vmul.f32 %v6984_v30, %v1071_v16 }
 0x1da   : > { %v2070_v14 = vmul.f32 %v1813_v43, %v1109_v35  ;;  %v5533_v52 = vmul.f32 %v6980_v47, %v1064_v29  ;;  %vm1116_vm10 = vweird.f32 %v6970_v26  ;;  %vm1117_vm11 = vweird.f32 %v6971_v7  ;;  %v6987_v29 = vld [vmem:[#allocation13_spill] sm:$0xff] }
 0x1db   : > { %v1816_v50 = vmul.f32 %v3490_v36, %v1815_v1  ;;  %v1073_v17 = vmul.f32 0.5, %v1072_v40  ;;  %vm1391_vm0 = vcmp.eq.f32.partialorder %v6979_v57, inf  ;;  %v1394_v13 = vand.u32 2147483648, %v6979_v57  ;;  %vm1118_vm9 = vmor %vm1116_vm10, %vm1117_vm11 }
 0x1dc   : > { %v2102_v58 = vmul.f32 %v2070_v14, %v6985_v56  ;;  %v1390_v39 = vmul.f32 %v5533_v52, %v6979_v57  ;;  %3495 = vrsqrt.f32 %v5519_v5  ;;  %vm1393_vm6 = vcmp.eq.f32.partialorder %v6979_v57, 0.0  ;;  %v6988_v14 = vld [vmem:[#allocation5_spill] sm:$0xff] }
 0x1dd   : > { %v3492_v51 = vpop.eup %3491  ;;  %v1817_v49 = vmul.f32 0.5, %v1816_v50  ;;  %v1074_v42 = vsub.f32 1.5, %v1073_v17  ;;  %vm1821_vm1 = vweird.f32 %v3490_v36  ;;  %vm1086_vm15 = vweird.f32 %v6972_v28 }
 0x1de   : > { %2196 = vmatpush.msra.mxu2 %v2102_v58  ;;  %v1785_v20 = vmul.f32 %v3492_v51, %v5507_v45  ;;  %v1392_v3 = vsel %vm1391_vm0, %v6979_v57, %v1390_v39  ;;  %vm1087_vm8 = vweird.f32 %v6973_v4  ;;  %vm1820_vm5 = vweird.f32 %v5489_v27 }
 0x1df   : > { %v3494_v2 = vpop.eup %3493  ;;  %v1818_v23 = vsub.f32 1.5, %v1817_v49  ;;  %v5551_v0 = vsel %vm1393_vm6, %v1394_v13, %v1392_v3  ;;  %vm1097_vm3 = vweird.f32 %v5423_v24  ;;  %v5563_v53 = vmul.f32 %v6984_v30, %v1074_v42  ;;  %vm1822_vm13 = vmor %vm1820_vm5, %vm1821_vm1 }
 0x1e0   : > { %v1786_v12 = vmul.f32 %v3492_v51, %v1785_v20  ;;  %v1795_v54 = vmul.f32 %v3494_v2, %v5524_v22  ;;  %3497 = vrsqrt.f32 %v5551_v0  ;;  %v1119_v34 = vsel %vm1118_vm9, %v6971_v7, %v5468_v48  ;;  %vm1088_vm10 = vmor %vm1086_vm15, %vm1087_vm8 }
 0x1e1   : > { %v1819_v19 = vmul.f32 %v3490_v36, %v1818_v23  ;;  %vm1403_vm2 = vcmp.eq.f32.partialorder %v6983_v60, inf  ;;  %vm1791_vm7 = vweird.f32 %v3492_v51  ;;  %v1402_v27 = vmul.f32 %v5563_v53, %v6983_v60 }
 0x1e2   : > { %v1787_v62 = vmul.f32 0.5, %v1786_v12  ;;  %v1796_v41 = vmul.f32 %v3494_v2, %v1795_v54  ;;  %v5568_v18 = vpop.eup %3495  ;;  %v1406_v55 = vand.u32 2147483648, %v6983_v60  ;;  %vm1790_vm14 = vweird.f32 %v5507_v45 }
 0x1e3   : > { %v1823_v26 = vsel %vm1822_vm13, %v3490_v36, %v1819_v19  ;;  %v1041_v7 = vmul.f32 %v5568_v18, %v5519_v5  ;;  %vm1801_vm12 = vweird.f32 %v3494_v2  ;;  %v1404_v48 = vsel %vm1403_vm2, %v6983_v60, %v1402_v27  ;;  %vm1792_vm11 = vmor %vm1790_vm14, %vm1791_vm7 }
 0x1e4   : > { %v2071_v6 = vmul.f32 %v1823_v26, %v1119_v34  ;;  %v1788_v61 = vsub.f32 1.5, %v1787_v62  ;;  %v1797_v38 = vmul.f32 0.5, %v1796_v41  ;;  %vm1405_vm4 = vcmp.eq.f32.partialorder %v6983_v60, 0.0 }
 0x1e5   : > { %v1407_v9 = vsel %vm1405_vm4, %v1406_v55, %v1404_v48  ;;  %v1089_v11 = vsel %vm1088_vm10, %v6973_v4, %v5484_v15  ;;  %vm1096_vm0 = vweird.f32 %v6967_v10  ;;  %vm1800_vm1 = vweird.f32 %v5524_v22  ;;  %v6990_v55 = vld [vmem:[#allocation10_spill] sm:$0xff] }
 0x1e6   : > { %v3498_v37 = vpop.eup %3497  ;;  %v2103_v63 = vmul.f32 %v2071_v6, %v6986_v46  ;;  %v1789_v44 = vmul.f32 %v3492_v51, %v1788_v61  ;;  %v1798_v32 = vsub.f32 1.5, %v1797_v38  ;;  %3499 = vrsqrt.f32 %v1407_v9  ;;  %vm1098_vm6 = vmor %vm1096_vm0, %vm1097_vm3 }
 0x1e7   : > { %v1765_v45 = vmul.f32 %v3498_v37, %v5551_v0  ;;  %v1042_v21 = vmul.f32 %v5568_v18, %v1041_v7  ;;  %vm1802_vm15 = vmor %vm1800_vm1, %vm1801_vm12  ;;  %v1099_v10 = vsel %vm1098_vm6, %v5423_v24, %v5497_v8  ;;  %3501 = vrsqrt.f32 %v5537_v31 }
 0x1e8   : > { %2237 = vmatpush.msra.mxu3 %v2103_v63  ;;  %v1793_v59 = vsel %vm1792_vm11, %v3492_v51, %v1789_v44  ;;  %v1799_v28 = vmul.f32 %v3494_v2, %v1798_v32  ;;  %vm1067_vm8 = vweird.f32 %v6980_v47  ;;  %vm1771_vm9 = vweird.f32 %v3498_v37 }
 0x1e9   : > { %v2068_v33 = vmul.f32 %v1793_v59, %v1089_v11  ;;  %v1766_v4 = vmul.f32 %v3498_v37, %v1765_v45  ;;  %v1043_v36 = vmul.f32 0.5, %v1042_v21  ;;  %vm1066_vm5 = vweird.f32 %v6979_v57  ;;  %v6991_v45 = vld [vmem:[#allocation11_spill] sm:$0xff] }
 0x1ea   : > { %v1803_v15 = vsel %vm1802_vm15, %v3494_v2, %v1799_v28  ;;  %vm1068_vm3 = vmor %vm1066_vm5, %vm1067_vm8  ;;  %vm1770_vm13 = vweird.f32 %v5551_v0  ;;  %vm1367_vm7 = vcmp.eq.f32.partialorder %v5519_v5, inf  ;;  %v1370_v57 = vand.u32 2147483648, %v5519_v5  ;;  %v6989_v2 = vld [vmem:[#allocation9_spill] sm:$0xff]  ;;  %v2128_v28 = vld [vmem:[%s6690_s3] sm:$0xff] }
 0x1eb   : > { %v2100_v16 = vmul.f32 %v2068_v33, %v6987_v29  ;;  %v2069_v35 = vmul.f32 %v1803_v15, %v1099_v10  ;;  %v1767_v43 = vmul.f32 0.5, %v1766_v4  ;;  %v1044_v22 = vsub.f32 1.5, %v1043_v36  ;;  %vm1772_vm2 = vmor %vm1770_vm13, %vm1771_vm9  ;;  %v2129_v4 = vld [vmem:[%s6690_s3 + $0x8] sm:$0xff]  ;;  %v6992_v29 = vld [vmem:[#allocation12_spill] sm:$0xff] }
 0x1ec   : > { %v3500_v1 = vpop.eup %3499  ;;  %v1069_v39 = vsel %vm1068_vm3, %v6980_v47, %v5533_v52  ;;  %vm1369_vm14 = vcmp.eq.f32.partialorder %v5519_v5, 0.0  ;;  %vm1077_vm12 = vweird.f32 %v6984_v30  ;;  %vm1076_vm10 = vweird.f32 %v6983_v60 }
 0x1ed   : > { %2197 = vmatpush.msra.mxu2 %v2100_v16  ;;  %v2101_v40 = vmul.f32 %v2069_v35, %v6988_v14  ;;  %v1768_v50 = vsub.f32 1.5, %v1767_v43  ;;  %v1775_v24 = vmul.f32 %v3500_v1, %v1407_v9  ;;  %v1045_v8 = vmul.f32 %v5568_v18, %v1044_v22  ;;  %v5602_v58 = vpop.eup %3501  ;;  %vm1078_vm11 = vmor %vm1076_vm10, %vm1077_vm12  ;;  %v2131_v35 = vld [vmem:[%s6690_s3 + $0x18] sm:$0xff]  ;;  %v2132_v43 = vld [vmem:[%s6690_s3 + $0x20] sm:$0xff] }
 0x1ee   : > { %v1051_v13 = vmul.f32 %v5602_v58, %v5537_v31  ;;  %vm1781_vm4 = vweird.f32 %v3500_v1  ;;  %vm1780_vm0 = vweird.f32 %v1407_v9  ;;  %v1079_v34 = vsel %vm1078_vm11, %v6984_v30, %v5563_v53  ;;  %v2133_v22 = vld [vmem:[%s6690_s3 + $0x28] sm:$0xff]  ;;  %v2135_v14 = vld [vmem:[%s6690_s3 + $0x38] sm:$0xff] }
 0x1ef   : > { %2238 = vmatpush.msra.mxu3 %v2101_v40  ;;  %v1769_v56 = vmul.f32 %v3498_v37, %v1768_v50  ;;  %v1776_v17 = vmul.f32 %v3500_v1, %v1775_v24  ;;  %v1366_v51 = vmul.f32 %v1045_v8, %v5519_v5  ;;  %vm1782_vm6 = vmor %vm1780_vm0, %vm1781_vm4  ;;  %vm1379_vm1 = vcmp.eq.f32.partialorder %v5537_v31, inf  ;;  %v5658_v40 = vpop.permute.xlu2 %2181  ;;  %v5660_v50 = vpop.permute.xlu1 %2176 }
 0x1f0   : > { %v1052_v52 = vmul.f32 %v5602_v58, %v1051_v13  ;;  %v1382_v7 = vand.u32 2147483648, %v5537_v31  ;;  %vm1381_vm15 = vcmp.eq.f32.partialorder %v5537_v31, 0.0  ;;  %vm1047_vm8 = vweird.f32 %v5568_v18 }
 0x1f1   : > { %v1773_v49 = vsel %vm1772_vm2, %v3498_v37, %v1769_v56  ;;  %v1777_v3 = vmul.f32 0.5, %v1776_v17  ;;  %v1368_v42 = vsel %vm1367_vm7, %v5519_v5, %v1366_v51  ;;  %vm1046_vm5 = vweird.f32 %v5519_v5  ;;  %v2147_v56 = vpop.permute.xlu0 %2146 }
 0x1f2   : > { %v2066_v20 = vmul.f32 %v1773_v49, %v1069_v39  ;;  %v1371_v47 = vsel %vm1369_vm14, %v1370_v57, %v1368_v42  ;;  %v1053_v12 = vmul.f32 0.5, %v1052_v52  ;;  %vm1048_vm3 = vmor %vm1046_vm5, %vm1047_vm8  ;;  %vm1057_vm7 = vweird.f32 %v5602_v58 }
 0x1f3   : > { %v1778_v0 = vsub.f32 1.5, %v1777_v3  ;;  %3503 = vrsqrt.f32 %v1371_v47  ;;  %vm1750_vm13 = vweird.f32 %v1371_v47  ;;  %v1049_v63 = vsel %vm1048_vm3, %v5568_v18, %v1045_v8 }
 0x1f4   : > { %v2098_v23 = vmul.f32 %v2066_v20, %v6989_v2  ;;  %v1054_v19 = vsub.f32 1.5, %v1053_v12  ;;  %vm1056_vm12 = vweird.f32 %v5537_v31  ;;  %vm6993_vm0 = vcmp.lt.s32.totalorder %v6911_v25, 1 }
 0x1f5   : > { %v1779_v54 = vmul.f32 %v3500_v1, %v1778_v0  ;;  %vm1058_vm4 = vmor %vm1056_vm12, %vm1057_vm7 }
 0x1f6   : > { %2198 = vmatpush.msra.mxu2 %v2098_v23  ;;  %v1055_v26 = vmul.f32 %v5602_v58, %v1054_v19  ;;  %vm6999_vm5 = vmmov %vm6993_vm0 }
 0x1f7   : > { %v1783_v62 = vsel %vm1782_vm6, %v3500_v1, %v1779_v54  ;;  %v2134_v1 = vld [vmem:[%s6690_s3 + $0x30] sm:$0xff]  ;;  %v5662_v24 = vpop.permute.xlu2 %2166  ;;  %v5664_v39 = vpop.permute.xlu1 %2171  ;;  %vm6994_vm6 = vcmp.lt.s32.totalorder %v6911_v25, 7  ;;  %vm7004_vm12 = vmmov %vm6993_vm0 }
 0x1f8   : > { %v2067_v41 = vmul.f32 %v1783_v62, %v1079_v34  ;;  %v1378_v60 = vmul.f32 %v1055_v26, %v5537_v31  ;;  %v1059_v10 = vsel %vm1058_vm4, %v5602_v58, %v1055_v26  ;;  %vm7005_vm4 = vmmov %vm6993_vm0 }
 0x1f9   : > { %v3504_v27 = vpop.eup %3503 }
 0x1fa   : > { %v2099_v6 = vmul.f32 %v2067_v41, %v6990_v55  ;;  %v1745_v61 = vmul.f32 %v3504_v27, %v1371_v47  ;;  %v1380_v48 = vsel %vm1379_vm1, %v5537_v31, %v1378_v60  ;;  %vm1751_vm9 = vweird.f32 %v3504_v27  ;;  %v2130_v31 = vld [vmem:[%s6690_s3 + $0x10] sm:$0xff]  ;;  %vm6995_vm1 = vmmov %vm6994_vm6 }
 0x1fb   : > { %v1383_v53 = vsel %vm1381_vm15, %v1382_v7, %v1380_v48  ;;  %vm1752_vm2 = vmor %vm1750_vm13, %vm1751_vm9 }
 0x1fc   : > { %2239 = vmatpush.msra.mxu3 %v2099_v6  ;;  %v1746_v38 = vmul.f32 %v3504_v27, %v1745_v61  ;;  %3505 = vrsqrt.f32 %v1383_v53  ;;  %vm1760_vm10 = vweird.f32 %v1383_v53  ;;  %vm6996_vm15 = vmmov %vm6993_vm0 }
 0x1fd   : > { %vm6997_vm8 = vmmov %vm6995_vm1 }
 0x1fe   : > { %v1747_v30 = vmul.f32 0.5, %v1746_v38  ;;  %vm6998_vm9 = vmmov %vm6995_vm1 }
 0x1ff   : > { %v2152_v51 = vpop.permute.xlu2 %2151  ;;  %v2157_v0 = vpop.permute.xlu1 %2156  ;;  %vm7000_vm13 = vmmov %vm6993_vm0 }
 0x200   : > { %v1748_v37 = vsub.f32 1.5, %v1747_v30  ;;  %vm7002_vm7 = vmmov %vm6995_vm1 }
 0x202   : > { %v1749_v46 = vmul.f32 %v3504_v27, %v1748_v37  ;;  %v3506_v32 = vpop.eup %3505 }
 0x203   : > { %v1755_v11 = vmul.f32 %v3506_v32, %v1383_v53  ;;  %vm1761_vm14 = vweird.f32 %v3506_v32  ;;  %v2162_v53 = vpop.permute.xlu0 %2161 }
 0x204   : > { %v1753_v44 = vsel %vm1752_vm2, %v3504_v27, %v1749_v46  ;;  %vm1762_vm11 = vmor %vm1760_vm10, %vm1761_vm14  ;;  %vm7003_vm14 = vcmp.eq.s32.totalorder %v6911_v25, 0 }
 0x205   : > { %v2064_v9 = vmul.f32 %v1753_v44, %v1049_v63  ;;  %v1756_v21 = vmul.f32 %v3506_v32, %v1755_v11  ;;  %vm7001_vm2 = vmmov %vm6993_vm0 }
 0x206   : > { %vm7006_vm10 = vmmov %vm6995_vm1 }
 0x207   : > { %v2096_v59 = vmul.f32 %v2064_v9, %v6991_v45  ;;  %v1757_v33 = vmul.f32 0.5, %v1756_v21 }
 0x209   : > { %2199 = vmatpush.msra.mxu2 %v2096_v59  ;;  %v1758_v5 = vsub.f32 1.5, %v1757_v33 }
 0x20a   : > { %2200 = vmatmul.f32.vlgmr.msra.gmra.mxu2 %v2128_v28 }
 0x20b   : > { %v1759_v18 = vmul.f32 %v3506_v32, %v1758_v5 }
 0x20d   : > { %v1763_v15 = vsel %vm1762_vm11, %v3506_v32, %v1759_v18  ;;  %vm7007_vm11 = vmmov %vm6993_vm0 }
 0x20e   : > { %v2065_v36 = vmul.f32 %v1763_v15, %v1059_v10 }
 0x210   : > { %v2097_v16 = vmul.f32 %v2065_v36, %v6992_v29 }
 0x212   : > { %2203 = vmatmul.f32.gmra.mxu2 %v2129_v4  ;;  %2240 = vmatpush.msra.mxu3 %v2097_v16 }
 0x213   : > { %2241 = vmatmul.f32.vlgmr.msra.gmra.mxu3 %v2128_v28 }
 0x21a   : > { %2206 = vmatmul.f32.gmra.mxu2 %v2130_v31 }
 0x21b   : > { %2244 = vmatmul.f32.gmra.mxu3 %v2129_v4 }
 0x222   : > { %2209 = vmatmul.f32.gmra.mxu2 %v2131_v35 }
 0x223   : > { %2247 = vmatmul.f32.gmra.mxu3 %v2130_v31 }
 0x22a   : > { %2212 = vmatmul.f32.gmra.mxu2 %v2132_v43 }
 0x22b   : > { %2250 = vmatmul.f32.gmra.mxu3 %v2131_v35 }
 0x232   : > { %2215 = vmatmul.f32.gmra.mxu2 %v2133_v22 }
 0x233   : > { %2253 = vmatmul.f32.gmra.mxu3 %v2132_v43 }
 0x23a   : > { %2218 = vmatmul.f32.gmra.mxu2 %v2134_v1 }
 0x23b   : > { %2256 = vmatmul.f32.gmra.mxu3 %v2133_v22 }
 0x242   : > { %2221 = vmatmul.f32.gmra.mxu2 %v2135_v14 }
 0x243   : > { %2259 = vmatmul.f32.gmra.mxu3 %v2134_v1 }
 0x24b   : > { %2262 = vmatmul.f32.gmra.mxu3 %v2135_v14 }
 0x28d   : > { %v2201_v8 = vpop.f32.mrf.mxu2 }
 0x28e   : > { %v2202_v58 = vadd.f32 %v2201_v8, %v2147_v56 }
 0x290   : > { %v5666_v17 = vmax.f32 %v2202_v58, 0.0 }
 0x292   : > { %v5670_v13 = vmul.f32 %v5666_v17, %v5666_v17 }
 0x294   : > { %v2298_v47 = vrot.slane %v5670_v13, 7  ;;  %v2330_v52 = vrot.slane %v5670_v13, 1 }
 0x295   : > { %v2204_v49 = vpop.f32.mrf.mxu2 }
 0x296   : > { %v2205_v57 = vadd.f32 %v2204_v49, %v2152_v51  ;;  %v2242_v3 = vpop.f32.mrf.mxu3 }
 0x297   : > { %v2243_v63 = vadd.f32 %v2242_v3, %v2147_v56 }
 0x298   : > { %v5672_v20 = vmax.f32 %v2205_v57, 0.0 }
 0x299   : > { %v5696_v11 = vmax.f32 %v2243_v63, 0.0 }
 0x29a   : > { %v2284_v42 = vmul.f32 %v5672_v20, %v5672_v20 }
 0x29b   : > { %v5707_v18 = vmul.f32 %v5696_v11, %v5696_v11 }
 0x29c   : > { %v2300_v2 = vrot.slane %v2284_v42, 7  ;;  %v2332_v23 = vrot.slane %v2284_v42, 1 }
 0x29d   : > { %v2207_v12 = vpop.f32.mrf.mxu2  ;;  %v6787_v22 = vrot.slane %v5707_v18, 7  ;;  %v2331_v1 = vrot.slane %v5707_v18, 1 }
 0x29e   : > { %v2326_v54 = vsel %vm6993_vm0, %v2298_v47, %v2300_v2  ;;  %v5686_v19 = vsel %vm6994_vm6, %v2330_v52, %v2332_v23  ;;  %v2208_v34 = vadd.f32 %v2207_v12, %v2157_v0  ;;  %v2245_v26 = vpop.f32.mrf.mxu3  ;;  %vm7008_vm6 = vmmov %vm6993_vm0 }
 0x29f   : > { %v2404_v62 = vadd.f32 %v2326_v54, %v2284_v42  ;;  %v2246_v44 = vadd.f32 %v2245_v26, %v2152_v51 }
 0x2a0   : > { %v5688_v41 = vmax.f32 %v2208_v34, 0.0 }
 0x2a1   : > { %v5698_v45 = vmax.f32 %v2246_v44, 0.0 }
 0x2a2   : > { %v2286_v27 = vmul.f32 %v5688_v41, %v5688_v41 }
 0x2a3   : > { %v5711_v4 = vmul.f32 %v5698_v45, %v5698_v45 }
 0x2a4   : > { %v2334_v55 = vrot.slane %v2286_v27, 1  ;;  %v2302_v28 = vrot.slane %v2286_v27, 7 }
 0x2a5   : > { %v2210_v6 = vpop.f32.mrf.mxu2  ;;  %v6786_v14 = vrot.slane %v5711_v4, 1  ;;  %v2301_v56 = vrot.slane %v5711_v4, 7 }
 0x2a6   : > { %v2356_v61 = vsel %vm6995_vm1, %v2332_v23, %v2334_v55  ;;  %v2248_v38 = vpop.f32.mrf.mxu3  ;;  %v2211_v37 = vadd.f32 %v2210_v6, %v2162_v53  ;;  %v2324_v15 = vsel %vm6996_vm15, %v2300_v2, %v2302_v28  ;;  %v5745_v23 = vadd.s32 56, %v6911_v25  ;;  %vm7009_vm1 = vmmov %vm6993_vm0 }
 0x2a7   : > { %v2420_v60 = vadd.f32 %v2404_v62, %v2356_v61  ;;  %v2249_v21 = vadd.f32 %v2248_v38, %v2157_v0  ;;  %v2406_v58 = vadd.f32 %v2324_v15, %v2286_v27  ;;  %v5758_v62 = vsel %vm6998_vm9, %v2331_v1, %v6786_v14  ;;  %vm7010_vm15 = vmmov %vm6993_vm0 }
 0x2a8   : > { %v5694_v32 = vmax.f32 %v2211_v37, 0.0  ;;  %vm2385_vm3 = vcmp.eq.s32.totalorder %v5745_v23, 63  ;;  %vm7012_vm9 = vmmov %vm7002_vm7 }
 0x2a9   : > { %v5717_v36 = vmax.f32 %v2249_v21, 0.0  ;;  %v2436_v26 = vmul.f32 3.3333334e-05, %v2420_v60 }
 0x2aa   : > { %v5703_v33 = vmul.f32 %v5694_v32, %v5694_v32 }
 0x2ab   : > { %v5736_v57 = vmul.f32 %v5717_v36, %v5717_v36 }
 0x2ac   : > { %v2336_v29 = vrot.slane %v5703_v33, 1  ;;  %v2304_v8 = vrot.slane %v5703_v33, 7 }
 0x2ad   : > { %v2213_v7 = vpop.f32.mrf.mxu2 }
 0x2ae   : > { %v2251_v48 = vpop.f32.mrf.mxu3  ;;  %v2214_v16 = vadd.f32 %v2213_v7, %v5662_v24  ;;  %v2354_v3 = vsel %vm6997_vm8, %v2334_v55, %v2336_v29  ;;  %v2322_v27 = vsel %vm6999_vm5, %v2302_v28, %v2304_v8  ;;  %v2303_v7 = vrot.slane %v5736_v57, 7  ;;  %vm7011_vm8 = vmmov %vm7002_vm7 }
 0x2af   : > { %v2252_v0 = vadd.f32 %v2251_v48, %v2162_v53  ;;  %v5794_v28 = vadd.f32 1.0, %v2436_v26  ;;  %v5801_v15 = vadd.f32 %v2322_v27, %v5703_v33  ;;  %vm7013_vm5 = vmmov %vm7003_vm14 }
 0x2b0   : > { %v5742_v42 = vmax.f32 %v2214_v16, 0.0 }
 0x2b1   : > { %v5774_v60 = vmax.f32 %v2252_v0, 0.0 }
 0x2b2   : > { %v5769_v48 = vmul.f32 %v5742_v42, %v5742_v42 }
 0x2b5   : > { %v2216_v30 = vpop.f32.mrf.mxu2 }
 0x2b6   : > { %v2254_v46 = vpop.f32.mrf.mxu3  ;;  %v2217_v35 = vadd.f32 %v2216_v30, %v5664_v39 }
 0x2b7   : > { %v2255_v21 = vadd.f32 %v2254_v46, %v5662_v24  ;;  %v2325_v24 = vsel %vm7004_vm12, %v2301_v56, %v2303_v7 }
 0x2b8   : > { %v5747_v12 = vmax.f32 %v2217_v35, 0.0  ;;  %v2407_v27 = vadd.f32 %v2325_v24, %v5736_v57 }
 0x2bd   : > { %v2219_v9 = vpop.f32.mrf.mxu2 }
 0x2be   : > { %v2220_v59 = vadd.f32 %v2219_v9, %v5660_v50  ;;  %v2257_v5 = vpop.f32.mrf.mxu3 }
 0x2bf   : > { %v2258_v55 = vadd.f32 %v2257_v5, %v5664_v39  ;;  %v5778_v39 = vmul.f32 %v5747_v12, %v5747_v12 }
 0x2c0   : > { %v5713_v10 = vmax.f32 %v2220_v59, 0.0 }
 0x2c1   : > { %v5786_v63 = vmax.f32 %v2258_v55, 0.0  ;;  %v2308_v46 = vrot.slane %v5778_v39, 7 }
 0x2c2   : > { %v5730_v51 = vmul.f32 %v5713_v10, %v5713_v10 }
 0x2c4   : > { %v2310_v6 = vrot.slane %v5730_v51, 7 }
 0x2c5   : > { %v2222_v31 = vpop.f32.mrf.mxu2 }
 0x2c6   : > { %v2223_v43 = vadd.f32 %v2222_v31, %v5658_v40  ;;  %v2260_v2 = vpop.f32.mrf.mxu3 }
 0x2c7   : > { %v2261_v54 = vadd.f32 %v2260_v2, %v5660_v50  ;;  %v2422_v50 = vadd.f32 %v2406_v58, %v2354_v3  ;;  %v5820_v58 = vmul.f32 %v5774_v60, %v5774_v60  ;;  %v2306_v3 = vrot.slane %v5769_v48, 7 }
 0x2c8   : > { %v5732_v49 = vmax.f32 %v2223_v43, 0.0  ;;  %v5825_v2 = vmul.f32 %v5786_v63, %v5786_v63 }
 0x2c9   : > { %v5771_v30 = vmax.f32 %v2261_v54, 0.0  ;;  %v2438_v16 = vmul.f32 3.3333334e-05, %v2422_v50  ;;  %v5827_v54 = vmax.f32 %v2255_v21, 0.0 }
 0x2ca   : > { %v2296_v34 = vmul.f32 %v5732_v49, %v5732_v49 }
 0x2cc   : > { %v2312_v61 = vrot.slane %v2296_v34, 7  ;;  %v2344_v38 = vrot.slane %v2296_v34, 1 }
 0x2ce   : > { %v2314_v53 = vsel %vm7000_vm13, %v2310_v6, %v2312_v61  ;;  %v2328_v37 = vsel %vm7001_vm2, %v2312_v61, %v2298_v47  ;;  %v2360_v44 = vsel %vm7002_vm7, %v2344_v38, %v2330_v52  ;;  %v5805_v52 = vmul.f32 %v5771_v30, %v5771_v30  ;;  %v2263_v35 = vpop.f32.mrf.mxu3  ;;  %vm7014_vm13 = vmmov %vm7002_vm7 }
 0x2cf   : > { %v2362_v9 = vsel %vm7003_vm14, 0.0, %v2328_v37  ;;  %v2416_v59 = vadd.f32 %v2314_v53, %v2296_v34  ;;  %v2400_v5 = vsel %vm2385_vm3, 0.0, %v2360_v44  ;;  %v2264_v43 = vadd.f32 %v2263_v35, %v5658_v40  ;;  %vm7015_vm2 = vmmov %vm7002_vm7 }
 0x2d0   : > { %v2402_v47 = vadd.f32 %v2362_v9, %v5670_v13  ;;  %v2316_v34 = vsel %vm7005_vm4, %v2308_v46, %v2310_v6  ;;  %v2335_v40 = vrot.slane %v5736_v57, 1  ;;  %v2311_v55 = vrot.slane %v5805_v52, 7  ;;  %vm7017_vm7 = vmmov %vm7015_vm2 }
 0x2d1   : > { %v2432_v31 = vadd.f32 %v2416_v59, %v2400_v5  ;;  %v5832_v26 = vmax.f32 %v2264_v43, 0.0  ;;  %v5839_v61 = vadd.f32 1.0, %v2438_v16  ;;  %v2338_v53 = vrot.slane %v5769_v48, 1  ;;  %vm7018_vm14 = vmmov %vm7015_vm2 }
 0x2d2   : > { %v5815_v13 = vadd.f32 %v2402_v47, %v5686_v19  ;;  %v2342_v19 = vrot.slane %v5730_v51, 1  ;;  %v2305_v44 = vrot.slane %v5820_v58, 7  ;;  %v2320_v9 = vsel %vm7007_vm11, %v2304_v8, %v2306_v3  ;;  %vm7019_vm12 = vmmov %vm7015_vm2 }
 0x2d3   : > { %v2448_v0 = vmul.f32 3.3333334e-05, %v2432_v31  ;;  %v2297_v6 = vmul.f32 %v5832_v26, %v5832_v26  ;;  %v2309_v59 = vrot.slane %v5825_v2, 7  ;;  %v2414_v21 = vadd.f32 %v2316_v34, %v5730_v51  ;;  %vm7020_vm4 = vmmov %vm6993_vm0 }
 0x2d4   : > { %v2346_v37 = vsel %vm7006_vm10, %v2342_v19, %v2344_v38  ;;  %v2291_v5 = vmul.f32 %v5827_v54, %v5827_v54  ;;  %v2340_v16 = vrot.slane %v5778_v39, 1  ;;  %v2343_v35 = vrot.slane %v5805_v52, 1  ;;  %vm7021_vm10 = vmmov %vm6993_vm0 }
 0x2d5   : > { %v5837_v50 = vadd.f32 1.0, %v2448_v0  ;;  %v2313_v38 = vrot.slane %v2297_v6, 7  ;;  %v2345_v47 = vrot.slane %v2297_v6, 1  ;;  %v2317_v31 = vsel %vm6993_vm0, %v2309_v59, %v2311_v55  ;;  %vm7022_vm11 = vmmov %vm7015_vm2 }
 0x2d6   : > { %v2430_v24 = vadd.f32 %v2414_v21, %v2346_v37  ;;  %v2318_v8 = vsel %vm7008_vm6, %v2306_v3, %v2308_v46  ;;  %v2339_v21 = vrot.slane %v2291_v5, 1  ;;  %vm7025_vm6 = vmmov %vm7009_vm1 }
 0x2d7   : > { %3507 = vrsqrt.f32 %v5837_v50  ;;  %v2315_v51 = vsel %vm7009_vm1, %v2311_v55, %v2313_v38  ;;  %v2329_v43 = vsel %vm7010_vm15, %v2313_v38, %v6787_v22  ;;  %v2361_v0 = vsel %vm7011_vm8, %v2345_v47, %v2331_v1 }
 0x2d8   : > { %v2347_v34 = vsel %vm7012_vm9, %v2343_v35, %v2345_v47  ;;  %v2363_v37 = vsel %vm7013_vm5, 0.0, %v2329_v43  ;;  %v2401_v46 = vsel %vm2385_vm3, 0.0, %v2361_v0  ;;  %v2417_v3 = vadd.f32 %v2315_v51, %v2297_v6  ;;  %vm7016_vm3 = vmmov %vm6993_vm0 }
 0x2d9   : > { %v2337_v55 = vrot.slane %v5820_v58, 1  ;;  %v2415_v38 = vadd.f32 %v2317_v31, %v5805_v52  ;;  %v2403_v14 = vadd.f32 %v2363_v37, %v5707_v18  ;;  %v2352_v1 = vsel %vm7014_vm13, %v2336_v29, %v2338_v53  ;;  %vm7023_vm0 = vmmov %vm7015_vm2 }
 0x2da   : > { %v2348_v47 = vsel %vm7015_vm2, %v2340_v16, %v2342_v19  ;;  %v2446_v43 = vmul.f32 3.3333334e-05, %v2430_v24  ;;  %v2433_v22 = vadd.f32 %v2417_v3, %v2401_v46  ;;  %v2410_v6 = vadd.f32 %v2320_v9, %v5769_v48  ;;  %vm7027_vm1 = vmmov %vm7023_vm0 }
 0x2db   : > { %v2412_v51 = vadd.f32 %v2318_v8, %v5778_v39  ;;  %v5892_v52 = vadd.f32 %v2403_v14, %v5758_v62  ;;  %v2431_v31 = vadd.f32 %v2415_v38, %v2347_v34  ;;  %v2323_v33 = vsel %vm7016_vm3, %v2303_v7, %v2305_v44 }
 0x2dc   : > { %v2307_v29 = vrot.slane %v2291_v5, 7  ;;  %v2449_v0 = vmul.f32 3.3333334e-05, %v2433_v22  ;;  %v2355_v48 = vsel %vm7017_vm7, %v2335_v40, %v2337_v55  ;;  %v2353_v14 = vsel %vm7018_vm14, %v2337_v55, %v2339_v21 }
 0x2dd   : > { %v5887_v23 = vpop.eup %3507  ;;  %v2350_v62 = vsel %vm7019_vm12, %v2338_v53, %v2340_v16  ;;  %v2428_v39 = vadd.f32 %v2412_v51, %v2348_v47  ;;  %v2341_v9 = vrot.slane %v5825_v2, 1  ;;  %v5909_v7 = vadd.f32 1.0, %v2446_v43 }
 0x2de   : > { %v2607_v19 = vmul.f32 %v5887_v23, %v5837_v50  ;;  %v5911_v22 = vadd.f32 1.0, %v2449_v0  ;;  %v2409_v8 = vadd.f32 %v2323_v33, %v5820_v58  ;;  %v2424_v34 = vadd.f32 %v5801_v15, %v2352_v1 }
 0x2df   : > { %v2319_v37 = vsel %vm7020_vm4, %v2307_v29, %v2309_v59  ;;  %v2447_v46 = vmul.f32 3.3333334e-05, %v2431_v31  ;;  %v2423_v3 = vadd.f32 %v2407_v27, %v2355_v48  ;;  %v2321_v53 = vsel %vm7021_vm10, %v2305_v44, %v2307_v29 }
 0x2e0   : > { %v2608_v24 = vmul.f32 %v5887_v23, %v2607_v19  ;;  %3509 = vrsqrt.f32 %v5911_v22  ;;  %v2425_v55 = vadd.f32 %v2409_v8, %v2353_v14  ;;  %v2426_v38 = vadd.f32 %v2410_v6, %v2350_v62 }
 0x2e1   : > { %v2444_v47 = vmul.f32 3.3333334e-05, %v2428_v39  ;;  %v2349_v43 = vsel %vm7022_vm11, %v2341_v9, %v2343_v35  ;;  %v2351_v15 = vsel %vm7023_vm0, %v2339_v21, %v2341_v9  ;;  %v2413_v58 = vadd.f32 %v2319_v37, %v5825_v2 }
 0x2e2   : > { %v2609_v16 = vmul.f32 0.5, %v2608_v24  ;;  %3511 = vrsqrt.f32 %v5909_v7  ;;  %v7024_v44 = vrot.slane %v5707_v18, 7  ;;  %v2411_v1 = vadd.f32 %v2321_v53, %v2291_v5 }
 0x2e3   : > { %v5933_v6 = vadd.f32 1.0, %v2447_v46  ;;  %3513 = vrsqrt.f32 %v5794_v28  ;;  %v2440_v35 = vmul.f32 3.3333334e-05, %v2424_v34  ;;  %v2429_v51 = vadd.f32 %v2413_v58, %v2349_v43 }
 0x2e4   : > { %v2610_v27 = vsub.f32 1.5, %v2609_v16  ;;  %v2327_v59 = vsel %vm7025_vm6, %v7024_v44, %v2301_v56  ;;  %v7026_v2 = vrot.slane %v5711_v4, 1  ;;  %3515 = vrsqrt.f32 %v5839_v61 }
 0x2e5   : > { %v2439_v56 = vmul.f32 3.3333334e-05, %v2423_v3  ;;  %v2427_v5 = vadd.f32 %v2411_v1, %v2351_v15  ;;  %v2441_v33 = vmul.f32 3.3333334e-05, %v2425_v55  ;;  %v2442_v29 = vmul.f32 3.3333334e-05, %v2426_v38 }
 0x2e6   : > { %v5937_v21 = vmul.f32 %v5887_v23, %v2610_v27  ;;  %v2357_v18 = vsel %vm7027_vm1, %v7026_v2, %v2335_v40  ;;  %v5946_v31 = vpop.eup %3509  ;;  %v5948_v0 = vadd.f32 1.0, %v2444_v47  ;;  %3517 = vrsqrt.f32 %v5933_v6 }
 0x2e7   : > { %vm2801_vm15 = vcmp.eq.f32.partialorder %v5837_v50, inf  ;;  %v2804_v25 = vand.u32 2147483648, %v5837_v50  ;;  %v2617_v57 = vmul.f32 %v5946_v31, %v5911_v22  ;;  %v5959_v48 = vadd.f32 1.0, %v2440_v35 }
 0x2e8   : > { %v2800_v19 = vmul.f32 %v5937_v21, %v5837_v50  ;;  %v5957_v40 = vpop.eup %3511  ;;  %v2445_v14 = vmul.f32 3.3333334e-05, %v2429_v51  ;;  %vm2803_vm8 = vcmp.eq.f32.partialorder %v5837_v50, 0.0  ;;  %v5963_v39 = vadd.f32 1.0, %v2439_v56 }
 0x2e9   : > { %v2443_v9 = vmul.f32 3.3333334e-05, %v2427_v5  ;;  %v2618_v8 = vmul.f32 %v5946_v31, %v2617_v57  ;;  %v5968_v34 = vpop.eup %3513  ;;  %v2405_v37 = vadd.f32 %v2327_v59, %v5711_v4  ;;  %v5971_v46 = vadd.f32 1.0, %v2442_v29 }
 0x2ea   : > { %v2802_v62 = vsel %vm2801_vm15, %v5837_v50, %v2800_v19  ;;  %v5974_v3 = vpop.eup %3515  ;;  %v5976_v53 = vadd.f32 1.0, %v2441_v33  ;;  %v2587_v55 = vmul.f32 %v5957_v40, %v5909_v7  ;;  %v5982_v47 = vadd.f32 1.0, %v2445_v14 }
 0x2eb   : > { %v5965_v24 = vsel %vm2803_vm8, %v2804_v25, %v2802_v62  ;;  %v2619_v16 = vmul.f32 0.5, %v2618_v8  ;;  %v2421_v38 = vadd.f32 %v2405_v37, %v2357_v18  ;;  %v5987_v43 = vadd.f32 1.0, %v2443_v9 }
 0x2ec   : > { %3519 = vrsqrt.f32 %v5965_v24  ;;  %v5984_v4 = vpop.eup %3517  ;;  %v2588_v58 = vmul.f32 %v5957_v40, %v2587_v55  ;;  %vm2613_vm9 = vweird.f32 %v5887_v23  ;;  %vm2813_vm5 = vcmp.eq.f32.partialorder %v5911_v22, inf }
 0x2ed   : > { %3521 = vrsqrt.f32 %v5948_v0  ;;  %v2620_v15 = vsub.f32 1.5, %v2619_v16  ;;  %v2437_v1 = vmul.f32 3.3333334e-05, %v2421_v38  ;;  %v2597_v35 = vmul.f32 %v5984_v4, %v5933_v6 }
 0x2ee   : > { %3523 = vrsqrt.f32 %v5959_v48  ;;  %v2589_v44 = vmul.f32 0.5, %v2588_v58  ;;  %v2816_v5 = vand.u32 2147483648, %v5911_v22  ;;  %vm2612_vm13 = vweird.f32 %v5837_v50 }
 0x2ef   : > { %3525 = vrsqrt.f32 %v5963_v39  ;;  %v5993_v27 = vmul.f32 %v5946_v31, %v2620_v15  ;;  %v2598_v29 = vmul.f32 %v5984_v4, %v2597_v35  ;;  %vm2815_vm2 = vcmp.eq.f32.partialorder %v5911_v22, 0.0  ;;  %vm6030_vm3 = vmor %vm2612_vm13, %vm2613_vm9 }
 0x2f0   : > { %3527 = vrsqrt.f32 %v5971_v46  ;;  %v2590_v33 = vsub.f32 1.5, %v2589_v44  ;;  %v6026_v55 = vadd.f32 1.0, %v2437_v1  ;;  %v2615_v58 = vsel %vm6030_vm3, %v5887_v23, %v5937_v21 }
 0x2f1   : > { %3529 = vrsqrt.f32 %v5976_v53  ;;  %v2812_v18 = vmul.f32 %v5993_v27, %v5911_v22  ;;  %v2599_v8 = vmul.f32 0.5, %v2598_v29  ;;  %vm2777_vm14 = vcmp.eq.f32.partialorder %v5909_v7, inf }
 0x2f2   : > { %v3520_v59 = vpop.eup %3519  ;;  %3531 = vrsqrt.f32 %v5982_v47  ;;  %v6020_v9 = vmul.f32 %v5957_v40, %v2590_v33  ;;  %vm2779_vm12 = vcmp.eq.f32.partialorder %v5909_v7, 0.0  ;;  %vm2964_vm4 = vweird.f32 %v5965_v24 }
 0x2f3   : > { %v5998_v51 = vpop.eup %3521  ;;  %3533 = vrsqrt.f32 %v5987_v43  ;;  %v2959_v2 = vmul.f32 %v3520_v59, %v5965_v24  ;;  %v2814_v57 = vsel %vm2813_vm5, %v5911_v22, %v2812_v18  ;;  %v2600_v1 = vsub.f32 1.5, %v2599_v8 }
 0x2f4   : > { %v6005_v56 = vpop.eup %3523  ;;  %v6017_v62 = vsel %vm2815_vm2, %v2816_v5, %v2814_v57  ;;  %v2567_v37 = vmul.f32 %v5998_v51, %v5948_v0  ;;  %v2776_v44 = vmul.f32 %v6020_v9, %v5909_v7  ;;  %vm2965_vm7 = vweird.f32 %v3520_v59 }
 0x2f5   : > { %v6010_v19 = vpop.eup %3525  ;;  %v2960_v25 = vmul.f32 %v3520_v59, %v2959_v2  ;;  %3535 = vrsqrt.f32 %v6017_v62  ;;  %v2780_v5 = vand.u32 2147483648, %v5909_v7  ;;  %v6051_v23 = vmul.f32 %v5984_v4, %v2600_v1  ;;  %vm2966_vm10 = vmor %vm2964_vm4, %vm2965_vm7 }
 0x2f6   : > { %v6015_v14 = vpop.eup %3527  ;;  %v2568_v35 = vmul.f32 %v5998_v51, %v2567_v37  ;;  %v2778_v33 = vsel %vm2777_vm14, %v5909_v7, %v2776_v44  ;;  %vm2623_vm11 = vweird.f32 %v5946_v31  ;;  %vm2789_vm0 = vcmp.eq.f32.partialorder %v5933_v6, inf }
 0x2f7   : > { %v6024_v16 = vpop.eup %3529  ;;  %v2961_v38 = vmul.f32 0.5, %v2960_v25  ;;  %v6054_v25 = vsel %vm2779_vm12, %v2780_v5, %v2778_v33  ;;  %v2788_v8 = vmul.f32 %v6051_v23, %v5933_v6  ;;  %vm2791_vm6 = vcmp.eq.f32.partialorder %v5933_v6, 0.0 }
 0x2f8   : > { %v6035_v15 = vpop.eup %3531  ;;  %v2569_v21 = vmul.f32 0.5, %v2568_v35  ;;  %3537 = vrsqrt.f32 %v6054_v25  ;;  %vm2622_vm1 = vweird.f32 %v5911_v22  ;;  %vm2592_vm8 = vweird.f32 %v5909_v7 }
 0x2f9   : > { %v6044_v2 = vpop.eup %3533  ;;  %v2962_v18 = vsub.f32 1.5, %v2961_v38  ;;  %v2577_v57 = vmul.f32 %v6035_v15, %v5982_v47  ;;  %v2792_v38 = vand.u32 2147483648, %v5933_v6  ;;  %vm6077_vm15 = vmor %vm2622_vm1, %vm2623_vm11  ;;  %vm2593_vm9 = vweird.f32 %v5957_v40 }
 0x2fa   : > { %v2570_v24 = vsub.f32 1.5, %v2569_v21  ;;  %v2625_v22 = vsel %vm6077_vm15, %v5946_v31, %v5993_v27  ;;  %vm2753_vm5 = vcmp.eq.f32.partialorder %v5948_v0, inf  ;;  %vm2755_vm13 = vcmp.eq.f32.partialorder %v5948_v0, 0.0  ;;  %vm6104_vm3 = vmor %vm2592_vm8, %vm2593_vm9 }
 0x2fb   : > { %v2963_v29 = vmul.f32 %v3520_v59, %v2962_v18  ;;  %v3536_v37 = vpop.eup %3535  ;;  %v2578_v44 = vmul.f32 %v6035_v15, %v2577_v57  ;;  %v2790_v18 = vsel %vm2789_vm0, %v5933_v6, %v2788_v8  ;;  %vm2603_vm7 = vweird.f32 %v5984_v4 }
 0x2fc   : > { %v2969_v35 = vmul.f32 %v3536_v37, %v6017_v62  ;;  %v6069_v5 = vsel %vm2791_vm6, %v2792_v38, %v2790_v18  ;;  %v6072_v33 = vmul.f32 %v5998_v51, %v2570_v24  ;;  %v2756_v38 = vand.u32 2147483648, %v5948_v0 }
 0x2fd   : > { %v2967_v50 = vsel %vm2966_vm10, %v3520_v59, %v2963_v29  ;;  %v2579_v59 = vmul.f32 0.5, %v2578_v44  ;;  %3539 = vrsqrt.f32 %v6069_v5  ;;  %v2547_v24 = vmul.f32 %v6015_v14, %v5971_v46 }
 0x2fe   : > { %v2992_v1 = vmul.f32 %v2967_v50, %v2615_v58  ;;  %v2970_v21 = vmul.f32 %v3536_v37, %v2969_v35  ;;  %v3538_v8 = vpop.eup %3537  ;;  %vm2975_vm2 = vweird.f32 %v3536_v37  ;;  %vm2974_vm14 = vweird.f32 %v6017_v62 }
 0x2ff   : > { %v2580_v57 = vsub.f32 1.5, %v2579_v59  ;;  %v2939_v44 = vmul.f32 %v3538_v8, %v6054_v25  ;;  %v2548_v59 = vmul.f32 %v6015_v14, %v2547_v24  ;;  %vm2602_vm12 = vweird.f32 %v5933_v6  ;;  %vm2976_vm10 = vmor %vm2974_vm14, %vm2975_vm2 }
 0x300   : > { %v3008_v29 = vmul.f32 %v2992_v1, %v5732_v49  ;;  %v2752_v49 = vmul.f32 %v6072_v33, %v5948_v0  ;;  %v2971_v50 = vmul.f32 0.5, %v2970_v21  ;;  %vm2765_vm4 = vcmp.eq.f32.partialorder %v5982_v47, inf  ;;  %vm6152_vm2 = vmor %vm2602_vm12, %vm2603_vm7 }
 0x301   : > { %v6098_v27 = vmul.f32 %v6035_v15, %v2580_v57  ;;  %v2940_v58 = vmul.f32 %v3538_v8, %v2939_v44  ;;  %v2549_v57 = vmul.f32 0.5, %v2548_v59  ;;  %vm2767_vm11 = vcmp.eq.f32.partialorder %v5982_v47, 0.0 }
 0x302   : > { %3029 = vmatpush.msrb.mxu2 %v3008_v29  ;;  %v2754_v31 = vsel %vm2753_vm5, %v5948_v0, %v2752_v49  ;;  %v2972_v1 = vsub.f32 1.5, %v2971_v50  ;;  %v2595_v29 = vsel %vm6104_vm3, %v5957_v40, %v6020_v9  ;;  %v2768_v40 = vand.u32 2147483648, %v5982_v47 }
 0x303   : > { %v6109_v18 = vsel %vm2755_vm13, %v2756_v38, %v2754_v31  ;;  %v3540_v7 = vpop.eup %3539  ;;  %v2764_v49 = vmul.f32 %v6098_v27, %v5982_v47  ;;  %v2941_v62 = vmul.f32 0.5, %v2940_v58  ;;  %vm2945_vm0 = vweird.f32 %v3538_v8 }
 0x304   : > { %3541 = vrsqrt.f32 %v6109_v18  ;;  %v2973_v21 = vmul.f32 %v3536_v37, %v2972_v1  ;;  %v2949_v50 = vmul.f32 %v3540_v7, %v6069_v5  ;;  %v2550_v24 = vsub.f32 1.5, %v2549_v57 }
 0x305   : > { %v2766_v38 = vsel %vm2765_vm4, %v5982_v47, %v2764_v49  ;;  %v2942_v31 = vsub.f32 1.5, %v2941_v62  ;;  %vm2572_vm6 = vweird.f32 %v5948_v0  ;;  %vm2573_vm1 = vweird.f32 %v5998_v51 }
 0x306   : > { %v2977_v9 = vsel %vm2976_vm10, %v3536_v37, %v2973_v21  ;;  %v2950_v1 = vmul.f32 %v3540_v7, %v2949_v50  ;;  %v6128_v35 = vsel %vm2767_vm11, %v2768_v40, %v2766_v38  ;;  %v6133_v59 = vmul.f32 %v6015_v14, %v2550_v24  ;;  %vm6172_vm7 = vmor %vm2572_vm6, %vm2573_vm1 }
 0x307   : > { %v2993_v44 = vmul.f32 %v2977_v9, %v2625_v22  ;;  %3543 = vrsqrt.f32 %v6128_v35  ;;  %v2557_v37 = vmul.f32 %v6044_v2, %v5987_v43  ;;  %v2943_v22 = vmul.f32 %v3538_v8, %v2942_v31 }
 0x308   : > { %vm2944_vm15 = vweird.f32 %v6054_v25  ;;  %v2951_v49 = vmul.f32 0.5, %v2950_v1  ;;  %vm2955_vm9 = vweird.f32 %v3540_v7  ;;  %v2728_v62 = vmul.f32 %v6133_v59, %v5971_v46 }
 0x309   : > { %v3009_v21 = vmul.f32 %v2993_v44, %v5832_v26  ;;  %vm2946_vm8 = vmor %vm2944_vm15, %vm2945_vm0  ;;  %vm2729_vm5 = vcmp.eq.f32.partialorder %v5971_v46, inf  ;;  %v2732_v9 = vand.u32 2147483648, %v5971_v46  ;;  %v2558_v26 = vmul.f32 %v6044_v2, %v2557_v37 }
 0x30a   : > { %v3542_v58 = vpop.eup %3541  ;;  %v2947_v50 = vsel %vm2946_vm8, %v3538_v8, %v2943_v22  ;;  %v2952_v40 = vsub.f32 1.5, %v2951_v49  ;;  %v2730_v24 = vsel %vm2729_vm5, %v5971_v46, %v2728_v62  ;;  %vm2731_vm13 = vcmp.eq.f32.partialorder %v5971_v46, 0.0 }
 0x30b   : > { %v2919_v57 = vmul.f32 %v3542_v58, %v6109_v18  ;;  %3049 = vmatpush.msrb.mxu3 %v3009_v21  ;;  %v2990_v38 = vmul.f32 %v2947_v50, %v2595_v29  ;;  %vm2954_vm3 = vweird.f32 %v6069_v5  ;;  %v6157_v31 = vsel %vm2731_vm13, %v2732_v9, %v2730_v24 }
 0x30c   : > { %v2953_v8 = vmul.f32 %v3540_v7, %v2952_v40  ;;  %v2559_v1 = vmul.f32 0.5, %v2558_v26  ;;  %vm2956_vm14 = vmor %vm2954_vm3, %vm2955_vm9  ;;  %vm2582_vm4 = vweird.f32 %v5982_v47  ;;  %3545 = vrsqrt.f32 %v6157_v31 }
 0x30d   : > { %v2920_v25 = vmul.f32 %v3542_v58, %v2919_v57  ;;  %v3544_v29 = vpop.eup %3543  ;;  %v3006_v37 = vmul.f32 %v2990_v38, %v5713_v10  ;;  %v2605_v6 = vsel %vm6152_vm2, %v5984_v4, %v6051_v23  ;;  %vm2925_vm12 = vweird.f32 %v3542_v58 }
 0x30e   : > { %v2957_v22 = vsel %vm2956_vm14, %v3540_v7, %v2953_v8  ;;  %v2929_v5 = vmul.f32 %v3544_v29, %v6128_v35  ;;  %v2560_v49 = vsub.f32 1.5, %v2559_v1  ;;  %v2527_v50 = vmul.f32 %v6005_v56, %v5959_v48 }
 0x30f   : > { %v2921_v21 = vmul.f32 0.5, %v2920_v25  ;;  %3030 = vmatpush.msrb.mxu2 %v3006_v37  ;;  %v2991_v57 = vmul.f32 %v2957_v22, %v2605_v6  ;;  %v2575_v4 = vsel %vm6172_vm7, %v5998_v51, %v6072_v33  ;;  %vm2583_vm10 = vweird.f32 %v6035_v15 }
 0x310   : > { %v2930_v23 = vmul.f32 %v3544_v29, %v2929_v5  ;;  %v6184_v7 = vmul.f32 %v6044_v2, %v2560_v49  ;;  %vm2924_vm11 = vweird.f32 %v6109_v18  ;;  %v2528_v9 = vmul.f32 %v6005_v56, %v2527_v50  ;;  %vm2584_vm9 = vmor %vm2582_vm4, %vm2583_vm10 }
 0x311   : > { %v2922_v62 = vsub.f32 1.5, %v2921_v21  ;;  %v3007_v0 = vmul.f32 %v2991_v57, %v5771_v30  ;;  %vm2926_vm0 = vmor %vm2924_vm11, %vm2925_vm12  ;;  %vm2934_vm6 = vweird.f32 %v6128_v35  ;;  %vm2741_vm1 = vcmp.eq.f32.partialorder %v5987_v43, inf }
 0x312   : > { %v2931_v26 = vmul.f32 0.5, %v2930_v23  ;;  %v2740_v51 = vmul.f32 %v6184_v7, %v5987_v43  ;;  %v3546_v33 = vpop.eup %3545  ;;  %vm2935_vm15 = vweird.f32 %v3544_v29  ;;  %v2529_v25 = vmul.f32 0.5, %v2528_v9 }
 0x313   : > { %v2923_v40 = vmul.f32 %v3542_v58, %v2922_v62  ;;  %3050 = vmatpush.msrb.mxu3 %v3007_v0  ;;  %v2537_v30 = vmul.f32 %v6024_v16, %v5976_v53  ;;  %v2899_v44 = vmul.f32 %v3546_v33, %v6157_v31  ;;  %v2744_v8 = vand.u32 2147483648, %v5987_v43  ;;  %vm2936_vm5 = vmor %vm2934_vm6, %vm2935_vm15 }
 0x314   : > { %v2932_v24 = vsub.f32 1.5, %v2931_v26  ;;  %v2742_v1 = vsel %vm2741_vm1, %v5987_v43, %v2740_v51  ;;  %vm2743_vm8 = vcmp.eq.f32.partialorder %v5987_v43, 0.0  ;;  %v2530_v37 = vsub.f32 1.5, %v2529_v25 }
 0x315   : > { %v2927_v38 = vsel %vm2926_vm0, %v3542_v58, %v2923_v40  ;;  %v2538_v21 = vmul.f32 %v6024_v16, %v2537_v30  ;;  %v2900_v22 = vmul.f32 %v3546_v33, %v2899_v44  ;;  %v6205_v5 = vsel %vm2743_vm8, %v2744_v8, %v2742_v1 }
 0x316   : > { %v2988_v18 = vmul.f32 %v2927_v38, %v2575_v4  ;;  %v2933_v6 = vmul.f32 %v3544_v29, %v2932_v24  ;;  %vm2552_vm13 = vweird.f32 %v5971_v46  ;;  %3547 = vrsqrt.f32 %v6205_v5 }
 0x317   : > { %v6213_v49 = vmul.f32 %v6005_v56, %v2530_v37  ;;  %v2585_v47 = vsel %vm2584_vm9, %v6035_v15, %v6098_v27  ;;  %vm2553_vm2 = vweird.f32 %v6015_v14  ;;  %v2901_v10 = vmul.f32 0.5, %v2900_v22 }
 0x318   : > { %v3004_v58 = vmul.f32 %v2988_v18, %v5747_v12  ;;  %v2539_v12 = vmul.f32 0.5, %v2538_v21  ;;  %v2937_v57 = vsel %vm2936_vm5, %v3544_v29, %v2933_v6  ;;  %vm2705_vm3 = vcmp.eq.f32.partialorder %v5959_v48, inf  ;;  %vm6232_vm7 = vmor %vm2552_vm13, %vm2553_vm2 }
 0x319   : > { %v2989_v62 = vmul.f32 %v2937_v57, %v2585_v47  ;;  %v2704_v35 = vmul.f32 %v6213_v49, %v5959_v48  ;;  %v2902_v4 = vsub.f32 1.5, %v2901_v10  ;;  %vm2905_vm14 = vweird.f32 %v3546_v33 }
 0x31a   : > { %3031 = vmatpush.msrb.mxu2 %v3004_v58  ;;  %v2540_v50 = vsub.f32 1.5, %v2539_v12  ;;  %v2708_v23 = vand.u32 2147483648, %v5959_v48  ;;  %v2507_v0 = vmul.f32 %v5974_v3, %v5839_v61  ;;  %vm2707_vm4 = vcmp.eq.f32.partialorder %v5959_v48, 0.0 }
 0x31b   : > { %v3005_v15 = vmul.f32 %v2989_v62, %v5786_v63  ;;  %v2706_v27 = vsel %vm2705_vm3, %v5959_v48, %v2704_v35  ;;  %v2903_v9 = vmul.f32 %v3546_v33, %v2902_v4  ;;  %vm2904_vm12 = vweird.f32 %v6157_v31 }
 0x31c   : > { %v6228_v29 = vmul.f32 %v6024_v16, %v2540_v50  ;;  %v6237_v26 = vsel %vm2707_vm4, %v2708_v23, %v2706_v27  ;;  %v2508_v63 = vmul.f32 %v5974_v3, %v2507_v0  ;;  %v3548_v51 = vpop.eup %3547  ;;  %v2555_v38 = vsel %vm6232_vm7, %v6015_v14, %v6133_v59  ;;  %vm2906_vm10 = vmor %vm2904_vm12, %vm2905_vm14 }
 0x31d   : > { %3051 = vmatpush.msrb.mxu3 %v3005_v15  ;;  %3549 = vrsqrt.f32 %v6237_v26  ;;  %vm2717_vm11 = vcmp.eq.f32.partialorder %v5976_v53, inf  ;;  %v2907_v31 = vsel %vm2906_vm10, %v3546_v33, %v2903_v9  ;;  %v2909_v25 = vmul.f32 %v3548_v51, %v6205_v5 }
 0x31e   : > { %v2716_v46 = vmul.f32 %v6228_v29, %v5976_v53  ;;  %v2720_v30 = vand.u32 2147483648, %v5976_v53  ;;  %v2509_v18 = vmul.f32 0.5, %v2508_v63  ;;  %v2986_v24 = vmul.f32 %v2907_v31, %v2555_v38 }
 0x31f   : > { %vm2563_vm0 = vweird.f32 %v6044_v2  ;;  %vm2719_vm6 = vcmp.eq.f32.partialorder %v5976_v53, 0.0  ;;  %vm2562_vm1 = vweird.f32 %v5987_v43  ;;  %v2910_v59 = vmul.f32 %v3548_v51, %v2909_v25 }
 0x320   : > { %v2718_v14 = vsel %vm2717_vm11, %v5976_v53, %v2716_v46  ;;  %v2510_v8 = vsub.f32 1.5, %v2509_v18  ;;  %v3002_v33 = vmul.f32 %v2986_v24, %v5742_v42  ;;  %vm2533_vm15 = vweird.f32 %v6005_v56  ;;  %vm6264_vm8 = vmor %vm2562_vm1, %vm2563_vm0 }
 0x321   : > { %v6255_v44 = vsel %vm2719_vm6, %v2720_v30, %v2718_v14  ;;  %v2517_v1 = vmul.f32 %v6010_v19, %v5963_v39  ;;  %v2434_v37 = vmul.f32 3.3333334e-05, %v5815_v13  ;;  %v2911_v43 = vmul.f32 0.5, %v2910_v59 }
 0x322   : > { %3551 = vrsqrt.f32 %v6255_v44  ;;  %v6269_v58 = vmul.f32 %v5974_v3, %v2510_v8  ;;  %3032 = vmatpush.msrb.mxu2 %v3002_v33  ;;  %v2565_v6 = vsel %vm6264_vm8, %v6044_v2, %v6184_v7  ;;  %vm2914_vm9 = vweird.f32 %v6205_v5 }
 0x323   : > { %3553 = vrsqrt.f32 %v6026_v55  ;;  %v3550_v42 = vpop.eup %3549  ;;  %vm2532_vm5 = vweird.f32 %v5959_v48  ;;  %v2518_v13 = vmul.f32 %v6010_v19, %v2517_v1  ;;  %v2912_v22 = vsub.f32 1.5, %v2911_v43 }
 0x324   : > { %vm2915_vm13 = vweird.f32 %v3548_v51  ;;  %vm6280_vm2 = vmor %vm2532_vm5, %vm2533_vm15  ;;  %v2879_v47 = vmul.f32 %v3550_v42, %v6237_v26  ;;  %vm2543_vm3 = vweird.f32 %v6024_v16  ;;  %vm2542_vm14 = vweird.f32 %v5976_v53 }
 0x325   : > { %v2535_v2 = vsel %vm6280_vm2, %v6005_v56, %v6213_v49  ;;  %v2680_v48 = vmul.f32 %v6269_v58, %v5839_v61  ;;  %v2519_v7 = vmul.f32 0.5, %v2518_v13  ;;  %v2487_v57 = vmul.f32 %v5968_v34, %v5794_v28  ;;  %vm2916_vm12 = vmor %vm2914_vm9, %vm2915_vm13 }
 0x326   : > { %v2913_v10 = vmul.f32 %v3548_v51, %v2912_v22  ;;  %v2880_v62 = vmul.f32 %v3550_v42, %v2879_v47  ;;  %vm2884_vm4 = vweird.f32 %v6237_v26  ;;  %vm2681_vm7 = vcmp.eq.f32.partialorder %v5839_v61, inf  ;;  %vm6330_vm8 = vmor %vm2542_vm14, %vm2543_vm3 }
 0x327   : > { %v2682_v56 = vsel %vm2681_vm7, %v5839_v61, %v2680_v48  ;;  %v2684_v49 = vand.u32 2147483648, %v5839_v61  ;;  %v2520_v50 = vsub.f32 1.5, %v2519_v7  ;;  %v2488_v4 = vmul.f32 %v5968_v34, %v2487_v57 }
 0x328   : > { %v3552_v35 = vpop.eup %3551  ;;  %v2917_v0 = vsel %vm2916_vm12, %v3548_v51, %v2913_v10  ;;  %v2881_v15 = vmul.f32 0.5, %v2880_v62  ;;  %vm2683_vm10 = vcmp.eq.f32.partialorder %v5839_v61, 0.0  ;;  %vm2885_vm11 = vweird.f32 %v3550_v42 }
 0x329   : > { %v6302_v23 = vpop.eup %3553  ;;  %v2889_v27 = vmul.f32 %v3552_v35, %v6255_v44  ;;  %v2987_v40 = vmul.f32 %v2917_v0, %v2565_v6  ;;  %v6306_v9 = vsel %vm2683_vm10, %v2684_v49, %v2682_v56  ;;  %v6309_v5 = vmul.f32 %v6010_v19, %v2520_v50  ;;  %vm2886_vm6 = vmor %vm2884_vm4, %vm2885_vm11 }
 0x32a   : > { %v2489_v63 = vmul.f32 0.5, %v2488_v4  ;;  %v2882_v38 = vsub.f32 1.5, %v2881_v15  ;;  %3555 = vrsqrt.f32 %v6306_v9  ;;  %vm2693_vm0 = vcmp.eq.f32.partialorder %v5963_v39, inf }
 0x32b   : > { %v2890_v46 = vmul.f32 %v3552_v35, %v2889_v27  ;;  %v3003_v31 = vmul.f32 %v2987_v40, %v5827_v54  ;;  %v2692_v51 = vmul.f32 %v6309_v5, %v5963_v39  ;;  %v2696_v24 = vand.u32 2147483648, %v5963_v39 }
 0x32c   : > { %v2490_v25 = vsub.f32 1.5, %v2489_v63  ;;  %v2883_v30 = vmul.f32 %v3550_v42, %v2882_v38  ;;  %v2497_v14 = vmul.f32 %v6302_v23, %v6026_v55  ;;  %vm2895_vm1 = vweird.f32 %v3552_v35 }
 0x32d   : > { %v2891_v18 = vmul.f32 0.5, %v2890_v46  ;;  %3052 = vmatpush.msrb.mxu3 %v3003_v31  ;;  %v2694_v54 = vsel %vm2693_vm0, %v5963_v39, %v2692_v51  ;;  %vm2695_vm15 = vcmp.eq.f32.partialorder %v5963_v39, 0.0  ;;  %v6337_v43 = vadd.f32 1.0, %v2434_v37 }
 0x32e   : > { %v6324_v59 = vmul.f32 %v5968_v34, %v2490_v25  ;;  %v2887_v8 = vsel %vm2886_vm6, %v3550_v42, %v2883_v30  ;;  %v6334_v26 = vsel %vm2695_vm15, %v2696_v24, %v2694_v54  ;;  %v2498_v21 = vmul.f32 %v6302_v23, %v2497_v14 }
 0x32f   : > { %v2892_v1 = vsub.f32 1.5, %v2891_v18  ;;  %v2984_v6 = vmul.f32 %v2887_v8, %v2535_v2  ;;  %v2545_v42 = vsel %vm6330_vm8, %v6024_v16, %v6228_v29  ;;  %3557 = vrsqrt.f32 %v6334_v26 }
 0x330   : > { %v3556_v53 = vpop.eup %3555  ;;  %vm2894_vm9 = vweird.f32 %v6255_v44  ;;  %v2656_v22 = vmul.f32 %v6324_v59, %v5794_v28  ;;  %v2499_v12 = vmul.f32 0.5, %v2498_v21  ;;  %vm2657_vm13 = vcmp.eq.f32.partialorder %v5794_v28, inf }
 0x331   : > { %v2893_v13 = vmul.f32 %v3552_v35, %v2892_v1  ;;  %v3000_v47 = vmul.f32 %v2984_v6, %v5694_v32  ;;  %vm2896_vm5 = vmor %vm2894_vm9, %vm2895_vm1  ;;  %v2859_v37 = vmul.f32 %v3556_v53, %v6306_v9  ;;  %v2660_v16 = vand.u32 2147483648, %v5794_v28 }
 0x332   : > { %v2658_v2 = vsel %vm2657_vm13, %v5794_v28, %v2656_v22  ;;  %vm2659_vm2 = vcmp.eq.f32.partialorder %v5794_v28, 0.0  ;;  %v2500_v44 = vsub.f32 1.5, %v2499_v12  ;;  %3559 = vrsqrt.f32 %v6337_v43 }
 0x333   : > { %v2897_v29 = vsel %vm2896_vm5, %v3552_v35, %v2893_v13  ;;  %3033 = vmatpush.msrb.mxu2 %v3000_v47  ;;  %v2860_v7 = vmul.f32 %v3556_v53, %v2859_v37  ;;  %v6354_v57 = vsel %vm2659_vm2, %v2660_v16, %v2658_v2  ;;  %v2435_v62 = vmul.f32 3.3333334e-05, %v5892_v52 }
 0x334   : > { %v2985_v48 = vmul.f32 %v2897_v29, %v2545_v42  ;;  %3561 = vrsqrt.f32 %v6354_v57  ;;  %v6359_v32 = vmul.f32 %v6302_v23, %v2500_v44  ;;  %vm2513_vm3 = vweird.f32 %v5974_v3 }
 0x335   : > { %v3558_v10 = vpop.eup %3557  ;;  %v2861_v56 = vmul.f32 0.5, %v2860_v7  ;;  %vm2865_vm14 = vweird.f32 %v3556_v53  ;;  %vm2669_vm4 = vcmp.eq.f32.partialorder %v6026_v55, inf  ;;  %v2672_v0 = vand.u32 2147483648, %v6026_v55 }
 0x336   : > { %v3001_v35 = vmul.f32 %v2985_v48, %v5774_v60  ;;  %v2869_v49 = vmul.f32 %v3558_v10, %v6334_v26  ;;  %v2668_v50 = vmul.f32 %v6359_v32, %v6026_v55  ;;  %vm2512_vm7 = vweird.f32 %v5839_v61 }
 0x337   : > { %v2862_v4 = vsub.f32 1.5, %v2861_v56  ;;  %vm2671_vm12 = vcmp.eq.f32.partialorder %v6026_v55, 0.0  ;;  %v6374_v27 = vadd.f32 1.0, %v2435_v62  ;;  %vm2514_vm10 = vmor %vm2512_vm7, %vm2513_vm3  ;;  %vm2864_vm11 = vweird.f32 %v6306_v9  ;;  %v3124_v62 = vld [vmem:[%s6694_s7 + $0x1e8] sm:$0xff] }
 0x338   : > { %3053 = vmatpush.msrb.mxu3 %v3001_v35  ;;  %v2870_v52 = vmul.f32 %v3558_v10, %v2869_v49  ;;  %v2670_v60 = vsel %vm2669_vm4, %v6026_v55, %v2668_v50  ;;  %v6372_v15 = vpop.eup %3559  ;;  %vm2866_vm0 = vmor %vm2864_vm11, %vm2865_vm14  ;;  %v2515_v31 = vsel %vm2514_vm10, %v5974_v3, %v6269_v58  ;;  %vm2523_vm6 = vweird.f32 %v6010_v19  ;;  %v3090_v49 = vld [vmem:[%s6694_s7 + $0xd8] sm:$0xff] }
 0x339   : > { %v2863_v40 = vmul.f32 %v3556_v53, %v2862_v4  ;;  %v6377_v63 = vsel %vm2671_vm12, %v2672_v0, %v2670_v60  ;;  %v2467_v61 = vmul.f32 %v6372_v15, %v6337_v43  ;;  %vm2875_vm1 = vweird.f32 %v3558_v10  ;;  %v3122_v0 = vld [vmem:[%s6694_s7 + $0x1d8] sm:$0xff] }
 0x33a   : > { %v3562_v38 = vpop.eup %3561  ;;  %v2871_v46 = vmul.f32 0.5, %v2870_v52  ;;  %3563 = vrsqrt.f32 %v6377_v63  ;;  %vm2522_vm15 = vweird.f32 %v5963_v39  ;;  %vm2874_vm9 = vweird.f32 %v6334_v26 }
 0x33b   : > { %v2867_v51 = vsel %vm2866_vm0, %v3556_v53, %v2863_v40  ;;  %v2839_v25 = vmul.f32 %v3562_v38, %v6354_v57  ;;  %v2468_v18 = vmul.f32 %v6372_v15, %v2467_v61  ;;  %3565 = vrsqrt.f32 %v6374_v27  ;;  %vm2524_vm8 = vmor %vm2522_vm15, %vm2523_vm6  ;;  %v3120_v40 = vld [vmem:[%s6694_s7 + $0x1c8] sm:$0xff]  ;;  %v3118_v61 = vld [vmem:[%s6694_s7 + $0x1b8] sm:$0xff] }
 0x33c   : > { %v2982_v30 = vmul.f32 %v2867_v51, %v2515_v31  ;;  %v2872_v9 = vsub.f32 1.5, %v2871_v46  ;;  %vm2876_vm5 = vmor %vm2874_vm9, %vm2875_vm1  ;;  %v2525_v33 = vsel %vm2524_vm8, %v6010_v19, %v6309_v5  ;;  %vm2493_vm13 = vweird.f32 %v5968_v34  ;;  %v3086_v46 = vld [vmem:[%s6694_s7 + $0xb8] sm:$0xff] }
 0x33d   : > { %v2840_v24 = vmul.f32 %v3562_v38, %v2839_v25  ;;  %v2469_v3 = vmul.f32 0.5, %v2468_v18  ;;  %vm2845_vm2 = vweird.f32 %v3562_v38  ;;  %vm2492_vm3 = vweird.f32 %v5794_v28  ;;  %v3084_v25 = vld [vmem:[%s6694_s7 + $0xa8] sm:$0xff]  ;;  %v3082_v18 = vld [vmem:[%s6694_s7 + $0x98] sm:$0xff] }
 0x33e   : > { %v2998_v14 = vmul.f32 %v2982_v30, %v5688_v41  ;;  %v2873_v54 = vmul.f32 %v3558_v10, %v2872_v9  ;;  %vm2494_vm14 = vmor %vm2492_vm3, %vm2493_vm13  ;;  %vm2844_vm4 = vweird.f32 %v6354_v57  ;;  %vm2503_vm12 = vweird.f32 %v6302_v23  ;;  %v3092_v57 = vld [vmem:[%s6694_s7 + $0xe8] sm:$0xff] }
 0x33f   : > { %v2841_v58 = vmul.f32 0.5, %v2840_v24  ;;  %v2470_v39 = vsub.f32 1.5, %v2469_v3  ;;  %v2495_v13 = vsel %vm2494_vm14, %v5968_v34, %v6324_v59  ;;  %vm2846_vm7 = vmor %vm2844_vm4, %vm2845_vm2  ;;  %vm2633_vm10 = vcmp.eq.f32.partialorder %v6337_v43, inf  ;;  %v3116_v30 = vld [vmem:[%s6694_s7 + $0x1a8] sm:$0xff]  ;;  %v3114_v24 = vld [vmem:[%s6694_s7 + $0x198] sm:$0xff] }
 0x340   : > { %v3564_v8 = vpop.eup %3563  ;;  %3034 = vmatpush.msrb.mxu2 %v2998_v14  ;;  %v2877_v1 = vsel %vm2876_vm5, %v3558_v10, %v2873_v54  ;;  %v2636_v47 = vand.u32 2147483648, %v6337_v43  ;;  %vm2635_vm11 = vcmp.eq.f32.partialorder %v6337_v43, 0.0  ;;  %vm2502_vm0 = vweird.f32 %v6026_v55  ;;  %v3094_v55 = vld [vmem:[%s6694_s7 + $0xf8] sm:$0xff] }
 0x341   : > { %v2983_v21 = vmul.f32 %v2877_v1, %v2525_v33  ;;  %v2842_v6 = vsub.f32 1.5, %v2841_v58  ;;  %v2849_v41 = vmul.f32 %v3564_v8, %v6377_v63  ;;  %v6397_v26 = vmul.f32 %v6372_v15, %v2470_v39  ;;  %v6399_v42 = vpop.eup %3565  ;;  %vm6421_vm1 = vmor %vm2502_vm0, %vm2503_vm12  ;;  %3167 = vmatpush.msrb.mxu0 %v3094_v55  ;;  %v3080_v58 = vld [vmem:[%s6694_s7 + $0x88] sm:$0xff]  ;;  %v3083_v55 = vld [vmem:[%s6694_s7 + $0xa0] sm:$0xff] }
 0x342   : > { %v2477_v22 = vmul.f32 %v6399_v42, %v6374_v27  ;;  %vm2855_vm6 = vweird.f32 %v3564_v8  ;;  %vm2854_vm15 = vweird.f32 %v6377_v63  ;;  %v2505_v35 = vsel %vm6421_vm1, %v6302_v23, %v6359_v32  ;;  %v3088_v23 = vld [vmem:[%s6694_s7 + $0xc8] sm:$0xff] }
 0x343   : > { %v2999_v53 = vmul.f32 %v2983_v21, %v5717_v36  ;;  %v2843_v19 = vmul.f32 %v3562_v38, %v2842_v6  ;;  %v2850_v5 = vmul.f32 %v3564_v8, %v2849_v41  ;;  %v2632_v28 = vmul.f32 %v6397_v26, %v6337_v43  ;;  %vm2856_vm8 = vmor %vm2854_vm15, %vm2855_vm6  ;;  %3168 = vmatpush.msrb.mxu0 %v3092_v57  ;;  %v3078_v21 = vld [vmem:[%s6694_s7 + $0x78] sm:$0xff]  ;;  %v3121_v57 = vld [vmem:[%s6694_s7 + $0x1d0] sm:$0xff] }
 0x344   : > { %v2478_v34 = vmul.f32 %v6399_v42, %v2477_v22  ;;  %vm2645_vm9 = vcmp.eq.f32.partialorder %v6374_v27, inf  ;;  %vm2647_vm5 = vcmp.eq.f32.partialorder %v6374_v27, 0.0  ;;  %vm2473_vm13 = vweird.f32 %v6372_v15  ;;  %v3110_v6 = vld [vmem:[%s6694_s7 + $0x178] sm:$0xff] }
 0x345   : > { %3054 = vmatpush.msrb.mxu3 %v2999_v53  ;;  %v2847_v12 = vsel %vm2846_vm7, %v3562_v38, %v2843_v19  ;;  %v2851_v36 = vmul.f32 0.5, %v2850_v5  ;;  %v2634_v16 = vsel %vm2633_vm10, %v6337_v43, %v2632_v28  ;;  %3169 = vmatpush.msrb.mxu0 %v3090_v49  ;;  %v2648_v38 = vand.u32 2147483648, %v6374_v27  ;;  %v3108_v19 = vld [vmem:[%s6694_s7 + $0x168] sm:$0xff]  ;;  %v3106_v28 = vld [vmem:[%s6694_s7 + $0x158] sm:$0xff]  ;;  %v3075_v49 = vld [vmem:[%s6694_s7 + $0x60] sm:$0xff] }
 0x346   : > { %v2980_v37 = vmul.f32 %v2847_v12, %v2495_v13  ;;  %v6416_v29 = vsel %vm2635_vm11, %v2636_v47, %v2634_v16  ;;  %v2479_v48 = vmul.f32 0.5, %v2478_v34  ;;  %vm2472_vm3 = vweird.f32 %v6337_v43  ;;  %v3093_v13 = vld [vmem:[%s6694_s7 + $0xf0] sm:$0xff]  ;;  %v3091_v12 = vld [vmem:[%s6694_s7 + $0xe0] sm:$0xff]  ;;  %v3104_v47 = vld [vmem:[%s6694_s7 + $0x148] sm:$0xff] }
 0x347   : > { %v2852_v59 = vsub.f32 1.5, %v2851_v36  ;;  %3567 = vrsqrt.f32 %v6416_v29  ;;  %3170 = vmatpush.msrb.mxu0 %v3088_v23  ;;  %vm2474_vm14 = vmor %vm2472_vm3, %vm2473_vm13  ;;  %vm2824_vm4 = vweird.f32 %v6416_v29  ;;  %vm3017_vm12 = vcmask 523264   ;;  %v3072_v36 = vld [vmem:[%s6694_s7 + $0x48] sm:$0xff]  ;;  %v3089_v16 = vld [vmem:[%s6694_s7 + $0xd0] sm:$0xff] }
 0x348   : > { %v2996_v2 = vmul.f32 %v2980_v37, %v5672_v20  ;;  %v3126_v20 = vld [vmem:[%s6694_s7 + $0x1f8] sm:$0xff]  ;;  %v2480_v10 = vsub.f32 1.5, %v2479_v48  ;;  %v2475_v33 = vsel %vm2474_vm14, %v6372_v15, %v6397_v26  ;;  %v3010_v15 = vld [vmem:[%s6692_s5] sm:$0xff]  ;;  %v3076_v26 = vld [vmem:[%s6694_s7 + $0x68] sm:$0xff]  ;;  %vm2483_vm10 = vweird.f32 %v6399_v42 }
 0x349   : > { %v2853_v7 = vmul.f32 %v3564_v8, %v2852_v59  ;;  %3187 = vmatpush.msrb.mxu1 %v3126_v20  ;;  %3171 = vmatpush.msrb.mxu0 %v3086_v46  ;;  %vm2482_vm0 = vweird.f32 %v6374_v27  ;;  %v3102_v34 = vld [vmem:[%s6694_s7 + $0x138] sm:$0xff]  ;;  %v3085_v48 = vld [vmem:[%s6694_s7 + $0xb0] sm:$0xff]  ;;  %v3123_v20 = vld [vmem:[%s6694_s7 + $0x1e0] sm:$0xff] }
 0x34a   : > { %3035 = vmatpush.msrb.mxu2 %v2996_v2  ;;  %v6447_v4 = vmul.f32 %v6399_v42, %v2480_v10  ;;  %vm2484_vm6 = vmor %vm2482_vm0, %vm2483_vm10  ;;  %v3087_v2 = vld [vmem:[%s6694_s7 + $0xc0] sm:$0xff]  ;;  %v3101_v46 = vld [vmem:[%s6694_s7 + $0x130] sm:$0xff] }
 0x34b   : > { %v2857_v56 = vsel %vm2856_vm8, %v3564_v8, %v2853_v7  ;;  %3188 = vmatpush.msrb.mxu1 %v3124_v62  ;;  %3172 = vmatpush.msrb.mxu0 %v3084_v25  ;;  %v3112_v8 = vld [vmem:[%s6694_s7 + $0x188] sm:$0xff]  ;;  %v3079_v10 = vld [vmem:[%s6694_s7 + $0x80] sm:$0xff]  ;;  %v3065_v25 = vld [vmem:[%s6694_s7 + $0x10] sm:$0xff]  ;;  %vm3208_vm8 = vcmask 130048  }
 0x34c   : > { %v2981_v50 = vmul.f32 %v2857_v56, %v2505_v35  ;;  %v2644_v60 = vmul.f32 %v6447_v4, %v6374_v27  ;;  %v2485_v59 = vsel %vm2484_vm6, %v6399_v42, %v6447_v4  ;;  %v3125_v42 = vld [vmem:[%s6694_s7 + $0x1f0] sm:$0xff]  ;;  %v3119_v62 = vld [vmem:[%s6694_s7 + $0x1c0] sm:$0xff] }
 0x34d   : > { %v3568_v32 = vpop.eup %3567  ;;  %3189 = vmatpush.msrb.mxu1 %v3122_v0  ;;  %3173 = vmatpush.msrb.mxu0 %v3082_v18  ;;  %v3077_v35 = vld [vmem:[%s6694_s7 + $0x70] sm:$0xff]  ;;  %v3071_v23 = vld [vmem:[%s6694_s7 + $0x40] sm:$0xff]  ;;  %v3098_v18 = vld [vmem:[%s6694_s7 + $0x118] sm:$0xff] }
 0x34e   : > { %v2997_v52 = vmul.f32 %v2981_v50, %v5698_v45  ;;  %v2819_v63 = vmul.f32 %v3568_v32, %v6416_v29  ;;  %v2646_v45 = vsel %vm2645_vm9, %v6374_v27, %v2644_v60  ;;  %vm2825_vm2 = vweird.f32 %v3568_v32  ;;  %v3070_v27 = vld [vmem:[%s6694_s7 + $0x38] sm:$0xff]  ;;  %v3117_v56 = vld [vmem:[%s6694_s7 + $0x1b0] sm:$0xff]  ;;  %v3115_v50 = vld [vmem:[%s6694_s7 + $0x1a0] sm:$0xff] }
 0x34f   : > { %v6472_v51 = vsel %vm2647_vm5, %v2648_v38, %v2646_v45  ;;  %3190 = vmatpush.msrb.mxu1 %v3120_v40  ;;  %vm2826_vm7 = vmor %vm2824_vm4, %vm2825_vm2  ;;  %3174 = vmatpush.msrb.mxu0 %v3080_v58  ;;  %v3073_v4 = vld [vmem:[%s6694_s7 + $0x50] sm:$0xff]  ;;  %v3107_v40 = vld [vmem:[%s6694_s7 + $0x160] sm:$0xff]  ;;  %v3015_v58 = vpop.permute.xlu0 %3014 }
 0x350   : > { %3055 = vmatpush.msrb.mxu3 %v2997_v52  ;;  %v2820_v31 = vmul.f32 %v3568_v32, %v2819_v63  ;;  %3569 = vrsqrt.f32 %v6472_v51  ;;  %vm2834_vm1 = vweird.f32 %v6472_v51  ;;  %v3113_v0 = vld [vmem:[%s6694_s7 + $0x190] sm:$0xff]  ;;  %v3103_v38 = vld [vmem:[%s6694_s7 + $0x140] sm:$0xff] }
 0x351   : > { %3191 = vmatpush.msrb.mxu1 %v3118_v61  ;;  %3175 = vmatpush.msrb.mxu0 %v3078_v21  ;;  %v3069_v52 = vld [vmem:[%s6694_s7 + $0x30] sm:$0xff]  ;;  %v3067_v45 = vld [vmem:[%s6694_s7 + $0x20] sm:$0xff] }
 0x352   : > { %v2821_v9 = vmul.f32 0.5, %v2820_v31  ;;  %v3109_v60 = vld [vmem:[%s6694_s7 + $0x170] sm:$0xff]  ;;  %v3099_v61 = vld [vmem:[%s6694_s7 + $0x120] sm:$0xff]  ;;  %v3068_v31 = vld [vmem:[%s6694_s7 + $0x28] sm:$0xff] }
 0x353   : > { %3192 = vmatpush.msrb.mxu1 %v3116_v30  ;;  %3176 = vmatpush.msrb.mxu0 %v3076_v26  ;;  %v3105_v63 = vld [vmem:[%s6694_s7 + $0x150] sm:$0xff] }
 0x354   : > { %v2822_v14 = vsub.f32 1.5, %v2821_v9  ;;  %v3097_v30 = vld [vmem:[%s6694_s7 + $0x110] sm:$0xff]  ;;  %v3066_v9 = vld [vmem:[%s6694_s7 + $0x18] sm:$0xff] }
 0x355   : > { %3193 = vmatpush.msrb.mxu1 %v3114_v24  ;;  %v3063_v24 = vld [vmem:[%s6694_s7] sm:$0xff] }
 0x356   : > { %v2823_v54 = vmul.f32 %v3568_v32, %v2822_v14  ;;  %v3570_v3 = vpop.eup %3569  ;;  %v3095_v14 = vld [vmem:[%s6694_s7 + $0x100] sm:$0xff] }
 0x357   : > { %v2829_v1 = vmul.f32 %v3570_v3, %v6472_v51  ;;  %3194 = vmatpush.msrb.mxu1 %v3112_v8  ;;  %vm2835_vm11 = vweird.f32 %v3570_v3  ;;  %v3100_v51 = vld [vmem:[%s6694_s7 + $0x128] sm:$0xff] }
 0x358   : > { %v2827_v43 = vsel %vm2826_vm7, %v3568_v32, %v2823_v54  ;;  %vm2836_vm15 = vmor %vm2834_vm1, %vm2835_vm11  ;;  %v3111_v32 = vld [vmem:[%s6694_s7 + $0x180] sm:$0xff]  ;;  %v3064_v54 = vld [vmem:[%s6694_s7 + $0x8] sm:$0xff] }
 0x359   : > { %v2978_v39 = vmul.f32 %v2827_v43, %v2475_v33  ;;  %v2830_v41 = vmul.f32 %v3570_v3, %v2829_v1  ;;  %3195 = vmatpush.msrb.mxu1 %v3110_v6 }
 0x35b   : > { %v2994_v53 = vmul.f32 %v2978_v39, %v5666_v17  ;;  %v2831_v5 = vmul.f32 0.5, %v2830_v41  ;;  %3196 = vmatpush.msrb.mxu1 %v3108_v19  ;;  %v3074_v17 = vld [vmem:[%s6694_s7 + $0x58] sm:$0xff] }
 0x35c   : > { %3177 = vmatpush.msrb.mxu0 %v3074_v17 }
 0x35d   : > { %3036 = vmatpush.msrb.mxu2 %v2994_v53  ;;  %v2832_v22 = vsub.f32 1.5, %v2831_v5  ;;  %3197 = vmatpush.msrb.mxu1 %v3106_v28 }
 0x35e   : > { %3327 = vmatmul.msk.f32.vlgmr.msrb.gmra.mxu2 %vm3017_vm12, %v3010_v15  ;;  %3178 = vmatpush.msrb.mxu0 %v3072_v36 }
 0x35f   : > { %3127 = vmatpush.msra.mxu2 %v3093_v13  ;;  %v2833_v37 = vmul.f32 %v3570_v3, %v2832_v22  ;;  %3198 = vmatpush.msrb.mxu1 %v3104_v47 }
 0x360   : > { %3179 = vmatpush.msrb.mxu0 %v3070_v27 }
 0x361   : > { %3128 = vmatpush.msra.mxu2 %v3091_v12  ;;  %v2837_v29 = vsel %vm2836_vm15, %v3570_v3, %v2833_v37  ;;  %3199 = vmatpush.msrb.mxu1 %v3102_v34  ;;  %v3096_v3 = vld [vmem:[%s6694_s7 + $0x108] sm:$0xff] }
 0x362   : > { %v2979_v44 = vmul.f32 %v2837_v29, %v2485_v59  ;;  %3180 = vmatpush.msrb.mxu0 %v3068_v31 }
 0x363   : > { %3129 = vmatpush.msra.mxu2 %v3089_v16  ;;  %3200 = vmatpush.msrb.mxu1 %v3100_v51 }
 0x364   : > { %v2995_v7 = vmul.f32 %v2979_v44, %v5696_v11  ;;  %v3081_v11 = vld [vmem:[%s6694_s7 + $0x90] sm:$0xff]  ;;  %3181 = vmatpush.msrb.mxu0 %v3066_v9 }
 0x365   : > { %3130 = vmatpush.msra.mxu2 %v3087_v2  ;;  %3201 = vmatpush.msrb.mxu1 %v3098_v18 }
 0x366   : > { %3056 = vmatpush.msrb.mxu3 %v2995_v7  ;;  %3182 = vmatpush.msrb.mxu0 %v3064_v54 }
 0x367   : > { %3131 = vmatpush.msra.mxu2 %v3085_v48  ;;  %3328 = vmatmul.msk.f32.vlgmr.msrb.gmra.mxu3 %vm3017_vm12, %v3010_v15 }
 0x368   : > { %3147 = vmatpush.msra.mxu3 %v3125_v42  ;;  %3202 = vmatpush.msrb.mxu1 %v3096_v3 }
 0x369   : > { %3132 = vmatpush.msra.mxu2 %v3083_v55 }
 0x36a   : > { %3148 = vmatpush.msra.mxu3 %v3123_v20 }
 0x36b   : > { %3133 = vmatpush.msra.mxu2 %v3081_v11 }
 0x36c   : > { %3149 = vmatpush.msra.mxu3 %v3121_v57 }
 0x36d   : > { %3134 = vmatpush.msra.mxu2 %v3079_v10 }
 0x36e   : > { %3150 = vmatpush.msra.mxu3 %v3119_v62 }
 0x36f   : > { %3135 = vmatpush.msra.mxu2 %v3077_v35 }
 0x370   : > { %3151 = vmatpush.msra.mxu3 %v3117_v56 }
 0x371   : > { %3136 = vmatpush.msra.mxu2 %v3075_v49 }
 0x372   : > { %3152 = vmatpush.msra.mxu3 %v3115_v50 }
 0x373   : > { %3137 = vmatpush.msra.mxu2 %v3073_v4 }
 0x374   : > { %3153 = vmatpush.msra.mxu3 %v3113_v0 }
 0x375   : > { %3138 = vmatpush.msra.mxu2 %v3071_v23 }
 0x376   : > { %3154 = vmatpush.msra.mxu3 %v3111_v32 }
 0x377   : > { %3139 = vmatpush.msra.mxu2 %v3069_v52 }
 0x378   : > { %3155 = vmatpush.msra.mxu3 %v3109_v60 }
 0x379   : > { %3140 = vmatpush.msra.mxu2 %v3067_v45 }
 0x37a   : > { %3156 = vmatpush.msra.mxu3 %v3107_v40 }
 0x37b   : > { %3141 = vmatpush.msra.mxu2 %v3065_v25 }
 0x37c   : > { %3157 = vmatpush.msra.mxu3 %v3105_v63 }
 0x37d   : > { %3142 = vmatpush.msra.mxu2 %v3063_v24 }
 0x37e   : > { %3158 = vmatpush.msra.mxu3 %v3103_v38 }
 0x380   : > { %3159 = vmatpush.msra.mxu3 %v3101_v46 }
 0x382   : > { %3160 = vmatpush.msra.mxu3 %v3099_v61 }
 0x384   : > { %3161 = vmatpush.msra.mxu3 %v3097_v30 }
 0x386   : > { %3162 = vmatpush.msra.mxu3 %v3095_v14 }
 0x3e1   : > { %v3038_v8 = vpop.f32.mrf.mxu2 }
 0x3e2   : > { %v3039_v33 = vadd.f32 %v3038_v8, %v3015_v58 }
 0x3e4   : > { %v3061_v43 = vmax.f32 %v3039_v33, 0.0 }
 0x3e6   : > { %3143 = vmatmul.f32.vlgmr.msra.gmra.mxu2 %v3061_v43  ;;  %3183 = vmatmul.f32.vlgmr.msrb.gmra.mxu0 %v3061_v43 }
 0x3ea   : > { %v3058_v1 = vpop.f32.mrf.mxu3 }
 0x3eb   : > { %v3059_v39 = vadd.f32 %v3058_v1, %v3015_v58 }
 0x3ed   : > { %v3062_v21 = vmax.f32 %v3059_v39, 0.0 }
 0x3ef   : > { %3163 = vmatmul.f32.vlgmr.msra.gmra.mxu3 %v3062_v21  ;;  %3203 = vmatmul.f32.vlgmr.msrb.gmra.mxu1 %v3062_v21 }
 0x463   : > { %v3184_v6 = vpop.f32.mrf.mxu0 }
 0x469   : > { %v3144_v15 = vpop.f32.mrf.mxu2 }
 0x46c   : > { %v3204_v41 = vpop.f32.mrf.mxu1 }
 0x46d   : > { %v3205_v53 = vadd.f32 %v3204_v41, %v3184_v6 }
 0x46f   : > { %3209 = vst.msk [vmem:[%s298_s22 + $0x8] sm:$0xff] %vm3208_vm8, %v3205_v53 }
 0x472   : > { %v3164_v26 = vpop.f32.mrf.mxu3 }
 0x473   : > { %v3165_v19 = vadd.f32 %v3164_v26, %v3144_v15 }
 0x475   : > { %3207 = vst [vmem:[%s298_s22] sm:$0xff] %v3165_v19 }
 0x476   : > { %3598 = shalt.err (!%p3595_p3)
}
 0x477   : > { %3336 = dma.vmem_to_hbm [thread:$0]  (%p3719_p5), %s3225_s23, 256, %s3227_s24, %s3211_s25  }
 0x478 PF: > { %p3342_p4 = scmp.ge.s32.totalorder %s3633_s30, 2  ;;  %s3238_s13 = sand.u32 1, %s3621_s27  }
 0x479   : > { %s3239_s20 = scalar_lea.sflag [#allocation3], %s3238_s13 }
 0x47a   : > { %p3339_p7 = pnand %p3342_p4, %p3723_p6 }
 0x47c   : > { %p3340_p8 = pneg %p3339_p7 }
 0x47e   : > { %3616 = dma.done.wait (%p3340_p8), %s3239_s20, 256  }
 0x47f   : > { %3618 = vsyncadd (%p3340_p8), %s3239_s20, 4294967040  ;;  %p18_p9 = scmp.ge.s32.totalorder %s3706_s11, 4   ;;  %s7048_s27 = smov %s3625_s28 }
 0x480   : > { %s7049_s28 = smov %s3629_s29  ;;  %s7050_s29 = smov %s3717_s14 }
 0x481   : > { %s7051_s30 = smov %s3706_s11  ;;  %20 = sbr.rel (!%p18_p9) target bundleno = 3 (0x3), region = 87 }
 0x486   :  { %3245 = vsyncpa [#allocation3], 1 }
 0x487   :  { %3247 = vsyncpa [#allocation3 + $0x1], 1 }

</bundles_post_ra>
